<compile_context>
chip_gen: v5e
topology: v5e:2x2
jax: 0.10.0
libtpu: 0.0.40
codegen_flags: <defaults>
</compile_context>

<pallas_src>
import math
import numpy as np
import jax
import jax.numpy as jnp
from jax.experimental import pallas as pl
from jax.experimental.pallas import tpu as pltpu

# ---- Transconfig (fixed by the PyTorch module) --------------------------------
D_MODEL = 7
D_FF = 2048
D_K = 128
D_V = 128
N_LAYERS = 6
N_HEADS = 8
LN_EPS = 1e-5


def _layernorm(z):
    # torch.nn.LayerNorm(d_model) with default weight=1, bias=0, eps=1e-5,
    # biased variance (divide by N).
    mu = jnp.mean(z, axis=-1, keepdims=True)
    var = jnp.mean((z - mu) ** 2, axis=-1, keepdims=True)
    return (z - mu) * jax.lax.rsqrt(var + LN_EPS)


def _make_encoder_stack_kernel(B, S):
    scale = 1.0 / math.sqrt(D_K)

    def kernel(x_ref, wq_ref, wk_ref, wv_ref, wo_ref, w1_ref, w2_ref,
               out_ref, attn_ref, h_ref):
        layer = pl.program_id(0)

        # Layer 0: load the (pos-encoded) input into the persistent carry.
        @pl.when(layer == 0)
        def _():
            h_ref[...] = x_ref[...]

        x = h_ref[...]                                  # (B*S, D_MODEL), f32
        wq = wq_ref[0]                                  # (D_MODEL, H*D_K)
        wk = wk_ref[0]
        wv = wv_ref[0]
        wo = wo_ref[0]                                  # (H*D_V, D_MODEL)
        w1 = w1_ref[0]                                  # (D_MODEL, D_FF)
        w2 = w2_ref[0]                                  # (D_FF, D_MODEL)

        # ---- fused Q/K/V projections: one whole-width matmul each ----------
        q = jnp.dot(x, wq, preferred_element_type=jnp.float32)  # (B*S, H*D_K)
        k = jnp.dot(x, wk, preferred_element_type=jnp.float32)  # (B*S, H*D_K)
        v = jnp.dot(x, wv, preferred_element_type=jnp.float32)  # (B*S, H*D_V)

        # ---- scaled-dot-product scores for every (batch, head) --------------
        # (per-(b,h) 8x128 @ 128x8 matmuls are inherent to the math; all other
        #  work — softmax, store, projections — is done on the fused arrays)
        score_list = []
        for b in range(B):
            qb = q[b * S:(b + 1) * S, :]
            kb = k[b * S:(b + 1) * S, :]
            for hd in range(N_HEADS):
                qh = qb[:, hd * D_K:(hd + 1) * D_K]          # (S, D_K)
                kh = kb[:, hd * D_K:(hd + 1) * D_K]          # (S, D_K)
                score_list.append(
                    jnp.dot(qh, kh.T, preferred_element_type=jnp.float32))
        scores = jnp.stack(score_list, axis=0) * scale        # (B*H, S, S)

        # ---- softmax (stable); reciprocal runs on the EUP -------------------
        scores = scores - jnp.max(scores, axis=-1, keepdims=True)
        e = jnp.exp(scores)
        denom = jnp.sum(e, axis=-1, keepdims=True)
        p = e * pl.reciprocal(denom, approx=True)             # (B*H, S, S)

        # single full-block store of all attention probabilities for this layer
        attn_ref[0] = p.astype(attn_ref.dtype)

        # ---- context, concatenated to (B*S, H*D_V); ONE W_O matmul ----------
        ctx_rows = []
        for b in range(B):
            vb = v[b * S:(b + 1) * S, :]
            heads = []
            for hd in range(N_HEADS):
                ph = p[b * N_HEADS + hd]                      # (S, S)
                vh = vb[:, hd * D_V:(hd + 1) * D_V]           # (S, D_V)
                heads.append(
                    jnp.dot(ph, vh, preferred_element_type=jnp.float32))
            ctx_rows.append(jnp.concatenate(heads, axis=1))   # (S, H*D_V)
        ctx = jnp.concatenate(ctx_rows, axis=0)               # (B*S, H*D_V)

        attn_out = jnp.dot(ctx, wo, preferred_element_type=jnp.float32)
        y1 = _layernorm(attn_out + x)                         # (B*S, D_MODEL)

        # ---- position-wise FFN ----------------------------------------------
        ff_hidden = jnp.maximum(
            jnp.dot(y1, w1, preferred_element_type=jnp.float32), 0.0)
        ffn = jnp.dot(ff_hidden, w2, preferred_element_type=jnp.float32)
        y2 = _layernorm(ffn + y1)

        # carry to the next layer
        h_ref[...] = y2

        @pl.when(layer == pl.num_programs(0) - 1)
        def _():
            out_ref[...] = y2.astype(out_ref.dtype)

    return kernel


def encoder_stack(x_flat, wq, wk, wv, wo, w1, w2, *, B, S):
    """Run all N_LAYERS encoder layers in a single pallas_call.

    x_flat: (B*S, D_MODEL) pos-encoded input tokens.
    Weights carry a leading N_LAYERS dimension.
    Returns (out_flat (B*S, D_MODEL), attn (N_LAYERS, B*N_HEADS, S, S)).
    """
    n_tok = B * S
    n_layers = wq.shape[0]
    kernel = _make_encoder_stack_kernel(B, S)

    grid_spec = pltpu.PrefetchScalarGridSpec(
        num_scalar_prefetch=0,
        grid=(n_layers,),
        in_specs=[
            pl.BlockSpec((n_tok, D_MODEL), lambda l: (0, 0)),            # x
            pl.BlockSpec((1, D_MODEL, N_HEADS * D_K), lambda l: (l, 0, 0)),  # W_Q
            pl.BlockSpec((1, D_MODEL, N_HEADS * D_K), lambda l: (l, 0, 0)),  # W_K
            pl.BlockSpec((1, D_MODEL, N_HEADS * D_V), lambda l: (l, 0, 0)),  # W_V
            pl.BlockSpec((1, N_HEADS * D_V, D_MODEL), lambda l: (l, 0, 0)),  # W_O
            pl.BlockSpec((1, D_MODEL, D_FF), lambda l: (l, 0, 0)),           # W1
            pl.BlockSpec((1, D_FF, D_MODEL), lambda l: (l, 0, 0)),           # W2
        ],
        out_specs=[
            pl.BlockSpec((n_tok, D_MODEL), lambda l: (0, 0)),                # out
            pl.BlockSpec((1, B * N_HEADS, S, S), lambda l: (l, 0, 0, 0)),    # attn
        ],
        scratch_shapes=[pltpu.VMEM((n_tok, D_MODEL), jnp.float32)],          # carry
    )

    out, attn = pl.pallas_call(
        kernel,
        grid_spec=grid_spec,
        out_shape=(
            jax.ShapeDtypeStruct((n_tok, D_MODEL), jnp.float32),
            jax.ShapeDtypeStruct((n_layers, B * N_HEADS, S, S), jnp.float32),
        ),
        compiler_params=pltpu.CompilerParams(
            dimension_semantics=("arbitrary",)),  # layers are sequential (carry)
    )(x_flat, wq, wk, wv, wo, w1, w2)
    return out, attn


# ---- PositionalEncoding table (exact numpy replica of the PyTorch init) -------
def make_pos_table(max_len, d_model):
    pos_table = np.array(
        [[pos / np.power(10000, 2 * i / d_model) for i in range(d_model)]
         if pos != 0 else np.zeros(d_model)
         for pos in range(max_len)])
    pos_table[1:, 0::2] = np.sin(pos_table[1:, 0::2])
    pos_table[1:, 1::2] = np.cos(pos_table[1:, 1::2])
    return jnp.asarray(pos_table, dtype=jnp.float32)


# ---- Parameter init (deterministic, torch.nn.Linear-style uniform) ------------
def init_params(key):
    def linear(k, fan_in, fan_out):
        bound = 1.0 / math.sqrt(fan_in)
        return jax.random.uniform(k, (N_LAYERS, fan_in, fan_out), jnp.float32,
                                  minval=-bound, maxval=bound)

    k1, k2, k3, k4, k5, k6 = jax.random.split(key, 6)
    return dict(
        wq=linear(k1, D_MODEL, N_HEADS * D_K),
        wk=linear(k2, D_MODEL, N_HEADS * D_K),
        wv=linear(k3, D_MODEL, N_HEADS * D_V),
        wo=linear(k4, N_HEADS * D_V, D_MODEL),
        w1=linear(k5, D_MODEL, D_FF),
        w2=linear(k6, D_FF, D_MODEL),
    )


# ---- Full Encoder forward ------------------------------------------------------
def encoder_forward(enc_inputs, params, pos_table):
    B, S, D = enc_inputs.shape
    assert D == D_MODEL
    # positional encoding add (dropout = identity, eval semantics)
    h = (enc_inputs + pos_table[:S, :]).reshape(B * S, D)
    out_flat, attn_all = encoder_stack(
        h, params["wq"], params["wk"], params["wv"],
        params["wo"], params["w1"], params["w2"], B=B, S=S)
    out = out_flat.reshape(B, S, D)
    attn_all = attn_all.reshape(N_LAYERS, B, N_HEADS, S, S)
    attns = [attn_all[l] for l in range(N_LAYERS)]
    return out, attns


if __name__ == "__main__":
    key = jax.random.PRNGKey(0)
    k_in, k_par = jax.random.split(key)

    B, S = 2, 8  # small example; d_model fixed at 7 by Transconfig
    x = jax.random.normal(k_in, (B, S, D_MODEL), dtype=jnp.float32)

    params = init_params(k_par)
    pos_table = make_pos_table(max_len=64, d_model=D_MODEL)

    fwd = jax.jit(encoder_forward)
    out, attns = fwd(x, params, pos_table)
    out = jax.block_until_ready(out)
    attns = [jax.block_until_ready(a) for a in attns]

    assert out.shape == (B, S, D_MODEL)
    assert len(attns) == N_LAYERS
    assert attns[0].shape == (B, N_HEADS, S, S)
    assert bool(jnp.all(jnp.isfinite(out)))
    assert bool(jnp.all(jnp.isfinite(attns[-1])))
    print("KERNEL_OK")
</pallas_src>

<mosaic_0001>
module attributes {stable_mosaic.version = 11 : i64} {
  func.func @kernel(%arg0: i32, %arg1: memref<16x7xf32, #tpu.memory_space<vmem>>, %arg2: memref<1x7x1024xf32, #tpu.memory_space<vmem>>, %arg3: memref<1x7x1024xf32, #tpu.memory_space<vmem>>, %arg4: memref<1x7x1024xf32, #tpu.memory_space<vmem>>, %arg5: memref<1x1024x7xf32, #tpu.memory_space<vmem>>, %arg6: memref<1x7x2048xf32, #tpu.memory_space<vmem>>, %arg7: memref<1x2048x7xf32, #tpu.memory_space<vmem>>, %arg8: memref<16x7xf32, #tpu.memory_space<vmem>>, %arg9: memref<1x16x8x8xf32, #tpu.memory_space<vmem>>, %arg10: memref<16x7xf32, #tpu.memory_space<vmem>>) attributes {dimension_semantics = [#tpu.dimension_semantics<arbitrary>], iteration_bounds = array<i64: 6>, scalar_prefetch = 0 : i64, scratch_operands = 1 : i64, tpu.core_type = #tpu.core_type<tc>, window_params = [{pipeline_mode = #tpu.pipeline_mode<synchronous>, transform_indices = @transform_0, window_bounds = array<i64: 16, 7>}, {transform_indices = @transform_1, window_bounds = array<i64: 1, 7, 1024>}, {transform_indices = @transform_2, window_bounds = array<i64: 1, 7, 1024>}, {transform_indices = @transform_3, window_bounds = array<i64: 1, 7, 1024>}, {transform_indices = @transform_4, window_bounds = array<i64: 1, 1024, 7>}, {transform_indices = @transform_5, window_bounds = array<i64: 1, 7, 2048>}, {transform_indices = @transform_6, window_bounds = array<i64: 1, 2048, 7>}, {pipeline_mode = #tpu.pipeline_mode<synchronous>, transform_indices = @transform_7, window_bounds = array<i64: 16, 7>}, {transform_indices = @transform_8, window_bounds = array<i64: 1, 16, 8, 8>}]} {
    %c0_i32 = arith.constant 0 : i32
    %0 = arith.cmpi eq, %arg0, %c0_i32 : i32
    %1 = arith.extui %0 : i1 to i32
    %c0_i32_0 = arith.constant 0 : i32
    %2 = arith.cmpi ne, %1, %c0_i32_0 : i32
    scf.if %2 {
      %c0_78 = arith.constant 0 : index
      %c0_79 = arith.constant 0 : index
      %235 = vector.load %arg1[%c0_78, %c0_79] : memref<16x7xf32, #tpu.memory_space<vmem>>, vector<16x7xf32>
      %c0_80 = arith.constant 0 : index
      %c0_81 = arith.constant 0 : index
      %236 = vector.load %arg10[%c0_80, %c0_81] : memref<16x7xf32, #tpu.memory_space<vmem>>, vector<16x7xf32>
      tpu.vector_store %arg10[%c0_80, %c0_81], %235 {strides = array<i32>} : memref<16x7xf32, #tpu.memory_space<vmem>>, vector<16x7xf32>,
    } else {
    }
    %c0 = arith.constant 0 : index
    %c0_1 = arith.constant 0 : index
    %3 = vector.load %arg10[%c0, %c0_1] : memref<16x7xf32, #tpu.memory_space<vmem>>, vector<16x7xf32>
    %c0_2 = arith.constant 0 : index
    %c0_3 = arith.constant 0 : index
    %c0_4 = arith.constant 0 : index
    %4 = vector.load %arg2[%c0_2, %c0_3, %c0_4] : memref<1x7x1024xf32, #tpu.memory_space<vmem>>, vector<1x7x1024xf32>
    %5 = vector.shape_cast %4 : vector<1x7x1024xf32> to vector<7x1024xf32>
    %c0_5 = arith.constant 0 : index
    %c0_6 = arith.constant 0 : index
    %c0_7 = arith.constant 0 : index
    %6 = vector.load %arg3[%c0_5, %c0_6, %c0_7] : memref<1x7x1024xf32, #tpu.memory_space<vmem>>, vector<1x7x1024xf32>
    %7 = vector.shape_cast %6 : vector<1x7x1024xf32> to vector<7x1024xf32>
    %c0_8 = arith.constant 0 : index
    %c0_9 = arith.constant 0 : index
    %c0_10 = arith.constant 0 : index
    %8 = vector.load %arg4[%c0_8, %c0_9, %c0_10] : memref<1x7x1024xf32, #tpu.memory_space<vmem>>, vector<1x7x1024xf32>
    %9 = vector.shape_cast %8 : vector<1x7x1024xf32> to vector<7x1024xf32>
    %c0_11 = arith.constant 0 : index
    %c0_12 = arith.constant 0 : index
    %c0_13 = arith.constant 0 : index
    %10 = vector.load %arg5[%c0_11, %c0_12, %c0_13] : memref<1x1024x7xf32, #tpu.memory_space<vmem>>, vector<1x1024x7xf32>
    %11 = vector.shape_cast %10 : vector<1x1024x7xf32> to vector<1024x7xf32>
    %c0_14 = arith.constant 0 : index
    %c0_15 = arith.constant 0 : index
    %c0_16 = arith.constant 0 : index
    %12 = vector.load %arg6[%c0_14, %c0_15, %c0_16] : memref<1x7x2048xf32, #tpu.memory_space<vmem>>, vector<1x7x2048xf32>
    %13 = vector.shape_cast %12 : vector<1x7x2048xf32> to vector<7x2048xf32>
    %c0_17 = arith.constant 0 : index
    %c0_18 = arith.constant 0 : index
    %c0_19 = arith.constant 0 : index
    %14 = vector.load %arg7[%c0_17, %c0_18, %c0_19] : memref<1x2048x7xf32, #tpu.memory_space<vmem>>, vector<1x2048x7xf32>
    %15 = vector.shape_cast %14 : vector<1x2048x7xf32> to vector<2048x7xf32>
    %cst = arith.constant dense<0.000000e+00> : vector<16x1024xf32>
    %16 = tpu.matmul %3, %5, %cst {dimension_numbers = #tpu.dot_dimension_numbers<[1], [0], [0], [1], [0, 0, 1, 1], [], []>} : vector<16x7xf32>, vector<7x1024xf32>, vector<16x1024xf32> -> vector<16x1024xf32>
    %cst_20 = arith.constant dense<0.000000e+00> : vector<16x1024xf32>
    %17 = tpu.matmul %3, %7, %cst_20 {dimension_numbers = #tpu.dot_dimension_numbers<[1], [0], [0], [1], [0, 0, 1, 1], [], []>} : vector<16x7xf32>, vector<7x1024xf32>, vector<16x1024xf32> -> vector<16x1024xf32>
    %cst_21 = arith.constant dense<0.000000e+00> : vector<16x1024xf32>
    %18 = tpu.matmul %3, %9, %cst_21 {dimension_numbers = #tpu.dot_dimension_numbers<[1], [0], [0], [1], [0, 0, 1, 1], [], []>} : vector<16x7xf32>, vector<7x1024xf32>, vector<16x1024xf32> -> vector<16x1024xf32>
    %19 = vector.extract_strided_slice %16 {offsets = [0, 0], sizes = [8, 1024], strides = [1, 1]} : vector<16x1024xf32> to vector<8x1024xf32>
    %20 = vector.extract_strided_slice %17 {offsets = [0, 0], sizes = [8, 1024], strides = [1, 1]} : vector<16x1024xf32> to vector<8x1024xf32>
    %21 = vector.extract_strided_slice %19 {offsets = [0, 0], sizes = [8, 128], strides = [1, 1]} : vector<8x1024xf32> to vector<8x128xf32>
    %22 = vector.extract_strided_slice %20 {offsets = [0, 0], sizes = [8, 128], strides = [1, 1]} : vector<8x1024xf32> to vector<8x128xf32>
    %23 = tpu.transpose %22, [1, 0] : vector<8x128xf32> -> vector<128x8xf32>
    %cst_22 = arith.constant dense<0.000000e+00> : vector<8x8xf32>
    %24 = tpu.matmul %21, %23, %cst_22 {dimension_numbers = #tpu.dot_dimension_numbers<[1], [0], [0], [1], [0, 0, 1, 1], [], []>} : vector<8x128xf32>, vector<128x8xf32>, vector<8x8xf32> -> vector<8x8xf32>
    %25 = vector.extract_strided_slice %19 {offsets = [0, 128], sizes = [8, 128], strides = [1, 1]} : vector<8x1024xf32> to vector<8x128xf32>
    %26 = vector.extract_strided_slice %20 {offsets = [0, 128], sizes = [8, 128], strides = [1, 1]} : vector<8x1024xf32> to vector<8x128xf32>
    %27 = tpu.transpose %26, [1, 0] : vector<8x128xf32> -> vector<128x8xf32>
    %cst_23 = arith.constant dense<0.000000e+00> : vector<8x8xf32>
    %28 = tpu.matmul %25, %27, %cst_23 {dimension_numbers = #tpu.dot_dimension_numbers<[1], [0], [0], [1], [0, 0, 1, 1], [], []>} : vector<8x128xf32>, vector<128x8xf32>, vector<8x8xf32> -> vector<8x8xf32>
    %29 = vector.extract_strided_slice %19 {offsets = [0, 256], sizes = [8, 128], strides = [1, 1]} : vector<8x1024xf32> to vector<8x128xf32>
    %30 = vector.extract_strided_slice %20 {offsets = [0, 256], sizes = [8, 128], strides = [1, 1]} : vector<8x1024xf32> to vector<8x128xf32>
    %31 = tpu.transpose %30, [1, 0] : vector<8x128xf32> -> vector<128x8xf32>
    %cst_24 = arith.constant dense<0.000000e+00> : vector<8x8xf32>
    %32 = tpu.matmul %29, %31, %cst_24 {dimension_numbers = #tpu.dot_dimension_numbers<[1], [0], [0], [1], [0, 0, 1, 1], [], []>} : vector<8x128xf32>, vector<128x8xf32>, vector<8x8xf32> -> vector<8x8xf32>
    %33 = vector.extract_strided_slice %19 {offsets = [0, 384], sizes = [8, 128], strides = [1, 1]} : vector<8x1024xf32> to vector<8x128xf32>
    %34 = vector.extract_strided_slice %20 {offsets = [0, 384], sizes = [8, 128], strides = [1, 1]} : vector<8x1024xf32> to vector<8x128xf32>
    %35 = tpu.transpose %34, [1, 0] : vector<8x128xf32> -> vector<128x8xf32>
    %cst_25 = arith.constant dense<0.000000e+00> : vector<8x8xf32>
    %36 = tpu.matmul %33, %35, %cst_25 {dimension_numbers = #tpu.dot_dimension_numbers<[1], [0], [0], [1], [0, 0, 1, 1], [], []>} : vector<8x128xf32>, vector<128x8xf32>, vector<8x8xf32> -> vector<8x8xf32>
    %37 = vector.extract_strided_slice %19 {offsets = [0, 512], sizes = [8, 128], strides = [1, 1]} : vector<8x1024xf32> to vector<8x128xf32>
    %38 = vector.extract_strided_slice %20 {offsets = [0, 512], sizes = [8, 128], strides = [1, 1]} : vector<8x1024xf32> to vector<8x128xf32>
    %39 = tpu.transpose %38, [1, 0] : vector<8x128xf32> -> vector<128x8xf32>
    %cst_26 = arith.constant dense<0.000000e+00> : vector<8x8xf32>
    %40 = tpu.matmul %37, %39, %cst_26 {dimension_numbers = #tpu.dot_dimension_numbers<[1], [0], [0], [1], [0, 0, 1, 1], [], []>} : vector<8x128xf32>, vector<128x8xf32>, vector<8x8xf32> -> vector<8x8xf32>
    %41 = vector.extract_strided_slice %19 {offsets = [0, 640], sizes = [8, 128], strides = [1, 1]} : vector<8x1024xf32> to vector<8x128xf32>
    %42 = vector.extract_strided_slice %20 {offsets = [0, 640], sizes = [8, 128], strides = [1, 1]} : vector<8x1024xf32> to vector<8x128xf32>
    %43 = tpu.transpose %42, [1, 0] : vector<8x128xf32> -> vector<128x8xf32>
    %cst_27 = arith.constant dense<0.000000e+00> : vector<8x8xf32>
    %44 = tpu.matmul %41, %43, %cst_27 {dimension_numbers = #tpu.dot_dimension_numbers<[1], [0], [0], [1], [0, 0, 1, 1], [], []>} : vector<8x128xf32>, vector<128x8xf32>, vector<8x8xf32> -> vector<8x8xf32>
    %45 = vector.extract_strided_slice %19 {offsets = [0, 768], sizes = [8, 128], strides = [1, 1]} : vector<8x1024xf32> to vector<8x128xf32>
    %46 = vector.extract_strided_slice %20 {offsets = [0, 768], sizes = [8, 128], strides = [1, 1]} : vector<8x1024xf32> to vector<8x128xf32>
    %47 = tpu.transpose %46, [1, 0] : vector<8x128xf32> -> vector<128x8xf32>
    %cst_28 = arith.constant dense<0.000000e+00> : vector<8x8xf32>
    %48 = tpu.matmul %45, %47, %cst_28 {dimension_numbers = #tpu.dot_dimension_numbers<[1], [0], [0], [1], [0, 0, 1, 1], [], []>} : vector<8x128xf32>, vector<128x8xf32>, vector<8x8xf32> -> vector<8x8xf32>
    %49 = vector.extract_strided_slice %19 {offsets = [0, 896], sizes = [8, 128], strides = [1, 1]} : vector<8x1024xf32> to vector<8x128xf32>
    %50 = vector.extract_strided_slice %20 {offsets = [0, 896], sizes = [8, 128], strides = [1, 1]} : vector<8x1024xf32> to vector<8x128xf32>
    %51 = tpu.transpose %50, [1, 0] : vector<8x128xf32> -> vector<128x8xf32>
    %cst_29 = arith.constant dense<0.000000e+00> : vector<8x8xf32>
    %52 = tpu.matmul %49, %51, %cst_29 {dimension_numbers = #tpu.dot_dimension_numbers<[1], [0], [0], [1], [0, 0, 1, 1], [], []>} : vector<8x128xf32>, vector<128x8xf32>, vector<8x8xf32> -> vector<8x8xf32>
    %53 = vector.extract_strided_slice %16 {offsets = [8, 0], sizes = [8, 1024], strides = [1, 1]} : vector<16x1024xf32> to vector<8x1024xf32>
    %54 = vector.extract_strided_slice %17 {offsets = [8, 0], sizes = [8, 1024], strides = [1, 1]} : vector<16x1024xf32> to vector<8x1024xf32>
    %55 = vector.extract_strided_slice %53 {offsets = [0, 0], sizes = [8, 128], strides = [1, 1]} : vector<8x1024xf32> to vector<8x128xf32>
    %56 = vector.extract_strided_slice %54 {offsets = [0, 0], sizes = [8, 128], strides = [1, 1]} : vector<8x1024xf32> to vector<8x128xf32>
    %57 = tpu.transpose %56, [1, 0] : vector<8x128xf32> -> vector<128x8xf32>
    %cst_30 = arith.constant dense<0.000000e+00> : vector<8x8xf32>
    %58 = tpu.matmul %55, %57, %cst_30 {dimension_numbers = #tpu.dot_dimension_numbers<[1], [0], [0], [1], [0, 0, 1, 1], [], []>} : vector<8x128xf32>, vector<128x8xf32>, vector<8x8xf32> -> vector<8x8xf32>
    %59 = vector.extract_strided_slice %53 {offsets = [0, 128], sizes = [8, 128], strides = [1, 1]} : vector<8x1024xf32> to vector<8x128xf32>
    %60 = vector.extract_strided_slice %54 {offsets = [0, 128], sizes = [8, 128], strides = [1, 1]} : vector<8x1024xf32> to vector<8x128xf32>
    %61 = tpu.transpose %60, [1, 0] : vector<8x128xf32> -> vector<128x8xf32>
    %cst_31 = arith.constant dense<0.000000e+00> : vector<8x8xf32>
    %62 = tpu.matmul %59, %61, %cst_31 {dimension_numbers = #tpu.dot_dimension_numbers<[1], [0], [0], [1], [0, 0, 1, 1], [], []>} : vector<8x128xf32>, vector<128x8xf32>, vector<8x8xf32> -> vector<8x8xf32>
    %63 = vector.extract_strided_slice %53 {offsets = [0, 256], sizes = [8, 128], strides = [1, 1]} : vector<8x1024xf32> to vector<8x128xf32>
    %64 = vector.extract_strided_slice %54 {offsets = [0, 256], sizes = [8, 128], strides = [1, 1]} : vector<8x1024xf32> to vector<8x128xf32>
    %65 = tpu.transpose %64, [1, 0] : vector<8x128xf32> -> vector<128x8xf32>
    %cst_32 = arith.constant dense<0.000000e+00> : vector<8x8xf32>
    %66 = tpu.matmul %63, %65, %cst_32 {dimension_numbers = #tpu.dot_dimension_numbers<[1], [0], [0], [1], [0, 0, 1, 1], [], []>} : vector<8x128xf32>, vector<128x8xf32>, vector<8x8xf32> -> vector<8x8xf32>
    %67 = vector.extract_strided_slice %53 {offsets = [0, 384], sizes = [8, 128], strides = [1, 1]} : vector<8x1024xf32> to vector<8x128xf32>
    %68 = vector.extract_strided_slice %54 {offsets = [0, 384], sizes = [8, 128], strides = [1, 1]} : vector<8x1024xf32> to vector<8x128xf32>
    %69 = tpu.transpose %68, [1, 0] : vector<8x128xf32> -> vector<128x8xf32>
    %cst_33 = arith.constant dense<0.000000e+00> : vector<8x8xf32>
    %70 = tpu.matmul %67, %69, %cst_33 {dimension_numbers = #tpu.dot_dimension_numbers<[1], [0], [0], [1], [0, 0, 1, 1], [], []>} : vector<8x128xf32>, vector<128x8xf32>, vector<8x8xf32> -> vector<8x8xf32>
    %71 = vector.extract_strided_slice %53 {offsets = [0, 512], sizes = [8, 128], strides = [1, 1]} : vector<8x1024xf32> to vector<8x128xf32>
    %72 = vector.extract_strided_slice %54 {offsets = [0, 512], sizes = [8, 128], strides = [1, 1]} : vector<8x1024xf32> to vector<8x128xf32>
    %73 = tpu.transpose %72, [1, 0] : vector<8x128xf32> -> vector<128x8xf32>
    %cst_34 = arith.constant dense<0.000000e+00> : vector<8x8xf32>
    %74 = tpu.matmul %71, %73, %cst_34 {dimension_numbers = #tpu.dot_dimension_numbers<[1], [0], [0], [1], [0, 0, 1, 1], [], []>} : vector<8x128xf32>, vector<128x8xf32>, vector<8x8xf32> -> vector<8x8xf32>
    %75 = vector.extract_strided_slice %53 {offsets = [0, 640], sizes = [8, 128], strides = [1, 1]} : vector<8x1024xf32> to vector<8x128xf32>
    %76 = vector.extract_strided_slice %54 {offsets = [0, 640], sizes = [8, 128], strides = [1, 1]} : vector<8x1024xf32> to vector<8x128xf32>
    %77 = tpu.transpose %76, [1, 0] : vector<8x128xf32> -> vector<128x8xf32>
    %cst_35 = arith.constant dense<0.000000e+00> : vector<8x8xf32>
    %78 = tpu.matmul %75, %77, %cst_35 {dimension_numbers = #tpu.dot_dimension_numbers<[1], [0], [0], [1], [0, 0, 1, 1], [], []>} : vector<8x128xf32>, vector<128x8xf32>, vector<8x8xf32> -> vector<8x8xf32>
    %79 = vector.extract_strided_slice %53 {offsets = [0, 768], sizes = [8, 128], strides = [1, 1]} : vector<8x1024xf32> to vector<8x128xf32>
    %80 = vector.extract_strided_slice %54 {offsets = [0, 768], sizes = [8, 128], strides = [1, 1]} : vector<8x1024xf32> to vector<8x128xf32>
    %81 = tpu.transpose %80, [1, 0] : vector<8x128xf32> -> vector<128x8xf32>
    %cst_36 = arith.constant dense<0.000000e+00> : vector<8x8xf32>
    %82 = tpu.matmul %79, %81, %cst_36 {dimension_numbers = #tpu.dot_dimension_numbers<[1], [0], [0], [1], [0, 0, 1, 1], [], []>} : vector<8x128xf32>, vector<128x8xf32>, vector<8x8xf32> -> vector<8x8xf32>
    %83 = vector.extract_strided_slice %53 {offsets = [0, 896], sizes = [8, 128], strides = [1, 1]} : vector<8x1024xf32> to vector<8x128xf32>
    %84 = vector.extract_strided_slice %54 {offsets = [0, 896], sizes = [8, 128], strides = [1, 1]} : vector<8x1024xf32> to vector<8x128xf32>
    %85 = tpu.transpose %84, [1, 0] : vector<8x128xf32> -> vector<128x8xf32>
    %cst_37 = arith.constant dense<0.000000e+00> : vector<8x8xf32>
    %86 = tpu.matmul %83, %85, %cst_37 {dimension_numbers = #tpu.dot_dimension_numbers<[1], [0], [0], [1], [0, 0, 1, 1], [], []>} : vector<8x128xf32>, vector<128x8xf32>, vector<8x8xf32> -> vector<8x8xf32>
    %87 = vector.shape_cast %24 : vector<8x8xf32> to vector<1x8x8xf32>
    %88 = vector.shape_cast %28 : vector<8x8xf32> to vector<1x8x8xf32>
    %89 = vector.shape_cast %32 : vector<8x8xf32> to vector<1x8x8xf32>
    %90 = vector.shape_cast %36 : vector<8x8xf32> to vector<1x8x8xf32>
    %91 = vector.shape_cast %40 : vector<8x8xf32> to vector<1x8x8xf32>
    %92 = vector.shape_cast %44 : vector<8x8xf32> to vector<1x8x8xf32>
    %93 = vector.shape_cast %48 : vector<8x8xf32> to vector<1x8x8xf32>
    %94 = vector.shape_cast %52 : vector<8x8xf32> to vector<1x8x8xf32>
    %95 = vector.shape_cast %58 : vector<8x8xf32> to vector<1x8x8xf32>
    %96 = vector.shape_cast %62 : vector<8x8xf32> to vector<1x8x8xf32>
    %97 = vector.shape_cast %66 : vector<8x8xf32> to vector<1x8x8xf32>
    %98 = vector.shape_cast %70 : vector<8x8xf32> to vector<1x8x8xf32>
    %99 = vector.shape_cast %74 : vector<8x8xf32> to vector<1x8x8xf32>
    %100 = vector.shape_cast %78 : vector<8x8xf32> to vector<1x8x8xf32>
    %101 = vector.shape_cast %82 : vector<8x8xf32> to vector<1x8x8xf32>
    %102 = vector.shape_cast %86 : vector<8x8xf32> to vector<1x8x8xf32>
    %103 = tpu.concatenate %87, %88, %89, %90, %91, %92, %93, %94, %95, %96, %97, %98, %99, %100, %101, %102 in 0 : vector<1x8x8xf32>, vector<1x8x8xf32>, vector<1x8x8xf32>, vector<1x8x8xf32>, vector<1x8x8xf32>, vector<1x8x8xf32>, vector<1x8x8xf32>, vector<1x8x8xf32>, vector<1x8x8xf32>, vector<1x8x8xf32>, vector<1x8x8xf32>, vector<1x8x8xf32>, vector<1x8x8xf32>, vector<1x8x8xf32>, vector<1x8x8xf32>, vector<1x8x8xf32> -> vector<16x8x8xf32>
    %cst_38 = arith.constant 0.0883883461 : f32
    %104 = vector.broadcast %cst_38 : f32 to vector<16x8x8xf32>
    %105 = arith.mulf %103, %104 : vector<16x8x8xf32>
    %cst_39 = arith.constant dense<0xFF800000> : vector<16x8xf32>
    %106 = vector.multi_reduction <maximumf>, %105, %cst_39 [2] : vector<16x8x8xf32> to vector<16x8xf32>
    %107 = vector.shape_cast %106 : vector<16x8xf32> to vector<16x8x1xf32>
    %108 = vector.broadcast %107 : vector<16x8x1xf32> to vector<16x8x8xf32>
    %109 = arith.subf %105, %108 : vector<16x8x8xf32>
    %110 = math.exp %109 : vector<16x8x8xf32>
    %cst_40 = arith.constant dense<0.000000e+00> : vector<16x8xf32>
    %111 = vector.multi_reduction <add>, %110, %cst_40 [2] : vector<16x8x8xf32> to vector<16x8xf32>
    %112 = vector.shape_cast %111 : vector<16x8xf32> to vector<16x8x1xf32>
    %113 = tpu.reciprocal %112 {approx = true} : vector<16x8x1xf32> -> vector<16x8x1xf32>
    %114 = vector.broadcast %113 : vector<16x8x1xf32> to vector<16x8x8xf32>
    %115 = arith.mulf %110, %114 : vector<16x8x8xf32>
    %c0_41 = arith.constant 0 : index
    %c0_42 = arith.constant 0 : index
    %c0_43 = arith.constant 0 : index
    %c0_44 = arith.constant 0 : index
    %116 = vector.load %arg9[%c0_41, %c0_42, %c0_43, %c0_44] : memref<1x16x8x8xf32, #tpu.memory_space<vmem>>, vector<1x16x8x8xf32>
    %117 = vector.shape_cast %116 : vector<1x16x8x8xf32> to vector<16x8x8xf32>
    %118 = vector.shape_cast %115 : vector<16x8x8xf32> to vector<1x16x8x8xf32>
    tpu.vector_store %arg9[%c0_41, %c0_42, %c0_43, %c0_44], %118 {strides = array<i32>} : memref<1x16x8x8xf32, #tpu.memory_space<vmem>>, vector<1x16x8x8xf32>,
    %119 = vector.extract_strided_slice %18 {offsets = [0, 0], sizes = [8, 1024], strides = [1, 1]} : vector<16x1024xf32> to vector<8x1024xf32>
    %120 = vector.extract_strided_slice %115 {offsets = [0, 0, 0], sizes = [1, 8, 8], strides = [1, 1, 1]} : vector<16x8x8xf32> to vector<1x8x8xf32>
    %121 = vector.shape_cast %120 : vector<1x8x8xf32> to vector<8x8xf32>
    %122 = vector.extract_strided_slice %119 {offsets = [0, 0], sizes = [8, 128], strides = [1, 1]} : vector<8x1024xf32> to vector<8x128xf32>
    %cst_45 = arith.constant dense<0.000000e+00> : vector<8x128xf32>
    %123 = tpu.matmul %121, %122, %cst_45 {dimension_numbers = #tpu.dot_dimension_numbers<[1], [0], [0], [1], [0, 0, 1, 1], [], []>} : vector<8x8xf32>, vector<8x128xf32>, vector<8x128xf32> -> vector<8x128xf32>
    %124 = vector.extract_strided_slice %115 {offsets = [1, 0, 0], sizes = [1, 8, 8], strides = [1, 1, 1]} : vector<16x8x8xf32> to vector<1x8x8xf32>
    %125 = vector.shape_cast %124 : vector<1x8x8xf32> to vector<8x8xf32>
    %126 = vector.extract_strided_slice %119 {offsets = [0, 128], sizes = [8, 128], strides = [1, 1]} : vector<8x1024xf32> to vector<8x128xf32>
    %cst_46 = arith.constant dense<0.000000e+00> : vector<8x128xf32>
    %127 = tpu.matmul %125, %126, %cst_46 {dimension_numbers = #tpu.dot_dimension_numbers<[1], [0], [0], [1], [0, 0, 1, 1], [], []>} : vector<8x8xf32>, vector<8x128xf32>, vector<8x128xf32> -> vector<8x128xf32>
    %128 = vector.extract_strided_slice %115 {offsets = [2, 0, 0], sizes = [1, 8, 8], strides = [1, 1, 1]} : vector<16x8x8xf32> to vector<1x8x8xf32>
    %129 = vector.shape_cast %128 : vector<1x8x8xf32> to vector<8x8xf32>
    %130 = vector.extract_strided_slice %119 {offsets = [0, 256], sizes = [8, 128], strides = [1, 1]} : vector<8x1024xf32> to vector<8x128xf32>
    %cst_47 = arith.constant dense<0.000000e+00> : vector<8x128xf32>
    %131 = tpu.matmul %129, %130, %cst_47 {dimension_numbers = #tpu.dot_dimension_numbers<[1], [0], [0], [1], [0, 0, 1, 1], [], []>} : vector<8x8xf32>, vector<8x128xf32>, vector<8x128xf32> -> vector<8x128xf32>
    %132 = vector.extract_strided_slice %115 {offsets = [3, 0, 0], sizes = [1, 8, 8], strides = [1, 1, 1]} : vector<16x8x8xf32> to vector<1x8x8xf32>
    %133 = vector.shape_cast %132 : vector<1x8x8xf32> to vector<8x8xf32>
    %134 = vector.extract_strided_slice %119 {offsets = [0, 384], sizes = [8, 128], strides = [1, 1]} : vector<8x1024xf32> to vector<8x128xf32>
    %cst_48 = arith.constant dense<0.000000e+00> : vector<8x128xf32>
    %135 = tpu.matmul %133, %134, %cst_48 {dimension_numbers = #tpu.dot_dimension_numbers<[1], [0], [0], [1], [0, 0, 1, 1], [], []>} : vector<8x8xf32>, vector<8x128xf32>, vector<8x128xf32> -> vector<8x128xf32>
    %136 = vector.extract_strided_slice %115 {offsets = [4, 0, 0], sizes = [1, 8, 8], strides = [1, 1, 1]} : vector<16x8x8xf32> to vector<1x8x8xf32>
    %137 = vector.shape_cast %136 : vector<1x8x8xf32> to vector<8x8xf32>
    %138 = vector.extract_strided_slice %119 {offsets = [0, 512], sizes = [8, 128], strides = [1, 1]} : vector<8x1024xf32> to vector<8x128xf32>
    %cst_49 = arith.constant dense<0.000000e+00> : vector<8x128xf32>
    %139 = tpu.matmul %137, %138, %cst_49 {dimension_numbers = #tpu.dot_dimension_numbers<[1], [0], [0], [1], [0, 0, 1, 1], [], []>} : vector<8x8xf32>, vector<8x128xf32>, vector<8x128xf32> -> vector<8x128xf32>
    %140 = vector.extract_strided_slice %115 {offsets = [5, 0, 0], sizes = [1, 8, 8], strides = [1, 1, 1]} : vector<16x8x8xf32> to vector<1x8x8xf32>
    %141 = vector.shape_cast %140 : vector<1x8x8xf32> to vector<8x8xf32>
    %142 = vector.extract_strided_slice %119 {offsets = [0, 640], sizes = [8, 128], strides = [1, 1]} : vector<8x1024xf32> to vector<8x128xf32>
    %cst_50 = arith.constant dense<0.000000e+00> : vector<8x128xf32>
    %143 = tpu.matmul %141, %142, %cst_50 {dimension_numbers = #tpu.dot_dimension_numbers<[1], [0], [0], [1], [0, 0, 1, 1], [], []>} : vector<8x8xf32>, vector<8x128xf32>, vector<8x128xf32> -> vector<8x128xf32>
    %144 = vector.extract_strided_slice %115 {offsets = [6, 0, 0], sizes = [1, 8, 8], strides = [1, 1, 1]} : vector<16x8x8xf32> to vector<1x8x8xf32>
    %145 = vector.shape_cast %144 : vector<1x8x8xf32> to vector<8x8xf32>
    %146 = vector.extract_strided_slice %119 {offsets = [0, 768], sizes = [8, 128], strides = [1, 1]} : vector<8x1024xf32> to vector<8x128xf32>
    %cst_51 = arith.constant dense<0.000000e+00> : vector<8x128xf32>
    %147 = tpu.matmul %145, %146, %cst_51 {dimension_numbers = #tpu.dot_dimension_numbers<[1], [0], [0], [1], [0, 0, 1, 1], [], []>} : vector<8x8xf32>, vector<8x128xf32>, vector<8x128xf32> -> vector<8x128xf32>
    %148 = vector.extract_strided_slice %115 {offsets = [7, 0, 0], sizes = [1, 8, 8], strides = [1, 1, 1]} : vector<16x8x8xf32> to vector<1x8x8xf32>
    %149 = vector.shape_cast %148 : vector<1x8x8xf32> to vector<8x8xf32>
    %150 = vector.extract_strided_slice %119 {offsets = [0, 896], sizes = [8, 128], strides = [1, 1]} : vector<8x1024xf32> to vector<8x128xf32>
    %cst_52 = arith.constant dense<0.000000e+00> : vector<8x128xf32>
    %151 = tpu.matmul %149, %150, %cst_52 {dimension_numbers = #tpu.dot_dimension_numbers<[1], [0], [0], [1], [0, 0, 1, 1], [], []>} : vector<8x8xf32>, vector<8x128xf32>, vector<8x128xf32> -> vector<8x128xf32>
    %152 = tpu.concatenate %123, %127, %131, %135, %139, %143, %147, %151 in 1 : vector<8x128xf32>, vector<8x128xf32>, vector<8x128xf32>, vector<8x128xf32>, vector<8x128xf32>, vector<8x128xf32>, vector<8x128xf32>, vector<8x128xf32> -> vector<8x1024xf32>
    %153 = vector.extract_strided_slice %18 {offsets = [8, 0], sizes = [8, 1024], strides = [1, 1]} : vector<16x1024xf32> to vector<8x1024xf32>
    %154 = vector.extract_strided_slice %115 {offsets = [8, 0, 0], sizes = [1, 8, 8], strides = [1, 1, 1]} : vector<16x8x8xf32> to vector<1x8x8xf32>
    %155 = vector.shape_cast %154 : vector<1x8x8xf32> to vector<8x8xf32>
    %156 = vector.extract_strided_slice %153 {offsets = [0, 0], sizes = [8, 128], strides = [1, 1]} : vector<8x1024xf32> to vector<8x128xf32>
    %cst_53 = arith.constant dense<0.000000e+00> : vector<8x128xf32>
    %157 = tpu.matmul %155, %156, %cst_53 {dimension_numbers = #tpu.dot_dimension_numbers<[1], [0], [0], [1], [0, 0, 1, 1], [], []>} : vector<8x8xf32>, vector<8x128xf32>, vector<8x128xf32> -> vector<8x128xf32>
    %158 = vector.extract_strided_slice %115 {offsets = [9, 0, 0], sizes = [1, 8, 8], strides = [1, 1, 1]} : vector<16x8x8xf32> to vector<1x8x8xf32>
    %159 = vector.shape_cast %158 : vector<1x8x8xf32> to vector<8x8xf32>
    %160 = vector.extract_strided_slice %153 {offsets = [0, 128], sizes = [8, 128], strides = [1, 1]} : vector<8x1024xf32> to vector<8x128xf32>
    %cst_54 = arith.constant dense<0.000000e+00> : vector<8x128xf32>
    %161 = tpu.matmul %159, %160, %cst_54 {dimension_numbers = #tpu.dot_dimension_numbers<[1], [0], [0], [1], [0, 0, 1, 1], [], []>} : vector<8x8xf32>, vector<8x128xf32>, vector<8x128xf32> -> vector<8x128xf32>
    %162 = vector.extract_strided_slice %115 {offsets = [10, 0, 0], sizes = [1, 8, 8], strides = [1, 1, 1]} : vector<16x8x8xf32> to vector<1x8x8xf32>
    %163 = vector.shape_cast %162 : vector<1x8x8xf32> to vector<8x8xf32>
    %164 = vector.extract_strided_slice %153 {offsets = [0, 256], sizes = [8, 128], strides = [1, 1]} : vector<8x1024xf32> to vector<8x128xf32>
    %cst_55 = arith.constant dense<0.000000e+00> : vector<8x128xf32>
    %165 = tpu.matmul %163, %164, %cst_55 {dimension_numbers = #tpu.dot_dimension_numbers<[1], [0], [0], [1], [0, 0, 1, 1], [], []>} : vector<8x8xf32>, vector<8x128xf32>, vector<8x128xf32> -> vector<8x128xf32>
    %166 = vector.extract_strided_slice %115 {offsets = [11, 0, 0], sizes = [1, 8, 8], strides = [1, 1, 1]} : vector<16x8x8xf32> to vector<1x8x8xf32>
    %167 = vector.shape_cast %166 : vector<1x8x8xf32> to vector<8x8xf32>
    %168 = vector.extract_strided_slice %153 {offsets = [0, 384], sizes = [8, 128], strides = [1, 1]} : vector<8x1024xf32> to vector<8x128xf32>
    %cst_56 = arith.constant dense<0.000000e+00> : vector<8x128xf32>
    %169 = tpu.matmul %167, %168, %cst_56 {dimension_numbers = #tpu.dot_dimension_numbers<[1], [0], [0], [1], [0, 0, 1, 1], [], []>} : vector<8x8xf32>, vector<8x128xf32>, vector<8x128xf32> -> vector<8x128xf32>
    %170 = vector.extract_strided_slice %115 {offsets = [12, 0, 0], sizes = [1, 8, 8], strides = [1, 1, 1]} : vector<16x8x8xf32> to vector<1x8x8xf32>
    %171 = vector.shape_cast %170 : vector<1x8x8xf32> to vector<8x8xf32>
    %172 = vector.extract_strided_slice %153 {offsets = [0, 512], sizes = [8, 128], strides = [1, 1]} : vector<8x1024xf32> to vector<8x128xf32>
    %cst_57 = arith.constant dense<0.000000e+00> : vector<8x128xf32>
    %173 = tpu.matmul %171, %172, %cst_57 {dimension_numbers = #tpu.dot_dimension_numbers<[1], [0], [0], [1], [0, 0, 1, 1], [], []>} : vector<8x8xf32>, vector<8x128xf32>, vector<8x128xf32> -> vector<8x128xf32>
    %174 = vector.extract_strided_slice %115 {offsets = [13, 0, 0], sizes = [1, 8, 8], strides = [1, 1, 1]} : vector<16x8x8xf32> to vector<1x8x8xf32>
    %175 = vector.shape_cast %174 : vector<1x8x8xf32> to vector<8x8xf32>
    %176 = vector.extract_strided_slice %153 {offsets = [0, 640], sizes = [8, 128], strides = [1, 1]} : vector<8x1024xf32> to vector<8x128xf32>
    %cst_58 = arith.constant dense<0.000000e+00> : vector<8x128xf32>
    %177 = tpu.matmul %175, %176, %cst_58 {dimension_numbers = #tpu.dot_dimension_numbers<[1], [0], [0], [1], [0, 0, 1, 1], [], []>} : vector<8x8xf32>, vector<8x128xf32>, vector<8x128xf32> -> vector<8x128xf32>
    %178 = vector.extract_strided_slice %115 {offsets = [14, 0, 0], sizes = [1, 8, 8], strides = [1, 1, 1]} : vector<16x8x8xf32> to vector<1x8x8xf32>
    %179 = vector.shape_cast %178 : vector<1x8x8xf32> to vector<8x8xf32>
    %180 = vector.extract_strided_slice %153 {offsets = [0, 768], sizes = [8, 128], strides = [1, 1]} : vector<8x1024xf32> to vector<8x128xf32>
    %cst_59 = arith.constant dense<0.000000e+00> : vector<8x128xf32>
    %181 = tpu.matmul %179, %180, %cst_59 {dimension_numbers = #tpu.dot_dimension_numbers<[1], [0], [0], [1], [0, 0, 1, 1], [], []>} : vector<8x8xf32>, vector<8x128xf32>, vector<8x128xf32> -> vector<8x128xf32>
    %182 = vector.extract_strided_slice %115 {offsets = [15, 0, 0], sizes = [1, 8, 8], strides = [1, 1, 1]} : vector<16x8x8xf32> to vector<1x8x8xf32>
    %183 = vector.shape_cast %182 : vector<1x8x8xf32> to vector<8x8xf32>
    %184 = vector.extract_strided_slice %153 {offsets = [0, 896], sizes = [8, 128], strides = [1, 1]} : vector<8x1024xf32> to vector<8x128xf32>
    %cst_60 = arith.constant dense<0.000000e+00> : vector<8x128xf32>
    %185 = tpu.matmul %183, %184, %cst_60 {dimension_numbers = #tpu.dot_dimension_numbers<[1], [0], [0], [1], [0, 0, 1, 1], [], []>} : vector<8x8xf32>, vector<8x128xf32>, vector<8x128xf32> -> vector<8x128xf32>
    %186 = tpu.concatenate %157, %161, %165, %169, %173, %177, %181, %185 in 1 : vector<8x128xf32>, vector<8x128xf32>, vector<8x128xf32>, vector<8x128xf32>, vector<8x128xf32>, vector<8x128xf32>, vector<8x128xf32>, vector<8x128xf32> -> vector<8x1024xf32>
    %187 = tpu.concatenate %152, %186 in 0 : vector<8x1024xf32>, vector<8x1024xf32> -> vector<16x1024xf32>
    %cst_61 = arith.constant dense<0.000000e+00> : vector<16x7xf32>
    %188 = tpu.matmul %187, %11, %cst_61 {dimension_numbers = #tpu.dot_dimension_numbers<[1], [0], [0], [1], [0, 0, 1, 1], [], []>} : vector<16x1024xf32>, vector<1024x7xf32>, vector<16x7xf32> -> vector<16x7xf32>
    %189 = arith.addf %188, %3 : vector<16x7xf32>
    %cst_62 = arith.constant dense<0.000000e+00> : vector<16xf32>
    %190 = vector.multi_reduction <add>, %189, %cst_62 [1] : vector<16x7xf32> to vector<16xf32>
    %191 = vector.shape_cast %190 : vector<16xf32> to vector<16x1xf32>
    %cst_63 = arith.constant 7.000000e+00 : f32
    %192 = vector.broadcast %cst_63 : f32 to vector<16x1xf32>
    %193 = arith.divf %191, %192 : vector<16x1xf32>
    %194 = vector.broadcast %193 : vector<16x1xf32> to vector<16x7xf32>
    %195 = arith.subf %189, %194 : vector<16x7xf32>
    %196 = arith.mulf %195, %195 : vector<16x7xf32>
    %cst_64 = arith.constant dense<0.000000e+00> : vector<16xf32>
    %197 = vector.multi_reduction <add>, %196, %cst_64 [1] : vector<16x7xf32> to vector<16xf32>
    %198 = vector.shape_cast %197 : vector<16xf32> to vector<16x1xf32>
    %cst_65 = arith.constant 7.000000e+00 : f32
    %199 = vector.broadcast %cst_65 : f32 to vector<16x1xf32>
    %200 = arith.divf %198, %199 : vector<16x1xf32>
    %201 = vector.broadcast %193 : vector<16x1xf32> to vector<16x7xf32>
    %202 = arith.subf %189, %201 : vector<16x7xf32>
    %cst_66 = arith.constant 9.99999974E-6 : f32
    %203 = vector.broadcast %cst_66 : f32 to vector<16x1xf32>
    %204 = arith.addf %200, %203 : vector<16x1xf32>
    %205 = math.rsqrt %204 : vector<16x1xf32>
    %206 = vector.broadcast %205 : vector<16x1xf32> to vector<16x7xf32>
    %207 = arith.mulf %202, %206 : vector<16x7xf32>
    %cst_67 = arith.constant dense<0.000000e+00> : vector<16x2048xf32>
    %208 = tpu.matmul %207, %13, %cst_67 {dimension_numbers = #tpu.dot_dimension_numbers<[1], [0], [0], [1], [0, 0, 1, 1], [], []>} : vector<16x7xf32>, vector<7x2048xf32>, vector<16x2048xf32> -> vector<16x2048xf32>
    %cst_68 = arith.constant 0.000000e+00 : f32
    %209 = vector.broadcast %cst_68 : f32 to vector<16x2048xf32>
    %210 = arith.maximumf %208, %209 : vector<16x2048xf32>
    %cst_69 = arith.constant dense<0.000000e+00> : vector<16x7xf32>
    %211 = tpu.matmul %210, %15, %cst_69 {dimension_numbers = #tpu.dot_dimension_numbers<[1], [0], [0], [1], [0, 0, 1, 1], [], []>} : vector<16x2048xf32>, vector<2048x7xf32>, vector<16x7xf32> -> vector<16x7xf32>
    %212 = arith.addf %211, %207 : vector<16x7xf32>
    %cst_70 = arith.constant dense<0.000000e+00> : vector<16xf32>
    %213 = vector.multi_reduction <add>, %212, %cst_70 [1] : vector<16x7xf32> to vector<16xf32>
    %214 = vector.shape_cast %213 : vector<16xf32> to vector<16x1xf32>
    %cst_71 = arith.constant 7.000000e+00 : f32
    %215 = vector.broadcast %cst_71 : f32 to vector<16x1xf32>
    %216 = arith.divf %214, %215 : vector<16x1xf32>
    %217 = vector.broadcast %216 : vector<16x1xf32> to vector<16x7xf32>
    %218 = arith.subf %212, %217 : vector<16x7xf32>
    %219 = arith.mulf %218, %218 : vector<16x7xf32>
    %cst_72 = arith.constant dense<0.000000e+00> : vector<16xf32>
    %220 = vector.multi_reduction <add>, %219, %cst_72 [1] : vector<16x7xf32> to vector<16xf32>
    %221 = vector.shape_cast %220 : vector<16xf32> to vector<16x1xf32>
    %cst_73 = arith.constant 7.000000e+00 : f32
    %222 = vector.broadcast %cst_73 : f32 to vector<16x1xf32>
    %223 = arith.divf %221, %222 : vector<16x1xf32>
    %224 = vector.broadcast %216 : vector<16x1xf32> to vector<16x7xf32>
    %225 = arith.subf %212, %224 : vector<16x7xf32>
    %cst_74 = arith.constant 9.99999974E-6 : f32
    %226 = vector.broadcast %cst_74 : f32 to vector<16x1xf32>
    %227 = arith.addf %223, %226 : vector<16x1xf32>
    %228 = math.rsqrt %227 : vector<16x1xf32>
    %229 = vector.broadcast %228 : vector<16x1xf32> to vector<16x7xf32>
    %230 = arith.mulf %225, %229 : vector<16x7xf32>
    %c0_75 = arith.constant 0 : index
    %c0_76 = arith.constant 0 : index
    %231 = vector.load %arg10[%c0_75, %c0_76] : memref<16x7xf32, #tpu.memory_space<vmem>>, vector<16x7xf32>
    tpu.vector_store %arg10[%c0_75, %c0_76], %230 {strides = array<i32>} : memref<16x7xf32, #tpu.memory_space<vmem>>, vector<16x7xf32>,
    %c5_i32 = arith.constant 5 : i32
    %232 = arith.cmpi eq, %arg0, %c5_i32 : i32
    %233 = arith.extui %232 : i1 to i32
    %c0_i32_77 = arith.constant 0 : i32
    %234 = arith.cmpi ne, %233, %c0_i32_77 : i32
    scf.if %234 {
      %c0_78 = arith.constant 0 : index
      %c0_79 = arith.constant 0 : index
      %235 = vector.load %arg8[%c0_78, %c0_79] : memref<16x7xf32, #tpu.memory_space<vmem>>, vector<16x7xf32>
      tpu.vector_store %arg8[%c0_78, %c0_79], %230 {strides = array<i32>} : memref<16x7xf32, #tpu.memory_space<vmem>>, vector<16x7xf32>,
    } else {
    }
    return
  }
  func.func @transform_0(%arg0: i32) -> (i32, i32) {
    %c0_i32 = arith.constant 0 : i32
    %c0_i32_0 = arith.constant 0 : i32
    %c0_i32_1 = arith.constant 0 : i32
    return %c0_i32, %c0_i32_0 : i32, i32
  }
  func.func @transform_1(%arg0: i32) -> (i32, i32, i32) {
    %c0_i32 = arith.constant 0 : i32
    %c0_i32_0 = arith.constant 0 : i32
    %c0_i32_1 = arith.constant 0 : i32
    return %arg0, %c0_i32, %c0_i32_0 : i32, i32, i32
  }
  func.func @transform_2(%arg0: i32) -> (i32, i32, i32) {
    %c0_i32 = arith.constant 0 : i32
    %c0_i32_0 = arith.constant 0 : i32
    %c0_i32_1 = arith.constant 0 : i32
    return %arg0, %c0_i32, %c0_i32_0 : i32, i32, i32
  }
  func.func @transform_3(%arg0: i32) -> (i32, i32, i32) {
    %c0_i32 = arith.constant 0 : i32
    %c0_i32_0 = arith.constant 0 : i32
    %c0_i32_1 = arith.constant 0 : i32
    return %arg0, %c0_i32, %c0_i32_0 : i32, i32, i32
  }
  func.func @transform_4(%arg0: i32) -> (i32, i32, i32) {
    %c0_i32 = arith.constant 0 : i32
    %c0_i32_0 = arith.constant 0 : i32
    %c0_i32_1 = arith.constant 0 : i32
    return %arg0, %c0_i32, %c0_i32_0 : i32, i32, i32
  }
  func.func @transform_5(%arg0: i32) -> (i32, i32, i32) {
    %c0_i32 = arith.constant 0 : i32
    %c0_i32_0 = arith.constant 0 : i32
    %c0_i32_1 = arith.constant 0 : i32
    return %arg0, %c0_i32, %c0_i32_0 : i32, i32, i32
  }
  func.func @transform_6(%arg0: i32) -> (i32, i32, i32) {
    %c0_i32 = arith.constant 0 : i32
    %c0_i32_0 = arith.constant 0 : i32
    %c0_i32_1 = arith.constant 0 : i32
    return %arg0, %c0_i32, %c0_i32_0 : i32, i32, i32
  }
  func.func @transform_7(%arg0: i32) -> (i32, i32) {
    %c0_i32 = arith.constant 0 : i32
    %c0_i32_0 = arith.constant 0 : i32
    %c0_i32_1 = arith.constant 0 : i32
    return %c0_i32, %c0_i32_0 : i32, i32
  }
  func.func @transform_8(%arg0: i32) -> (i32, i32, i32, i32) {
    %c0_i32 = arith.constant 0 : i32
    %c0_i32_0 = arith.constant 0 : i32
    %c0_i32_1 = arith.constant 0 : i32
    %c0_i32_2 = arith.constant 0 : i32
    return %arg0, %c0_i32, %c0_i32_0, %c0_i32_1 : i32, i32, i32, i32
  }
}

</mosaic_0001>

<bundles_post_ra>
// kernel: encoder_forward.1
= control target key start
LH: loop header
LB: loop body
LE: loop exit
PB: predicated region body
PF: predicated region fallthrough
CT: control target
= control target key end

     0   :  { %s3903_s27 = smov 0   ;;  %s4855_s0 = inlined_call_operand.vmem [shape: f32[16,7], index: 0, kind: input, shape index: {}]   ;;  %s4856_s1 = inlined_call_operand.vmem [shape: f32[6,7,1024], index: 1, kind: input, shape index: {}]   ;;  %s4857_s2 = inlined_call_operand.vmem [shape: f32[6,7,1024], index: 2, kind: input, shape index: {}]   ;;  %s4858_s3 = inlined_call_operand.vmem [shape: f32[6,7,1024], index: 3, kind: input, shape index: {}]   ;;  %s4859_s4 = inlined_call_operand.vmem [shape: f32[6,1024,7], index: 4, kind: input, shape index: {}]   ;;  %s4860_s5 = inlined_call_operand.vmem [shape: f32[6,7,2048], index: 5, kind: input, shape index: {}]   ;;  %s4861_s6 = inlined_call_operand.vmem [shape: f32[6,2048,7], index: 6, kind: input, shape index: {}]   ;;  %s4862_s7 = inlined_call_operand.vmem [shape: f32[16,7], index: 7, kind: output, shape index: {0}]   ;;  %s4863_s8 = inlined_call_operand.vmem [shape: f32[6,16,8,8], index: 8, kind: output, shape index: {1}]  }
   0x1 LB: > { %s3909_s28 = sadd.s32 4294967295, %s3855_s27   ;;  %p3602_p0 = scmp.ge.s32.totalorder %s3855_s27, 1  ;;  %s3855_s27 = sphi %s3903_s27, %s19_s27  }
   0x2   : > { %p310_p1 = scmp.lt.s32.totalorder %s3855_s27, 7 }
   0x4   : > { %p311_p2 = pnand %p3602_p0, %p310_p1 }
   0x5   : > { %p369_p3 = scmp.lt.s32.totalorder (!%p311_p2), %s3909_s28, 5  ;;  %p3617_p4 = scmp.ne.s32.totalorder (!%p311_p2), %s3909_s28, 0 }
   0x6   : > { %314 = sbr.rel (%p311_p2) target bundleno = 1780 (0x6f4), region = 48 }
   0xb   : > { %s370_s29 = scalar_select %p369_p3, %s3909_s28, 5 }
   0xd   : > { %s3757_s30 = sshll.u32 %s370_s29, 6  ;;  %s3760_s9 = sshll.u32 %s370_s29, 10 }
   0xe   : > { %s3918_s12 = scalar_lea.vmem %s4856_s1, %s3757_s30  ;;  %s3923_s15 = scalar_lea.vmem %s4857_s2, %s3757_s30 }
   0xf   : > { %s3928_s18 = scalar_lea.vmem %s4858_s3, %s3757_s30  ;;  %s3933_s21 = scalar_lea.vmem %s4859_s4, %s3760_s9 }
  0x10   : > { %s3761_s22 = sshll.u32 %s370_s29, 7  ;;  %s3762_s23 = sshll.u32 %s370_s29, 11 }
  0x11   : > { %s3938_s26 = scalar_lea.vmem %s4860_s5, %s3761_s22  ;;  %s3943_s13 = scalar_lea.vmem %s4861_s6, %s3762_s23 }
  0x12   : > { %s3948_s16 = scalar_lea.vmem %s4863_s8, %s3761_s22  ;;  %407 = sbr.rel (%p3617_p4) target bundleno = 26 (0x1a), region = 52 }
  0x17   : > { %v408_v0 = vld [vmem:[%s4855_s0] sm:$0xff]  ;;  %vm410_vm0 = vcmask 56320   ;;  %v409_v1 = vld [vmem:[%s4855_s0 + $0x8] sm:$0xff] }
  0x18   : > { %411 = vst.msk [vmem:[#allocation2] sm:$0xff] %vm410_vm0, %v408_v0 }
  0x19   : > { %412 = vst.msk [vmem:[#allocation2 + $0x8] sm:$0xff] %vm410_vm0, %v409_v1 }
  0x1a PF: > { %v415_v2 = vld [vmem:[%s3918_s12] sm:$0x7f]  ;;  %vm846_vm1 = vcmask 1046528   ;;  %v416_v3 = vld [vmem:[%s3918_s12 + $0x8] sm:$0x7f]  ;;  %vm839_vm2 = vcmask 56320  }
  0x1b   : > { %3618 = vmatpush.msk.msra.mxu0 %vm846_vm1, %v415_v2  ;;  %3621 = vmatpush.msk.msra.mxu1 %vm846_vm1, %v416_v3  ;;  %v417_v5 = vld [vmem:[%s3918_s12 + $0x10] sm:$0x7f]  ;;  %v418_v6 = vld [vmem:[%s3918_s12 + $0x18] sm:$0x7f]  ;;  %v419_v8 = vld [vmem:[%s3918_s12 + $0x20] sm:$0x7f] }
  0x1c   : > { %3624 = vmatpush.msk.msra.mxu2 %vm846_vm1, %v417_v5  ;;  %3627 = vmatpush.msk.msra.mxu3 %vm846_vm1, %v418_v6  ;;  %v421_v7 = vld [vmem:[%s3918_s12 + $0x30] sm:$0x7f]  ;;  %v420_v9 = vld [vmem:[%s3918_s12 + $0x28] sm:$0x7f]  ;;  %v422_v10 = vld [vmem:[%s3918_s12 + $0x38] sm:$0x7f] }
  0x1d   : > { %v425_v11 = vld [vmem:[%s3923_s15 + $0x10] sm:$0x7f]  ;;  %v423_v12 = vld [vmem:[%s3923_s15] sm:$0x7f]  ;;  %3630 = vmatpush.msk.msrb.mxu0 %vm846_vm1, %v419_v8  ;;  %v424_v13 = vld [vmem:[%s3923_s15 + $0x8] sm:$0x7f]  ;;  %3633 = vmatpush.msk.msrb.mxu1 %vm846_vm1, %v420_v9 }
  0x1e   : > { %3636 = vmatpush.msk.msrb.mxu2 %vm846_vm1, %v421_v7  ;;  %v426_v14 = vld [vmem:[%s3923_s15 + $0x18] sm:$0x7f]  ;;  %3639 = vmatpush.msk.msrb.mxu3 %vm846_vm1, %v422_v10  ;;  %v429_v16 = vld [vmem:[%s3923_s15 + $0x30] sm:$0x7f]  ;;  %v427_v17 = vld [vmem:[%s3923_s15 + $0x20] sm:$0x7f] }
  0x1f   : > { %v3959_v4 = vld [vmem:[#allocation2] sm:$0xff]  ;;  %v428_v18 = vld [vmem:[%s3923_s15 + $0x28] sm:$0x7f]  ;;  %v430_v19 = vld [vmem:[%s3923_s15 + $0x38] sm:$0x7f]  ;;  %vm1807_vm3 = vcmask 64512  }
  0x20   : > { %3619 = vmatmul.msk.f32.vlgmr.msra.gmra.mxu0 %vm839_vm2, %v3959_v4  ;;  %3622 = vmatmul.msk.f32.vlgmr.msra.gmra.mxu1 %vm839_vm2, %v3959_v4  ;;  %v3989_v15 = vld [vmem:[#allocation2 + $0x8] sm:$0xff]  ;;  %v431_v20 = vld [vmem:[%s3928_s18] sm:$0x7f]  ;;  %v433_v22 = vld [vmem:[%s3928_s18 + $0x10] sm:$0x7f]  ;;  %p3754_p5 = scmp.ne.s32.totalorder %s3909_s28, 5 }
  0x21   : > { %3625 = vmatmul.msk.f32.vlgmr.msra.gmra.mxu2 %vm839_vm2, %v3959_v4  ;;  %3628 = vmatmul.msk.f32.vlgmr.msra.gmra.mxu3 %vm839_vm2, %v3959_v4  ;;  %v432_v21 = vld [vmem:[%s3928_s18 + $0x8] sm:$0x7f]  ;;  %v434_v23 = vld [vmem:[%s3928_s18 + $0x18] sm:$0x7f]  ;;  %v435_v24 = vld [vmem:[%s3928_s18 + $0x20] sm:$0x7f] }
  0x22   : > { %3648 = vmatpush.msk.msra.mxu2 %vm846_vm1, %v425_v11  ;;  %3642 = vmatpush.msk.msra.mxu0 %vm846_vm1, %v423_v12  ;;  %v436_v25 = vld [vmem:[%s3928_s18 + $0x28] sm:$0x7f]  ;;  %v437_v26 = vld [vmem:[%s3928_s18 + $0x30] sm:$0x7f]  ;;  %v438_v27 = vld [vmem:[%s3928_s18 + $0x38] sm:$0x7f] }
  0x23   : > { %3645 = vmatpush.msk.msra.mxu1 %vm846_vm1, %v424_v13  ;;  %3651 = vmatpush.msk.msra.mxu3 %vm846_vm1, %v426_v14 }
  0x28   : > { %3620 = vmatmul.msk.f32.gmra.mxu0 %vm839_vm2, %v3989_v15  ;;  %3623 = vmatmul.msk.f32.gmra.mxu1 %vm839_vm2, %v3989_v15 }
  0x29   : > { %3626 = vmatmul.msk.f32.gmra.mxu2 %vm839_vm2, %v3989_v15  ;;  %3629 = vmatmul.msk.f32.gmra.mxu3 %vm839_vm2, %v3989_v15 }
  0x30   : > { %3631 = vmatmul.msk.f32.vlgmr.msrb.gmra.mxu0 %vm839_vm2, %v3959_v4  ;;  %3634 = vmatmul.msk.f32.vlgmr.msrb.gmra.mxu1 %vm839_vm2, %v3959_v4 }
  0x31   : > { %3637 = vmatmul.msk.f32.vlgmr.msrb.gmra.mxu2 %vm839_vm2, %v3959_v4  ;;  %3640 = vmatmul.msk.f32.vlgmr.msrb.gmra.mxu3 %vm839_vm2, %v3959_v4 }
  0x32   : > { %3660 = vmatpush.msk.msrb.mxu2 %vm846_vm1, %v429_v16  ;;  %3654 = vmatpush.msk.msrb.mxu0 %vm846_vm1, %v427_v17 }
  0x33   : > { %3657 = vmatpush.msk.msrb.mxu1 %vm846_vm1, %v428_v18  ;;  %3663 = vmatpush.msk.msrb.mxu3 %vm846_vm1, %v430_v19 }
  0x38   : > { %3632 = vmatmul.msk.f32.gmra.mxu0 %vm839_vm2, %v3989_v15  ;;  %3635 = vmatmul.msk.f32.gmra.mxu1 %vm839_vm2, %v3989_v15 }
  0x39   : > { %3638 = vmatmul.msk.f32.gmra.mxu2 %vm839_vm2, %v3989_v15  ;;  %3641 = vmatmul.msk.f32.gmra.mxu3 %vm839_vm2, %v3989_v15 }
  0x40   : > { %3643 = vmatmul.msk.f32.vlgmr.msra.gmra.mxu0 %vm839_vm2, %v3959_v4  ;;  %3646 = vmatmul.msk.f32.vlgmr.msra.gmra.mxu1 %vm839_vm2, %v3959_v4 }
  0x41   : > { %3649 = vmatmul.msk.f32.vlgmr.msra.gmra.mxu2 %vm839_vm2, %v3959_v4  ;;  %3652 = vmatmul.msk.f32.vlgmr.msra.gmra.mxu3 %vm839_vm2, %v3959_v4 }
  0x42   : > { %3666 = vmatpush.msk.msra.mxu0 %vm846_vm1, %v431_v20  ;;  %3669 = vmatpush.msk.msra.mxu1 %vm846_vm1, %v432_v21 }
  0x43   : > { %3672 = vmatpush.msk.msra.mxu2 %vm846_vm1, %v433_v22  ;;  %3675 = vmatpush.msk.msra.mxu3 %vm846_vm1, %v434_v23 }
  0x48   : > { %3644 = vmatmul.msk.f32.gmra.mxu0 %vm839_vm2, %v3989_v15  ;;  %3647 = vmatmul.msk.f32.gmra.mxu1 %vm839_vm2, %v3989_v15 }
  0x49   : > { %3650 = vmatmul.msk.f32.gmra.mxu2 %vm839_vm2, %v3989_v15  ;;  %3653 = vmatmul.msk.f32.gmra.mxu3 %vm839_vm2, %v3989_v15 }
  0x50   : > { %3655 = vmatmul.msk.f32.vlgmr.msrb.gmra.mxu0 %vm839_vm2, %v3959_v4  ;;  %3658 = vmatmul.msk.f32.vlgmr.msrb.gmra.mxu1 %vm839_vm2, %v3959_v4 }
  0x51   : > { %3661 = vmatmul.msk.f32.vlgmr.msrb.gmra.mxu2 %vm839_vm2, %v3959_v4  ;;  %3664 = vmatmul.msk.f32.vlgmr.msrb.gmra.mxu3 %vm839_vm2, %v3959_v4 }
  0x52   : > { %3678 = vmatpush.msk.msrb.mxu0 %vm846_vm1, %v435_v24  ;;  %3681 = vmatpush.msk.msrb.mxu1 %vm846_vm1, %v436_v25 }
  0x53   : > { %3684 = vmatpush.msk.msrb.mxu2 %vm846_vm1, %v437_v26  ;;  %3687 = vmatpush.msk.msrb.mxu3 %vm846_vm1, %v438_v27 }
  0x58   : > { %3656 = vmatmul.msk.f32.gmra.mxu0 %vm839_vm2, %v3989_v15  ;;  %3659 = vmatmul.msk.f32.gmra.mxu1 %vm839_vm2, %v3989_v15 }
  0x59   : > { %3662 = vmatmul.msk.f32.gmra.mxu2 %vm839_vm2, %v3989_v15  ;;  %3665 = vmatmul.msk.f32.gmra.mxu3 %vm839_vm2, %v3989_v15 }
  0x60   : > { %3667 = vmatmul.msk.f32.vlgmr.msra.gmra.mxu0 %vm839_vm2, %v3959_v4  ;;  %3670 = vmatmul.msk.f32.vlgmr.msra.gmra.mxu1 %vm839_vm2, %v3959_v4 }
  0x61   : > { %3673 = vmatmul.msk.f32.vlgmr.msra.gmra.mxu2 %vm839_vm2, %v3959_v4  ;;  %3676 = vmatmul.msk.f32.vlgmr.msra.gmra.mxu3 %vm839_vm2, %v3959_v4 }
  0x68   : > { %3668 = vmatmul.msk.f32.gmra.mxu0 %vm839_vm2, %v3989_v15  ;;  %3671 = vmatmul.msk.f32.gmra.mxu1 %vm839_vm2, %v3989_v15 }
  0x69   : > { %3674 = vmatmul.msk.f32.gmra.mxu2 %vm839_vm2, %v3989_v15  ;;  %3677 = vmatmul.msk.f32.gmra.mxu3 %vm839_vm2, %v3989_v15 }
  0x70   : > { %3679 = vmatmul.msk.f32.vlgmr.msrb.gmra.mxu0 %vm839_vm2, %v3959_v4  ;;  %3682 = vmatmul.msk.f32.vlgmr.msrb.gmra.mxu1 %vm839_vm2, %v3959_v4 }
  0x71   : > { %3685 = vmatmul.msk.f32.vlgmr.msrb.gmra.mxu2 %vm839_vm2, %v3959_v4  ;;  %3688 = vmatmul.msk.f32.vlgmr.msrb.gmra.mxu3 %vm839_vm2, %v3959_v4 }
  0x78   : > { %3680 = vmatmul.msk.f32.gmra.mxu0 %vm839_vm2, %v3989_v15  ;;  %3683 = vmatmul.msk.f32.gmra.mxu1 %vm839_vm2, %v3989_v15 }
  0x79   : > { %3686 = vmatmul.msk.f32.gmra.mxu2 %vm839_vm2, %v3989_v15  ;;  %3689 = vmatmul.msk.f32.gmra.mxu3 %vm839_vm2, %v3989_v15 }
  0x9d   : > { %v888_v28 = vpop.f32.mrf.mxu0  ;;  %v911_v29 = vpop.f32.mrf.mxu1 }
  0xa4   : > { %v934_v30 = vpop.f32.mrf.mxu2  ;;  %v957_v31 = vpop.f32.mrf.mxu3 }
  0xa5   : > { %v891_v32 = vpop.f32.mrf.mxu0  ;;  %v914_v33 = vpop.f32.mrf.mxu1 }
  0xac   : > { %v937_v34 = vpop.f32.mrf.mxu2  ;;  %v960_v35 = vpop.f32.mrf.mxu3 }
  0xad   : > { %v980_v36 = vpop.f32.mrf.mxu0  ;;  %v1003_v37 = vpop.f32.mrf.mxu1 }
  0xb4   : > { %v1026_v38 = vpop.f32.mrf.mxu2  ;;  %v1049_v39 = vpop.f32.mrf.mxu3 }
  0xb5   : > { %v983_v40 = vpop.f32.mrf.mxu0  ;;  %v1006_v41 = vpop.f32.mrf.mxu1 }
  0xbc   : > { %v1029_v42 = vpop.f32.mrf.mxu2  ;;  %v1052_v43 = vpop.f32.mrf.mxu3 }
  0xbd   : > { %v1096_v44 = vpop.f32.mrf.mxu0  ;;  %v1119_v45 = vpop.f32.mrf.mxu1 }
  0xbe   : > { %1486 = vmatpush.xpose.msra.mxu0 %v1096_v44  ;;  %1506 = vmatpush.xpose.msra.mxu1 %v1119_v45 }
  0xc1   : > { %1487 = vmatmul.f32.vlgmr.msra.gmra.mxu0 %v888_v28  ;;  %1507 = vmatmul.f32.vlgmr.msra.gmra.mxu1 %v911_v29 }
  0xc4   : > { %v1142_v46 = vpop.f32.mrf.mxu2  ;;  %v1165_v47 = vpop.f32.mrf.mxu3 }
  0xc5   : > { %1526 = vmatpush.xpose.msra.mxu2 %v1142_v46  ;;  %1546 = vmatpush.xpose.msra.mxu3 %v1165_v47  ;;  %v1099_v48 = vpop.f32.mrf.mxu0  ;;  %v1122_v49 = vpop.f32.mrf.mxu1 }
  0xc8   : > { %1527 = vmatmul.f32.vlgmr.msra.gmra.mxu2 %v934_v30  ;;  %1547 = vmatmul.f32.vlgmr.msra.gmra.mxu3 %v957_v31 }
  0xcc   : > { %v1145_v50 = vpop.f32.mrf.mxu2  ;;  %v1168_v51 = vpop.f32.mrf.mxu3 }
  0xcd   : > { %v1188_v52 = vpop.f32.mrf.mxu0  ;;  %v1211_v53 = vpop.f32.mrf.mxu1 }
  0xce   : > { %1566 = vmatpush.xpose.msrb.mxu0 %v1188_v52  ;;  %1586 = vmatpush.xpose.msrb.mxu1 %v1211_v53 }
  0xd1   : > { %1567 = vmatmul.f32.vlgmr.msrb.gmra.mxu0 %v980_v36  ;;  %1587 = vmatmul.f32.vlgmr.msrb.gmra.mxu1 %v1003_v37 }
  0xd2   : > { %1646 = vmatpush.xpose.msra.mxu0 %v1099_v48  ;;  %1666 = vmatpush.xpose.msra.mxu1 %v1122_v49 }
  0xd4   : > { %v1234_v54 = vpop.f32.mrf.mxu2  ;;  %v1257_v55 = vpop.f32.mrf.mxu3 }
  0xd5   : > { %1606 = vmatpush.xpose.msrb.mxu2 %v1234_v54  ;;  %1626 = vmatpush.xpose.msrb.mxu3 %v1257_v55  ;;  %v1191_v56 = vpop.f32.mrf.mxu0  ;;  %v1214_v57 = vpop.f32.mrf.mxu1 }
  0xd6   : > { %1726 = vmatpush.xpose.msrb.mxu0 %v1191_v56  ;;  %1746 = vmatpush.xpose.msrb.mxu1 %v1214_v57 }
  0xd8   : > { %1607 = vmatmul.f32.vlgmr.msrb.gmra.mxu2 %v1026_v38  ;;  %1627 = vmatmul.f32.vlgmr.msrb.gmra.mxu3 %v1049_v39 }
  0xd9   : > { %1686 = vmatpush.xpose.msra.mxu2 %v1145_v50  ;;  %1706 = vmatpush.xpose.msra.mxu3 %v1168_v51 }
  0xda   : > { %1647 = vmatmul.f32.vlgmr.msra.gmra.mxu0 %v891_v32  ;;  %1667 = vmatmul.f32.vlgmr.msra.gmra.mxu1 %v914_v33 }
  0xdc   : > { %v1237_v58 = vpop.f32.mrf.mxu2  ;;  %v1260_v59 = vpop.f32.mrf.mxu3 }
  0xdd   : > { %1766 = vmatpush.xpose.msrb.mxu2 %v1237_v58  ;;  %1786 = vmatpush.xpose.msrb.mxu3 %v1260_v59  ;;  %v1304_v60 = vpop.f32.mrf.mxu0  ;;  %v1327_v61 = vpop.f32.mrf.mxu1 }
  0xde   : > { %2018 = vmatpush.msra.mxu0 %v1304_v60  ;;  %2041 = vmatpush.msra.mxu1 %v1327_v61 }
  0xe0   : > { %1687 = vmatmul.f32.vlgmr.msra.gmra.mxu2 %v937_v34  ;;  %1707 = vmatmul.f32.vlgmr.msra.gmra.mxu3 %v960_v35 }
  0xe2   : > { %1727 = vmatmul.f32.vlgmr.msrb.gmra.mxu0 %v983_v40  ;;  %1747 = vmatmul.f32.vlgmr.msrb.gmra.mxu1 %v1006_v41 }
  0xe4   : > { %v1350_v0 = vpop.f32.mrf.mxu2  ;;  %v1373_v1 = vpop.f32.mrf.mxu3 }
  0xe5   : > { %v4105_v62 = vpop.f32.mrf.mxu0  ;;  %v4107_v63 = vpop.f32.mrf.mxu1  ;;  %2064 = vmatpush.msra.mxu2 %v1350_v0  ;;  %2087 = vmatpush.msra.mxu3 %v1373_v1 }
  0xe8   : > { %1767 = vmatmul.f32.vlgmr.msrb.gmra.mxu2 %v1029_v42  ;;  %1787 = vmatmul.f32.vlgmr.msrb.gmra.mxu3 %v1052_v43 }
  0xec   : > { %v4109_v4 = vpop.f32.mrf.mxu2  ;;  %v4111_v5 = vpop.f32.mrf.mxu3 }
  0xed   : > { %v1396_v2 = vpop.f32.mrf.mxu0  ;;  %v1419_v3 = vpop.f32.mrf.mxu1 }
  0xee   : > { %2110 = vmatpush.msrb.mxu0 %v1396_v2  ;;  %2133 = vmatpush.msrb.mxu1 %v1419_v3 }
  0xf4   : > { %v1442_v6 = vpop.f32.mrf.mxu2  ;;  %v1465_v7 = vpop.f32.mrf.mxu3 }
  0xf5   : > { %2156 = vmatpush.msrb.mxu2 %v1442_v6  ;;  %2179 = vmatpush.msrb.mxu3 %v1465_v7  ;;  %v4113_v8 = vpop.f32.mrf.mxu0  ;;  %v4115_v9 = vpop.f32.mrf.mxu1 }
  0xfc   : > { %v4121_v14 = vpop.f32.mrf.mxu2  ;;  %v4127_v17 = vpop.f32.mrf.mxu3 }
 0x13e   : > { %v1488_v10 = vpop.f32.mrf.mxu0  ;;  %v1508_v11 = vpop.f32.mrf.mxu1 }
 0x13f   : > { %v4117_v12 = vmul.f32 0.088388346, %v1508_v11  ;;  %v4119_v13 = vmul.f32 0.088388346, %v1488_v10 }
 0x141   : > { %v1811_v15 = vsel %vm1807_vm3, %v4117_v12, -inf  ;;  %v1808_v16 = vsel %vm1807_vm3, %v4119_v13, -inf }
 0x142   : > { %1812 = vmax.xlane.f32.xlu2 %v1811_v15  ;;  %1809 = vmax.xlane.f32.xlu1 %v1808_v16 }
 0x14b   : > { %v1528_v18 = vpop.f32.mrf.mxu2  ;;  %v1548_v21 = vpop.f32.mrf.mxu3 }
 0x14c   : > { %v4129_v19 = vmul.f32 0.088388346, %v1528_v18  ;;  %v4133_v22 = vmul.f32 0.088388346, %v1548_v21 }
 0x14e   : > { %v1814_v20 = vsel %vm1807_vm3, %v4129_v19, -inf  ;;  %v1817_v23 = vsel %vm1807_vm3, %v4133_v22, -inf  ;;  %v1568_v24 = vpop.f32.mrf.mxu0  ;;  %v1588_v28 = vpop.f32.mrf.mxu1 }
 0x14f   : > { %1815 = vmax.xlane.f32.xlu0 %v1814_v20  ;;  %v4137_v25 = vmul.f32 0.088388346, %v1568_v24  ;;  %v4149_v34 = vmul.f32 0.088388346, %v1588_v28 }
 0x151   : > { %v1820_v33 = vsel %vm1807_vm3, %v4137_v25, -inf  ;;  %v1823_v41 = vsel %vm1807_vm3, %v4149_v34, -inf }
 0x157   : > { %1818 = vmax.xlane.f32.xlu0 %v1817_v23  ;;  %v1648_v39 = vpop.f32.mrf.mxu0  ;;  %v1668_v40 = vpop.f32.mrf.mxu1 }
 0x158   : > { %v4161_v44 = vmul.f32 0.088388346, %v1648_v39  ;;  %v4163_v45 = vmul.f32 0.088388346, %v1668_v40 }
 0x15a   : > { %v1835_v48 = vsel %vm1807_vm3, %v4163_v45, -inf  ;;  %v1832_v50 = vsel %vm1807_vm3, %v4161_v44, -inf }
 0x15b   : > { %v1608_v26 = vpop.f32.mrf.mxu2  ;;  %v1628_v27 = vpop.f32.mrf.mxu3 }
 0x15c   : > { %v4139_v29 = vmul.f32 0.088388346, %v1608_v26  ;;  %v4141_v30 = vmul.f32 0.088388346, %v1628_v27 }
 0x15e   : > { %v1829_v31 = vsel %vm1807_vm3, %v4141_v30, -inf  ;;  %v1826_v32 = vsel %vm1807_vm3, %v4139_v29, -inf }
 0x15f   : > { %1830 = vmax.xlane.f32.xlu2 %v1829_v31  ;;  %1827 = vmax.xlane.f32.xlu1 %v1826_v32  ;;  %v1728_v51 = vpop.f32.mrf.mxu0  ;;  %v1748_v53 = vpop.f32.mrf.mxu1 }
 0x160   : > { %1821 = vmax.xlane.f32.xlu0 %v1820_v33  ;;  %v4173_v54 = vmul.f32 0.088388346, %v1728_v51  ;;  %v4177_v56 = vmul.f32 0.088388346, %v1748_v53 }
 0x162   : > { %v1844_v58 = vsel %vm1807_vm3, %v4173_v54, -inf  ;;  %v1847_v59 = vsel %vm1807_vm3, %v4177_v56, -inf }
 0x163   : > { %v1688_v35 = vpop.f32.mrf.mxu2  ;;  %v1708_v36 = vpop.f32.mrf.mxu3 }
 0x164   : > { %v4151_v37 = vmul.f32 0.088388346, %v1688_v35  ;;  %v4153_v38 = vmul.f32 0.088388346, %v1708_v36 }
 0x166   : > { %v1838_v42 = vsel %vm1807_vm3, %v4151_v37, -inf  ;;  %v1841_v43 = vsel %vm1807_vm3, %v4153_v38, -inf }
 0x167   : > { %1824 = vmax.xlane.f32.xlu2 %v1823_v41  ;;  %1839 = vmax.xlane.f32.xlu1 %v1838_v42 }
 0x168   : > { %1842 = vmax.xlane.f32.xlu0 %v1841_v43 }
 0x16b   : > { %v1768_v46 = vpop.f32.mrf.mxu2  ;;  %v1788_v52 = vpop.f32.mrf.mxu3 }
 0x16c   : > { %v4165_v47 = vmul.f32 0.088388346, %v1768_v46  ;;  %v4175_v55 = vmul.f32 0.088388346, %v1788_v52 }
 0x16e   : > { %v1850_v49 = vsel %vm1807_vm3, %v4165_v47, -inf  ;;  %v1853_v57 = vsel %vm1807_vm3, %v4175_v55, -inf }
 0x16f   : > { %1836 = vmax.xlane.f32.xlu2 %v1835_v48  ;;  %1833 = vmax.xlane.f32.xlu1 %v1832_v50 }
 0x170   : > { %1851 = vmax.xlane.f32.xlu0 %v1850_v49 }
 0x177   : > { %1854 = vmax.xlane.f32.xlu1 %v1853_v57  ;;  %1845 = vmax.xlane.f32.xlu2 %v1844_v58 }
 0x178   : > { %1848 = vmax.xlane.f32.xlu0 %v1847_v59 }
 0x1b5   : > { %v1810_v60 = vpop.xlane.xlu1 %1809  ;;  %v1813_v10 = vpop.xlane.xlu2 %1812 }
 0x1b6   : > { %v1856_v61 = vsub.f32 %v4119_v13, %v1810_v60  ;;  %v1857_v13 = vsub.f32 %v4117_v12, %v1813_v10 }
 0x1b8   : > { %v1872_v0 = vmul.f32 1.442695, %v1856_v61  ;;  %v1874_v21 = vmul.f32 1.442695, %v1857_v13 }
 0x1ba   : > { %3773 = vpow2.f32 %v1872_v0 }
 0x1c0   : > { %v4186_v1 = vpop.eup %3773 }
 0x1c1   : > { %v1904_v3 = vsel %vm1807_vm3, %v4186_v1, 0.0 }
 0x1c2   : > { %v1816_v2 = vpop.xlane.xlu0 %1815  ;;  %1905 = vadd.xlane.f32.xlu0 %v1904_v3 }
 0x1c3   : > { %v1858_v6 = vsub.f32 %v4129_v19, %v1816_v2 }
 0x1c5   : > { %v1876_v7 = vmul.f32 1.442695, %v1858_v6 }
 0x1c7   : > { %3775 = vpow2.f32 %v1876_v7 }
 0x1ca   : > { %v1819_v11 = vpop.xlane.xlu0 %1818 }
 0x1cb   : > { %v1859_v15 = vsub.f32 %v4133_v22, %v1819_v11 }
 0x1cd   : > { %v4192_v16 = vpop.eup %3775  ;;  %v1878_v18 = vmul.f32 1.442695, %v1859_v15 }
 0x1ce   : > { %v1910_v20 = vsel %vm1807_vm3, %v4192_v16, 0.0 }
 0x1cf   : > { %3777 = vpow2.f32 %v1878_v18  ;;  %1911 = vadd.xlane.f32.xlu1 %v1910_v20 }
 0x1d0   : > { %3779 = vpow2.f32 %v1874_v21 }
 0x1d2   : > { %v1831_v23 = vpop.xlane.xlu2 %1830  ;;  %v1828_v19 = vpop.xlane.xlu1 %1827 }
 0x1d3   : > { %v1863_v24 = vsub.f32 %v4141_v30, %v1831_v23  ;;  %v1862_v26 = vsub.f32 %v4139_v29, %v1828_v19  ;;  %v1822_v27 = vpop.xlane.xlu0 %1821 }
 0x1d4   : > { %v1860_v12 = vsub.f32 %v4137_v25, %v1822_v27 }
 0x1d5   : > { %v4199_v28 = vpop.eup %3777  ;;  %v1886_v22 = vmul.f32 1.442695, %v1863_v24  ;;  %v1884_v31 = vmul.f32 1.442695, %v1862_v26 }
 0x1d6   : > { %v1913_v32 = vsel %vm1807_vm3, %v4199_v28, 0.0  ;;  %v1880_v33 = vmul.f32 1.442695, %v1860_v12  ;;  %v4204_v30 = vpop.eup %3779 }
 0x1d7   : > { %3781 = vpow2.f32 %v1886_v22  ;;  %1914 = vadd.xlane.f32.xlu2 %v1913_v32  ;;  %v1907_v49 = vsel %vm1807_vm3, %v4204_v30, 0.0 }
 0x1d8   : > { %3783 = vpow2.f32 %v1884_v31 }
 0x1d9   : > { %3785 = vpow2.f32 %v1880_v33 }
 0x1da   : > { %v1825_v35 = vpop.xlane.xlu2 %1824  ;;  %v1840_v36 = vpop.xlane.xlu1 %1839 }
 0x1db   : > { %v1861_v29 = vsub.f32 %v4149_v34, %v1825_v35  ;;  %v1866_v39 = vsub.f32 %v4151_v37, %v1840_v36  ;;  %v1843_v40 = vpop.xlane.xlu0 %1842 }
 0x1dc   : > { %v1867_v46 = vsub.f32 %v4153_v38, %v1843_v40 }
 0x1dd   : > { %v4208_v41 = vpop.eup %3781  ;;  %v1882_v42 = vmul.f32 1.442695, %v1861_v29  ;;  %v1892_v25 = vmul.f32 1.442695, %v1866_v39 }
 0x1de   : > { %v4210_v43 = vpop.eup %3783  ;;  %v1925_v48 = vsel %vm1807_vm3, %v4208_v41, 0.0  ;;  %v1894_v37 = vmul.f32 1.442695, %v1867_v46 }
 0x1df   : > { %3787 = vpow2.f32 %v1882_v42  ;;  %1926 = vadd.xlane.f32.xlu0 %v1925_v48  ;;  %v1922_v34 = vsel %vm1807_vm3, %v4210_v43, 0.0  ;;  %1908 = vadd.xlane.f32.xlu2 %v1907_v49  ;;  %v4221_v57 = vpop.eup %3785 }
 0x1e0   : > { %3789 = vpow2.f32 %v1892_v25  ;;  %1923 = vadd.xlane.f32.xlu1 %v1922_v34 }
 0x1e1   : > { %3791 = vpow2.f32 %v1894_v37 }
 0x1e2   : > { %v1837_v50 = vpop.xlane.xlu2 %1836  ;;  %v1834_v51 = vpop.xlane.xlu1 %1833 }
 0x1e3   : > { %v1865_v52 = vsub.f32 %v4163_v45, %v1837_v50  ;;  %v1852_v38 = vpop.xlane.xlu0 %1851  ;;  %v1864_v53 = vsub.f32 %v4161_v44, %v1834_v51  ;;  %v1916_v45 = vsel %vm1807_vm3, %v4221_v57, 0.0 }
 0x1e4   : > { %v1870_v0 = vsub.f32 %v4165_v47, %v1852_v38 }
 0x1e5   : > { %v4223_v58 = vpop.eup %3787  ;;  %v1890_v59 = vmul.f32 1.442695, %v1865_v52  ;;  %v1888_v60 = vmul.f32 1.442695, %v1864_v53 }
 0x1e6   : > { %v4225_v61 = vpop.eup %3789  ;;  %v1919_v2 = vsel %vm1807_vm3, %v4223_v58, 0.0  ;;  %v1900_v3 = vmul.f32 1.442695, %v1870_v0 }
 0x1e7   : > { %3793 = vpow2.f32 %v1890_v59  ;;  %1920 = vadd.xlane.f32.xlu0 %v1919_v2  ;;  %v1934_v44 = vsel %vm1807_vm3, %v4225_v61, 0.0  ;;  %v4236_v15 = vpop.eup %3791 }
 0x1e8   : > { %1917 = vadd.xlane.f32.xlu1 %v1916_v45  ;;  %1935 = vadd.xlane.f32.xlu2 %v1934_v44  ;;  %3795 = vpow2.f32 %v1888_v60 }
 0x1e9   : > { %3797 = vpow2.f32 %v1900_v3 }
 0x1ea   : > { %v1855_v6 = vpop.xlane.xlu1 %1854  ;;  %v1846_v7 = vpop.xlane.xlu2 %1845 }
 0x1eb   : > { %v1849_v10 = vpop.xlane.xlu0 %1848  ;;  %v1871_v47 = vsub.f32 %v4175_v55, %v1855_v6  ;;  %v1868_v11 = vsub.f32 %v4173_v54, %v1846_v7  ;;  %v1937_v55 = vsel %vm1807_vm3, %v4236_v15, 0.0  ;;  %v454_v7 = vld [vmem:[%s3933_s21 + $0x78] sm:$0xff] }
 0x1ec   : > { %v1869_v21 = vsub.f32 %v4177_v56, %v1849_v10  ;;  %v470_v10 = vld [vmem:[%s3933_s21 + $0xf8] sm:$0xff] }
 0x1ed   : > { %v4238_v13 = vpop.eup %3793  ;;  %v1902_v18 = vmul.f32 1.442695, %v1871_v47  ;;  %v1896_v20 = vmul.f32 1.442695, %v1868_v11  ;;  %v483_v47 = vld [vmem:[%s3933_s21 + $0x160] sm:$0xff]  ;;  %v502_v11 = vld [vmem:[%s3933_s21 + $0x1f8] sm:$0xff] }
 0x1ee   : > { %v1931_v23 = vsel %vm1807_vm3, %v4238_v13, 0.0  ;;  %v4243_v19 = vpop.eup %3795  ;;  %v1898_v24 = vmul.f32 1.442695, %v1869_v21  ;;  %v452_v21 = vld [vmem:[%s3933_s21 + $0x68] sm:$0xff] }
 0x1ef   : > { %3799 = vpow2.f32 %v1902_v18  ;;  %1932 = vadd.xlane.f32.xlu0 %v1931_v23  ;;  %v1928_v54 = vsel %vm1807_vm3, %v4243_v19, 0.0  ;;  %v4249_v26 = vpop.eup %3797  ;;  %v482_v18 = vld [vmem:[%s3933_s21 + $0x158] sm:$0xff]  ;;  %v468_v23 = vld [vmem:[%s3933_s21 + $0xe8] sm:$0xff] }
 0x1f0   : > { %1938 = vadd.xlane.f32.xlu1 %v1937_v55  ;;  %3801 = vpow2.f32 %v1896_v20  ;;  %1929 = vadd.xlane.f32.xlu2 %v1928_v54  ;;  %v1946_v31 = vsel %vm1807_vm3, %v4249_v26, 0.0  ;;  %v501_v20 = vld [vmem:[%s3933_s21 + $0x1f0] sm:$0xff]  ;;  %v451_v54 = vld [vmem:[%s3933_s21 + $0x60] sm:$0xff] }
 0x1f1   : > { %3803 = vpow2.f32 %v1898_v24 }
 0x1f5   : > { %v4251_v56 = vpop.eup %3799 }
 0x1f6   : > { %v1949_v27 = vsel %vm1807_vm3, %v4251_v56, 0.0  ;;  %v4255_v22 = vpop.eup %3801 }
 0x1f7   : > { %v1940_v12 = vsel %vm1807_vm3, %v4255_v22, 0.0  ;;  %v4261_v32 = vpop.eup %3803 }
 0x1f8   : > { %1947 = vadd.xlane.f32.xlu1 %v1946_v31  ;;  %1950 = vadd.xlane.f32.xlu2 %v1949_v27  ;;  %v1943_v33 = vsel %vm1807_vm3, %v4261_v32, 0.0 }
 0x1f9   : > { %1941 = vadd.xlane.f32.xlu0 %v1940_v12  ;;  %v467_v12 = vld [vmem:[%s3933_s21 + $0xe0] sm:$0xff] }
 0x200   : > { %1944 = vadd.xlane.f32.xlu1 %v1943_v33 }
 0x235   : > { %v1906_v35 = vpop.xlane.xlu0 %1905 }
 0x236   : > { %3805 = vrcp.f32 %v1906_v35 }
 0x23c   : > { %v3806_v36 = vpop.eup %3805 }
 0x23d   : > { %v1968_v29 = vmul.f32 %v3806_v36, %v4186_v1  ;;  %v450_v36 = vld [vmem:[%s3933_s21 + $0x58] sm:$0xff] }
 0x23f   : > { %1984 = vst.msk [vmem:[%s3948_s16] sm:$0xff] %vm1807_vm3, %v1968_v29  ;;  %3690 = vmatmul.msk.f32.vlgmr.msra.gmra.mxu0 %vm1807_vm3, %v1968_v29 }
 0x240   : > { %2202 = vmatpush.msra.mxu0 %v4105_v62 }
 0x242   : > { %v1912_v39 = vpop.xlane.xlu1 %1911 }
 0x243   : > { %3807 = vrcp.f32 %v1912_v39 }
 0x249   : > { %v3808_v40 = vpop.eup %3807 }
 0x24a   : > { %v1970_v42 = vmul.f32 %v3808_v40, %v4192_v16  ;;  %v1915_v25 = vpop.xlane.xlu2 %1914  ;;  %v447_v40 = vld [vmem:[%s3933_s21 + $0x40] sm:$0xff] }
 0x24b   : > { %3809 = vrcp.f32 %v1915_v25  ;;  %v446_v25 = vld [vmem:[%s3933_s21 + $0x38] sm:$0xff] }
 0x24c   : > { %1986 = vst.msk [vmem:[%s3948_s16 + $0x10] sm:$0xff] %vm1807_vm3, %v1970_v42  ;;  %3692 = vmatmul.msk.f32.vlgmr.msra.gmra.mxu2 %vm1807_vm3, %v1970_v42 }
 0x24d   : > { %2248 = vmatpush.msra.mxu2 %v4109_v4 }
 0x251   : > { %v3810_v1 = vpop.eup %3809 }
 0x252   : > { %v1971_v46 = vmul.f32 %v3810_v1, %v4199_v28  ;;  %v1927_v48 = vpop.xlane.xlu0 %1926  ;;  %v1909_v49 = vpop.xlane.xlu2 %1908  ;;  %v445_v1 = vld [vmem:[%s3933_s21 + $0x30] sm:$0xff] }
 0x253   : > { %3811 = vrcp.f32 %v1927_v48  ;;  %v1924_v62 = vpop.xlane.xlu1 %1923  ;;  %v443_v48 = vld [vmem:[%s3933_s21 + $0x20] sm:$0xff] }
 0x254   : > { %1987 = vst.msk [vmem:[%s3948_s16 + $0x18] sm:$0xff] %vm1807_vm3, %v1971_v46  ;;  %3813 = vrcp.f32 %v1924_v62  ;;  %3693 = vmatmul.msk.f32.vlgmr.msra.gmra.mxu3 %vm1807_vm3, %v1971_v46  ;;  %v444_v46 = vld [vmem:[%s3933_s21 + $0x28] sm:$0xff] }
 0x255   : > { %3815 = vrcp.f32 %v1909_v49  ;;  %2271 = vmatpush.msra.mxu3 %v4111_v5  ;;  %v441_v49 = vld [vmem:[%s3933_s21 + $0x10] sm:$0xff]  ;;  %v440_v62 = vld [vmem:[%s3933_s21 + $0x8] sm:$0xff] }
 0x259   : > { %v3812_v16 = vpop.eup %3811 }
 0x25a   : > { %v3814_v34 = vpop.eup %3813  ;;  %v1975_v4 = vmul.f32 %v3812_v16, %v4208_v41  ;;  %v1921_v28 = vpop.xlane.xlu0 %1920  ;;  %v439_v16 = vld [vmem:[%s3933_s21] sm:$0xff] }
 0x25b   : > { %v3816_v37 = vpop.eup %3815  ;;  %v1974_v50 = vmul.f32 %v3814_v34, %v4210_v43  ;;  %3817 = vrcp.f32 %v1921_v28  ;;  %v1918_v51 = vpop.xlane.xlu1 %1917  ;;  %v480_v34 = vld [vmem:[%s3933_s21 + $0x148] sm:$0xff]  ;;  %v465_v28 = vld [vmem:[%s3933_s21 + $0xd0] sm:$0xff] }
 0x25c   : > { %v1936_v52 = vpop.xlane.xlu2 %1935  ;;  %1991 = vst.msk [vmem:[%s3948_s16 + $0x38] sm:$0xff] %vm1807_vm3, %v1975_v4  ;;  %v1969_v38 = vmul.f32 %v3816_v37, %v4204_v30  ;;  %3819 = vrcp.f32 %v1918_v51  ;;  %3697 = vmatmul.msk.f32.vlgmr.msrb.gmra.mxu3 %vm1807_vm3, %v1975_v4  ;;  %v500_v4 = vld [vmem:[%s3933_s21 + $0x1e8] sm:$0xff]  ;;  %v479_v37 = vld [vmem:[%s3933_s21 + $0x140] sm:$0xff] }
 0x25d   : > { %1990 = vst.msk [vmem:[%s3948_s16 + $0x30] sm:$0xff] %vm1807_vm3, %v1974_v50  ;;  %3821 = vrcp.f32 %v1936_v52  ;;  %3696 = vmatmul.msk.f32.vlgmr.msrb.gmra.mxu2 %vm1807_vm3, %v1974_v50  ;;  %2363 = vmatpush.msrb.mxu3 %v4127_v17  ;;  %v499_v50 = vld [vmem:[%s3933_s21 + $0x1e0] sm:$0xff]  ;;  %v464_v51 = vld [vmem:[%s3933_s21 + $0xc8] sm:$0xff]  ;;  %v478_v52 = vld [vmem:[%s3933_s21 + $0x138] sm:$0xff] }
 0x25e   : > { %1985 = vst.msk [vmem:[%s3948_s16 + $0x8] sm:$0xff] %vm1807_vm3, %v1969_v38  ;;  %3691 = vmatmul.msk.f32.vlgmr.msra.gmra.mxu1 %vm1807_vm3, %v1969_v38  ;;  %2340 = vmatpush.msrb.mxu2 %v4121_v14  ;;  %v498_v38 = vld [vmem:[%s3933_s21 + $0x1d8] sm:$0xff] }
 0x25f   : > { %2225 = vmatpush.msra.mxu1 %v4107_v63 }
 0x261   : > { %v3818_v5 = vpop.eup %3817 }
 0x262   : > { %v3820_v30 = vpop.eup %3819  ;;  %v1973_v41 = vmul.f32 %v3818_v5, %v4223_v58  ;;  %v1933_v43 = vpop.xlane.xlu0 %1932  ;;  %v486_v58 = vld [vmem:[%s3933_s21 + $0x178] sm:$0xff]  ;;  %v463_v5 = vld [vmem:[%s3933_s21 + $0xc0] sm:$0xff] }
 0x263   : > { %v3822_v53 = vpop.eup %3821  ;;  %v1972_v59 = vmul.f32 %v3820_v30, %v4221_v57  ;;  %3823 = vrcp.f32 %v1933_v43  ;;  %v1939_v17 = vpop.xlane.xlu1 %1938  ;;  %v485_v57 = vld [vmem:[%s3933_s21 + $0x170] sm:$0xff]  ;;  %v462_v43 = vld [vmem:[%s3933_s21 + $0xb8] sm:$0xff] }
 0x264   : > { %1989 = vst.msk [vmem:[%s3948_s16 + $0x28] sm:$0xff] %vm1807_vm3, %v1973_v41  ;;  %v1978_v14 = vmul.f32 %v3822_v53, %v4225_v61  ;;  %3825 = vrcp.f32 %v1939_v17  ;;  %v1930_v63 = vpop.xlane.xlu2 %1929  ;;  %v484_v61 = vld [vmem:[%s3933_s21 + $0x168] sm:$0xff]  ;;  %v477_v30 = vld [vmem:[%s3933_s21 + $0x130] sm:$0xff] }
 0x265   : > { %1988 = vst.msk [vmem:[%s3948_s16 + $0x20] sm:$0xff] %vm1807_vm3, %v1972_v59  ;;  %3827 = vrcp.f32 %v1930_v63  ;;  %3694 = vmatmul.msk.f32.vlgmr.msrb.gmra.mxu0 %vm1807_vm3, %v1972_v59  ;;  %v476_v53 = vld [vmem:[%s3933_s21 + $0x128] sm:$0xff]  ;;  %v461_v17 = vld [vmem:[%s3933_s21 + $0xb0] sm:$0xff]  ;;  %v495_v63 = vld [vmem:[%s3933_s21 + $0x1c0] sm:$0xff] }
 0x266   : > { %1994 = vst.msk [vmem:[%s3948_s16 + $0x50] sm:$0xff] %vm1807_vm3, %v1978_v14  ;;  %3695 = vmatmul.msk.f32.vlgmr.msrb.gmra.mxu1 %vm1807_vm3, %v1973_v41  ;;  %3700 = vmatmul.msk.f32.vlgmr.msra.gmra.mxu2 %vm1807_vm3, %v1978_v14  ;;  %v497_v41 = vld [vmem:[%s3933_s21 + $0x1d0] sm:$0xff]  ;;  %v496_v59 = vld [vmem:[%s3933_s21 + $0x1c8] sm:$0xff]  ;;  %v475_v14 = vld [vmem:[%s3933_s21 + $0x120] sm:$0xff] }
 0x267   : > { %2294 = vmatpush.msrb.mxu0 %v4113_v8  ;;  %2317 = vmatpush.msrb.mxu1 %v4115_v9 }
 0x268   : > { %2414 = vmatpush.msra.mxu2 %v486_v58  ;;  %v460_v58 = vld [vmem:[%s3933_s21 + $0xa8] sm:$0xff] }
 0x269   : > { %v3824_v60 = vpop.eup %3823 }
 0x26a   : > { %v3826_v0 = vpop.eup %3825  ;;  %v1977_v2 = vmul.f32 %v3824_v60, %v4238_v13  ;;  %2415 = vmatpush.msra.mxu2 %v485_v57  ;;  %v469_v13 = vld [vmem:[%s3933_s21 + $0xf0] sm:$0xff]  ;;  %v474_v57 = vld [vmem:[%s3933_s21 + $0x118] sm:$0xff] }
 0x26b   : > { %v3828_v45 = vpop.eup %3827  ;;  %v1979_v44 = vmul.f32 %v3826_v0, %v4236_v15  ;;  %v1948_v8 = vpop.xlane.xlu1 %1947  ;;  %v453_v15 = vld [vmem:[%s3933_s21 + $0x70] sm:$0xff]  ;;  %v494_v60 = vld [vmem:[%s3933_s21 + $0x1b8] sm:$0xff] }
 0x26c   : > { %1993 = vst.msk [vmem:[%s3948_s16 + $0x48] sm:$0xff] %vm1807_vm3, %v1977_v2  ;;  %v1976_v9 = vmul.f32 %v3828_v45, %v4243_v19  ;;  %3829 = vrcp.f32 %v1948_v8  ;;  %v1942_v3 = vpop.xlane.xlu0 %1941  ;;  %v1951_v6 = vpop.xlane.xlu2 %1950  ;;  %2416 = vmatpush.msra.mxu2 %v484_v61  ;;  %v481_v19 = vld [vmem:[%s3933_s21 + $0x150] sm:$0xff]  ;;  %v459_v61 = vld [vmem:[%s3933_s21 + $0xa0] sm:$0xff]  ;;  %v458_v45 = vld [vmem:[%s3933_s21 + $0x98] sm:$0xff] }
 0x26d   : > { %1995 = vst.msk [vmem:[%s3948_s16 + $0x58] sm:$0xff] %vm1807_vm3, %v1979_v44  ;;  %3831 = vrcp.f32 %v1942_v3  ;;  %3701 = vmatmul.msk.f32.vlgmr.msra.gmra.mxu3 %vm1807_vm3, %v1979_v44  ;;  %v473_v0 = vld [vmem:[%s3933_s21 + $0x110] sm:$0xff]  ;;  %v472_v44 = vld [vmem:[%s3933_s21 + $0x108] sm:$0xff]  ;;  %v471_v3 = vld [vmem:[%s3933_s21 + $0x100] sm:$0xff] }
 0x26e   : > { %1992 = vst.msk [vmem:[%s3948_s16 + $0x40] sm:$0xff] %vm1807_vm3, %v1976_v9  ;;  %3833 = vrcp.f32 %v1951_v6  ;;  %3698 = vmatmul.msk.f32.vlgmr.msra.gmra.mxu0 %vm1807_vm3, %v1976_v9  ;;  %3699 = vmatmul.msk.f32.vlgmr.msra.gmra.mxu1 %vm1807_vm3, %v1977_v2  ;;  %v493_v2 = vld [vmem:[%s3933_s21 + $0x1b0] sm:$0xff]  ;;  %v492_v8 = vld [vmem:[%s3933_s21 + $0x1a8] sm:$0xff]  ;;  %v491_v6 = vld [vmem:[%s3933_s21 + $0x1a0] sm:$0xff] }
 0x26f   : > { %2368 = vmatpush.msra.mxu0 %v454_v7  ;;  %2391 = vmatpush.msra.mxu1 %v470_v10  ;;  %v457_v9 = vld [vmem:[%s3933_s21 + $0x90] sm:$0xff]  ;;  %v456_v7 = vld [vmem:[%s3933_s21 + $0x88] sm:$0xff]  ;;  %v490_v10 = vld [vmem:[%s3933_s21 + $0x198] sm:$0xff] }
 0x270   : > { %2417 = vmatpush.msra.mxu2 %v483_v47  ;;  %2437 = vmatpush.msra.mxu3 %v502_v11  ;;  %v550_v47 = vld [vmem:[%s3933_s21 + $0x378] sm:$0xff]  ;;  %v455_v11 = vld [vmem:[%s3933_s21 + $0x80] sm:$0xff] }
 0x271   : > { %2369 = vmatpush.msra.mxu0 %v453_v15  ;;  %2392 = vmatpush.msra.mxu1 %v469_v13  ;;  %v518_v15 = vld [vmem:[%s3933_s21 + $0x278] sm:$0xff] }
 0x272   : > { %v3830_v55 = vpop.eup %3829  ;;  %2418 = vmatpush.msra.mxu2 %v482_v18  ;;  %2438 = vmatpush.msra.mxu3 %v501_v20  ;;  %v534_v13 = vld [vmem:[%s3933_s21 + $0x2f8] sm:$0xff]  ;;  %v489_v18 = vld [vmem:[%s3933_s21 + $0x190] sm:$0xff] }
 0x273   : > { %v3832_v24 = vpop.eup %3831  ;;  %v1982_v27 = vmul.f32 %v3830_v55, %v4249_v26  ;;  %v1945_v31 = vpop.xlane.xlu1 %1944  ;;  %2370 = vmatpush.msra.mxu0 %v452_v21  ;;  %2393 = vmatpush.msra.mxu1 %v468_v23  ;;  %v466_v26 = vld [vmem:[%s3933_s21 + $0xd8] sm:$0xff]  ;;  %v549_v20 = vld [vmem:[%s3933_s21 + $0x370] sm:$0xff]  ;;  %v488_v55 = vld [vmem:[%s3933_s21 + $0x188] sm:$0xff] }
 0x274   : > { %v3834_v33 = vpop.eup %3833  ;;  %v1980_v35 = vmul.f32 %v3832_v24, %v4255_v22  ;;  %3835 = vrcp.f32 %v1945_v31  ;;  %2419 = vmatpush.msra.mxu2 %v481_v19  ;;  %v449_v22 = vld [vmem:[%s3933_s21 + $0x50] sm:$0xff]  ;;  %2439 = vmatpush.msra.mxu3 %v500_v4  ;;  %v548_v19 = vld [vmem:[%s3933_s21 + $0x368] sm:$0xff]  ;;  %v547_v31 = vld [vmem:[%s3933_s21 + $0x360] sm:$0xff] }
 0x275   : > { %1998 = vst.msk [vmem:[%s3948_s16 + $0x70] sm:$0xff] %vm1807_vm3, %v1982_v27  ;;  %v1983_v29 = vmul.f32 %v3834_v33, %v4251_v56  ;;  %3704 = vmatmul.msk.f32.vlgmr.msrb.gmra.mxu2 %vm1807_vm3, %v1982_v27  ;;  %2371 = vmatpush.msra.mxu0 %v451_v54  ;;  %v448_v56 = vld [vmem:[%s3933_s21 + $0x48] sm:$0xff]  ;;  %v517_v21 = vld [vmem:[%s3933_s21 + $0x270] sm:$0xff]  ;;  %v487_v54 = vld [vmem:[%s3933_s21 + $0x180] sm:$0xff] }
 0x276   : > { %1996 = vst.msk [vmem:[%s3948_s16 + $0x60] sm:$0xff] %vm1807_vm3, %v1980_v35  ;;  %3702 = vmatmul.msk.f32.vlgmr.msrb.gmra.mxu0 %vm1807_vm3, %v1980_v35  ;;  %2394 = vmatpush.msra.mxu1 %v467_v12  ;;  %v533_v23 = vld [vmem:[%s3933_s21 + $0x2f0] sm:$0xff]  ;;  %v516_v24 = vld [vmem:[%s3933_s21 + $0x268] sm:$0xff]  ;;  %v515_v12 = vld [vmem:[%s3933_s21 + $0x260] sm:$0xff] }
 0x277   : > { %1999 = vst.msk [vmem:[%s3948_s16 + $0x78] sm:$0xff] %vm1807_vm3, %v1983_v29  ;;  %3705 = vmatmul.msk.f32.vlgmr.msrb.gmra.mxu3 %vm1807_vm3, %v1983_v29  ;;  %2372 = vmatpush.msra.mxu0 %v450_v36  ;;  %v532_v27 = vld [vmem:[%s3933_s21 + $0x2e8] sm:$0xff]  ;;  %v531_v33 = vld [vmem:[%s3933_s21 + $0x2e0] sm:$0xff]  ;;  %v546_v35 = vld [vmem:[%s3933_s21 + $0x358] sm:$0xff] }
 0x278   : > { %2395 = vmatpush.msra.mxu1 %v466_v26  ;;  %2420 = vmatpush.msra.mxu2 %v480_v34  ;;  %v566_v36 = vld [vmem:[%s3933_s21 + $0x3f8] sm:$0xff] }
 0x279   : > { %2373 = vmatpush.msra.mxu0 %v449_v22  ;;  %2440 = vmatpush.msra.mxu3 %v499_v50  ;;  %v514_v29 = vld [vmem:[%s3933_s21 + $0x258] sm:$0xff]  ;;  %v541_v50 = vld [vmem:[%s3933_s21 + $0x330] sm:$0xff] }
 0x27a   : > { %v3836_v39 = vpop.eup %3835  ;;  %2396 = vmatpush.msra.mxu1 %v465_v28  ;;  %2421 = vmatpush.msra.mxu2 %v479_v37  ;;  %v530_v26 = vld [vmem:[%s3933_s21 + $0x2d8] sm:$0xff] }
 0x27b   : > { %v1981_v42 = vmul.f32 %v3836_v39, %v4261_v32  ;;  %2374 = vmatpush.msra.mxu0 %v448_v56  ;;  %v442_v32 = vld [vmem:[%s3933_s21 + $0x18] sm:$0xff]  ;;  %2441 = vmatpush.msra.mxu3 %v498_v38  ;;  %v545_v56 = vld [vmem:[%s3933_s21 + $0x350] sm:$0xff] }
 0x27c   : > { %2397 = vmatpush.msra.mxu1 %v464_v51  ;;  %2422 = vmatpush.msra.mxu2 %v478_v52  ;;  %v565_v39 = vld [vmem:[%s3933_s21 + $0x3f0] sm:$0xff]  ;;  %v542_v34 = vld [vmem:[%s3933_s21 + $0x338] sm:$0xff] }
 0x27d   : > { %1997 = vst.msk [vmem:[%s3948_s16 + $0x68] sm:$0xff] %vm1807_vm3, %v1981_v42  ;;  %3703 = vmatmul.msk.f32.vlgmr.msrb.gmra.mxu1 %vm1807_vm3, %v1981_v42  ;;  %2375 = vmatpush.msra.mxu0 %v447_v40  ;;  %v513_v40 = vld [vmem:[%s3933_s21 + $0x250] sm:$0xff]  ;;  %v562_v4 = vld [vmem:[%s3933_s21 + $0x3d8] sm:$0xff] }
 0x27e   : > { %2398 = vmatpush.msra.mxu1 %v463_v5  ;;  %2423 = vmatpush.msra.mxu2 %v477_v30  ;;  %v529_v42 = vld [vmem:[%s3933_s21 + $0x2d0] sm:$0xff]  ;;  %v510_v28 = vld [vmem:[%s3933_s21 + $0x238] sm:$0xff]  ;;  %v540_v5 = vld [vmem:[%s3933_s21 + $0x328] sm:$0xff] }
 0x27f   : > { %2376 = vmatpush.msra.mxu0 %v446_v25  ;;  %2442 = vmatpush.msra.mxu3 %v497_v41  ;;  %v544_v25 = vld [vmem:[%s3933_s21 + $0x348] sm:$0xff]  ;;  %v526_v37 = vld [vmem:[%s3933_s21 + $0x2b8] sm:$0xff]  ;;  %v561_v51 = vld [vmem:[%s3933_s21 + $0x3d0] sm:$0xff] }
 0x280   : > { %2399 = vmatpush.msra.mxu1 %v462_v43  ;;  %2424 = vmatpush.msra.mxu2 %v476_v53  ;;  %v509_v52 = vld [vmem:[%s3933_s21 + $0x230] sm:$0xff]  ;;  %v560_v30 = vld [vmem:[%s3933_s21 + $0x3c8] sm:$0xff]  ;;  %v539_v53 = vld [vmem:[%s3933_s21 + $0x320] sm:$0xff] }
 0x281   : > { %2377 = vmatpush.msra.mxu0 %v445_v1  ;;  %2443 = vmatpush.msra.mxu3 %v496_v59  ;;  %v564_v1 = vld [vmem:[%s3933_s21 + $0x3e8] sm:$0xff]  ;;  %v525_v38 = vld [vmem:[%s3933_s21 + $0x2b0] sm:$0xff]  ;;  %v559_v59 = vld [vmem:[%s3933_s21 + $0x3c0] sm:$0xff] }
 0x282   : > { %2400 = vmatpush.msra.mxu1 %v461_v17  ;;  %2425 = vmatpush.msra.mxu2 %v475_v14  ;;  %v508_v41 = vld [vmem:[%s3933_s21 + $0x228] sm:$0xff]  ;;  %v507_v17 = vld [vmem:[%s3933_s21 + $0x220] sm:$0xff] }
 0x283   : > { %2378 = vmatpush.msra.mxu0 %v444_v46  ;;  %2444 = vmatpush.msra.mxu3 %v495_v63  ;;  %v512_v46 = vld [vmem:[%s3933_s21 + $0x248] sm:$0xff]  ;;  %v523_v14 = vld [vmem:[%s3933_s21 + $0x2a0] sm:$0xff]  ;;  %v538_v63 = vld [vmem:[%s3933_s21 + $0x318] sm:$0xff] }
 0x284   : > { %2401 = vmatpush.msra.mxu1 %v460_v58  ;;  %2426 = vmatpush.msra.mxu2 %v474_v57  ;;  %v524_v43 = vld [vmem:[%s3933_s21 + $0x2a8] sm:$0xff]  ;;  %v558_v58 = vld [vmem:[%s3933_s21 + $0x3b8] sm:$0xff] }
 0x285   : > { %2379 = vmatpush.msra.mxu0 %v443_v48  ;;  %2445 = vmatpush.msra.mxu3 %v494_v60  ;;  %v528_v48 = vld [vmem:[%s3933_s21 + $0x2c8] sm:$0xff]  ;;  %v506_v57 = vld [vmem:[%s3933_s21 + $0x218] sm:$0xff] }
 0x286   : > { %2402 = vmatpush.msra.mxu1 %v459_v61  ;;  %2427 = vmatpush.msra.mxu2 %v473_v0  ;;  %v522_v60 = vld [vmem:[%s3933_s21 + $0x298] sm:$0xff]  ;;  %v537_v61 = vld [vmem:[%s3933_s21 + $0x310] sm:$0xff] }
 0x287   : > { %2380 = vmatpush.msra.mxu0 %v442_v32  ;;  %2446 = vmatpush.msra.mxu3 %v493_v2  ;;  %v543_v32 = vld [vmem:[%s3933_s21 + $0x340] sm:$0xff]  ;;  %v557_v0 = vld [vmem:[%s3933_s21 + $0x3b0] sm:$0xff] }
 0x288   : > { %2403 = vmatpush.msra.mxu1 %v458_v45  ;;  %2428 = vmatpush.msra.mxu2 %v472_v44  ;;  %v505_v2 = vld [vmem:[%s3933_s21 + $0x210] sm:$0xff] }
 0x289   : > { %2381 = vmatpush.msra.mxu0 %v441_v49  ;;  %2447 = vmatpush.msra.mxu3 %v492_v8  ;;  %v563_v49 = vld [vmem:[%s3933_s21 + $0x3e0] sm:$0xff]  ;;  %v521_v45 = vld [vmem:[%s3933_s21 + $0x290] sm:$0xff]  ;;  %v536_v8 = vld [vmem:[%s3933_s21 + $0x308] sm:$0xff] }
 0x28a   : > { %2404 = vmatpush.msra.mxu1 %v457_v9  ;;  %2429 = vmatpush.msra.mxu2 %v471_v3  ;;  %v556_v9 = vld [vmem:[%s3933_s21 + $0x3a8] sm:$0xff] }
 0x28b   : > { %2382 = vmatpush.msra.mxu0 %v440_v62  ;;  %2448 = vmatpush.msra.mxu3 %v491_v6  ;;  %v511_v62 = vld [vmem:[%s3933_s21 + $0x240] sm:$0xff]  ;;  %v504_v3 = vld [vmem:[%s3933_s21 + $0x208] sm:$0xff] }
 0x28c   : > { %2405 = vmatpush.msra.mxu1 %v456_v7  ;;  %2506 = vmatpush.msrb.mxu2 %v550_v47  ;;  %v520_v6 = vld [vmem:[%s3933_s21 + $0x288] sm:$0xff]  ;;  %v535_v7 = vld [vmem:[%s3933_s21 + $0x300] sm:$0xff] }
 0x28d   : > { %2383 = vmatpush.msra.mxu0 %v439_v16  ;;  %2449 = vmatpush.msra.mxu3 %v490_v10  ;;  %v527_v16 = vld [vmem:[%s3933_s21 + $0x2c0] sm:$0xff] }
 0x28e   : > { %2406 = vmatpush.msra.mxu1 %v455_v11  ;;  %2507 = vmatpush.msrb.mxu2 %v549_v20  ;;  %v555_v10 = vld [vmem:[%s3933_s21 + $0x3a0] sm:$0xff]  ;;  %v552_v20 = vld [vmem:[%s3933_s21 + $0x388] sm:$0xff] }
 0x28f   : > { %2460 = vmatpush.msrb.mxu0 %v518_v15  ;;  %2450 = vmatpush.msra.mxu3 %v489_v18  ;;  %v503_v47 = vld [vmem:[%s3933_s21 + $0x200] sm:$0xff]  ;;  %v554_v15 = vld [vmem:[%s3933_s21 + $0x398] sm:$0xff] }
 0x290   : > { %2483 = vmatpush.msrb.mxu1 %v534_v13  ;;  %2508 = vmatpush.msrb.mxu2 %v548_v19  ;;  %v519_v11 = vld [vmem:[%s3933_s21 + $0x280] sm:$0xff]  ;;  %v553_v13 = vld [vmem:[%s3933_s21 + $0x390] sm:$0xff] }
 0x291   : > { %2461 = vmatpush.msrb.mxu0 %v517_v21  ;;  %2451 = vmatpush.msra.mxu3 %v488_v55  ;;  %v551_v21 = vld [vmem:[%s3933_s21 + $0x380] sm:$0xff] }
 0x292   : > { %2484 = vmatpush.msrb.mxu1 %v533_v23  ;;  %2509 = vmatpush.msrb.mxu2 %v547_v31 }
 0x293   : > { %2462 = vmatpush.msrb.mxu0 %v516_v24  ;;  %2452 = vmatpush.msra.mxu3 %v487_v54 }
 0x294   : > { %2485 = vmatpush.msrb.mxu1 %v532_v27  ;;  %2510 = vmatpush.msrb.mxu2 %v546_v35 }
 0x295   : > { %2463 = vmatpush.msrb.mxu0 %v515_v12  ;;  %2529 = vmatpush.msrb.mxu3 %v566_v36 }
 0x296   : > { %2486 = vmatpush.msrb.mxu1 %v531_v33  ;;  %2511 = vmatpush.msrb.mxu2 %v545_v56 }
 0x297   : > { %2464 = vmatpush.msrb.mxu0 %v514_v29  ;;  %2530 = vmatpush.msrb.mxu3 %v565_v39 }
 0x298   : > { %2487 = vmatpush.msrb.mxu1 %v530_v26  ;;  %2512 = vmatpush.msrb.mxu2 %v544_v25 }
 0x299   : > { %2465 = vmatpush.msrb.mxu0 %v513_v40  ;;  %2531 = vmatpush.msrb.mxu3 %v564_v1  ;;  %v3847_v40 = vld [vmem:[#allocation2] sm:$0xff] }
 0x29a   : > { %2488 = vmatpush.msrb.mxu1 %v529_v42  ;;  %2513 = vmatpush.msrb.mxu2 %v543_v32 }
 0x29b   : > { %2466 = vmatpush.msrb.mxu0 %v512_v46  ;;  %2532 = vmatpush.msrb.mxu3 %v563_v49 }
 0x29c   : > { %2489 = vmatpush.msrb.mxu1 %v528_v48  ;;  %2514 = vmatpush.msrb.mxu2 %v542_v34 }
 0x29d   : > { %2467 = vmatpush.msrb.mxu0 %v511_v62  ;;  %2533 = vmatpush.msrb.mxu3 %v562_v4  ;;  %v3848_v62 = vld [vmem:[#allocation2 + $0x8] sm:$0xff] }
 0x29e   : > { %2490 = vmatpush.msrb.mxu1 %v527_v16  ;;  %2515 = vmatpush.msrb.mxu2 %v541_v50 }
 0x29f   : > { %2468 = vmatpush.msrb.mxu0 %v510_v28  ;;  %2534 = vmatpush.msrb.mxu3 %v561_v51 }
 0x2a0   : > { %2491 = vmatpush.msrb.mxu1 %v526_v37  ;;  %2516 = vmatpush.msrb.mxu2 %v540_v5 }
 0x2a1   : > { %2469 = vmatpush.msrb.mxu0 %v509_v52  ;;  %2535 = vmatpush.msrb.mxu3 %v560_v30 }
 0x2a2   : > { %2492 = vmatpush.msrb.mxu1 %v525_v38  ;;  %2517 = vmatpush.msrb.mxu2 %v539_v53 }
 0x2a3   : > { %2470 = vmatpush.msrb.mxu0 %v508_v41  ;;  %2536 = vmatpush.msrb.mxu3 %v559_v59 }
 0x2a4   : > { %2493 = vmatpush.msrb.mxu1 %v524_v43  ;;  %2518 = vmatpush.msrb.mxu2 %v538_v63 }
 0x2a5   : > { %2471 = vmatpush.msrb.mxu0 %v507_v17  ;;  %2537 = vmatpush.msrb.mxu3 %v558_v58 }
 0x2a6   : > { %2494 = vmatpush.msrb.mxu1 %v523_v14  ;;  %2519 = vmatpush.msrb.mxu2 %v537_v61 }
 0x2a7   : > { %2472 = vmatpush.msrb.mxu0 %v506_v57  ;;  %2538 = vmatpush.msrb.mxu3 %v557_v0 }
 0x2a8   : > { %2495 = vmatpush.msrb.mxu1 %v522_v60  ;;  %2520 = vmatpush.msrb.mxu2 %v536_v8 }
 0x2a9   : > { %2473 = vmatpush.msrb.mxu0 %v505_v2  ;;  %2539 = vmatpush.msrb.mxu3 %v556_v9 }
 0x2aa   : > { %2496 = vmatpush.msrb.mxu1 %v521_v45  ;;  %2521 = vmatpush.msrb.mxu2 %v535_v7  ;;  %v3857_v45 = vmov 7.0  }
 0x2ab   : > { %2474 = vmatpush.msrb.mxu0 %v504_v3  ;;  %2540 = vmatpush.msrb.mxu3 %v555_v10  ;;  %3837 = vrcp.f32 %v3857_v45  ;;  %v612_v45 = vld [vmem:[%s3943_s13 + $0xe8] sm:$0xff] }
 0x2ac   : > { %2497 = vmatpush.msrb.mxu1 %v520_v6 }
 0x2ad   : > { %2475 = vmatpush.msrb.mxu0 %v503_v47  ;;  %2541 = vmatpush.msrb.mxu3 %v554_v15 }
 0x2ae   : > { %2498 = vmatpush.msrb.mxu1 %v519_v11 }
 0x2af   : > { %2542 = vmatpush.msrb.mxu3 %v553_v13 }
 0x2b1   : > { %2543 = vmatpush.msrb.mxu3 %v552_v20 }
 0x2b3   : > { %2544 = vmatpush.msrb.mxu3 %v551_v21 }
 0x2bc   : > { %v2020_v22 = vpop.f32.mrf.mxu0 }
 0x2bd   : > { %2384 = vmatmul.f32.vlgmr.msra.gmra.mxu0 %v2020_v22 }
 0x2cf   : > { %v2066_v44 = vpop.f32.mrf.mxu2 }
 0x2d0   : > { %2430 = vmatmul.f32.vlgmr.msra.gmra.mxu2 %v2066_v44  ;;  %v3838_v44 = vpop.eup %3837 }
 0x2d1   : > { %v2559_v8 = vmul.f32 7.0, %v3838_v44  ;;  %vm2563_vm4 = vweird.f32 %v3838_v44 }
 0x2d3   : > { %v2560_v9 = vsub.f32 1.0, %v2559_v8  ;;  %v644_v8 = vld [vmem:[%s3943_s13 + $0x1e8] sm:$0xff] }
 0x2d5   : > { %v2561_v3 = vmul.f32 %v3838_v44, %v2560_v9  ;;  %v595_v9 = vld [vmem:[%s3943_s13 + $0x60] sm:$0xff] }
 0x2d7   : > { %v2089_v18 = vpop.f32.mrf.mxu3  ;;  %v2562_v6 = vadd.f32 %v3838_v44, %v2561_v3  ;;  %v611_v3 = vld [vmem:[%s3943_s13 + $0xe0] sm:$0xff] }
 0x2d8   : > { %2453 = vmatmul.f32.vlgmr.msra.gmra.mxu3 %v2089_v18 }
 0x2d9   : > { %v4467_v7 = vsel %vm2563_vm4, %v3838_v44, %v2562_v6  ;;  %v628_v44 = vld [vmem:[%s3943_s13 + $0x168] sm:$0xff]  ;;  %v627_v6 = vld [vmem:[%s3943_s13 + $0x160] sm:$0xff] }
 0x2db   : > { %v2043_v23 = vpop.f32.mrf.mxu1 }
 0x2dc   : > { %2407 = vmatmul.f32.vlgmr.msra.gmra.mxu1 %v2043_v23 }
 0x2df   : > { %v2181_v24 = vpop.f32.mrf.mxu3 }
 0x2e0   : > { %v2158_v19 = vpop.f32.mrf.mxu2 }
 0x2e2   : > { %v2112_v55 = vpop.f32.mrf.mxu0 }
 0x2e3   : > { %v2135_v54 = vpop.f32.mrf.mxu1 }
 0x2e9   : > { %v2250_v27 = vpop.f32.mrf.mxu2 }
 0x2ea   : > { %2433 = vmatmul.f32.gmra.mxu2 %v2250_v27  ;;  %v570_v27 = vld [vmem:[%s3938_s26 + $0x18] sm:$0x7f] }
 0x2eb   : > { %v2204_v31 = vpop.f32.mrf.mxu0  ;;  %v2227_v12 = vpop.f32.mrf.mxu1  ;;  %3715 = vmatpush.msk.msra.mxu3 %vm846_vm1, %v570_v27  ;;  %v591_v27 = vld [vmem:[%s3943_s13 + $0x40] sm:$0xff] }
 0x2ec   : > { %2387 = vmatmul.f32.gmra.mxu0 %v2204_v31  ;;  %2410 = vmatmul.f32.gmra.mxu1 %v2227_v12 }
 0x2f0   : > { %v2273_v33 = vpop.f32.mrf.mxu3 }
 0x2f1   : > { %2456 = vmatmul.f32.gmra.mxu3 %v2273_v33  ;;  %v573_v33 = vld [vmem:[%s3938_s26 + $0x30] sm:$0x7f] }
 0x2f2   : > { %2522 = vmatmul.f32.vlgmr.msrb.gmra.mxu2 %v2158_v19 }
 0x2f3   : > { %v2296_v29 = vpop.f32.mrf.mxu0 }
 0x2f4   : > { %2476 = vmatmul.f32.vlgmr.msrb.gmra.mxu0 %v2112_v55  ;;  %2499 = vmatmul.f32.vlgmr.msrb.gmra.mxu1 %v2135_v54  ;;  %v569_v55 = vld [vmem:[%s3938_s26 + $0x10] sm:$0x7f]  ;;  %v567_v54 = vld [vmem:[%s3938_s26] sm:$0x7f] }
 0x2f5   : > { %3712 = vmatpush.msk.msra.mxu2 %vm846_vm1, %v569_v55  ;;  %3706 = vmatpush.msk.msra.mxu0 %vm846_vm1, %v567_v54  ;;  %v608_v55 = vld [vmem:[%s3943_s13 + $0xc8] sm:$0xff] }
 0x2f6   : > { %v624_v54 = vld [vmem:[%s3943_s13 + $0x148] sm:$0xff] }
 0x2f7   : > { %3724 = vmatpush.msk.msrb.mxu2 %vm846_vm1, %v573_v33  ;;  %v639_v33 = vld [vmem:[%s3943_s13 + $0x1c0] sm:$0xff] }
 0x2f8   : > { %v2342_v35 = vpop.f32.mrf.mxu2 }
 0x2f9   : > { %2545 = vmatmul.f32.vlgmr.msrb.gmra.mxu3 %v2181_v24  ;;  %v568_v24 = vld [vmem:[%s3938_s26 + $0x8] sm:$0x7f] }
 0x2fa   : > { %2525 = vmatmul.f32.gmra.mxu2 %v2342_v35  ;;  %v2319_v36 = vpop.f32.mrf.mxu1  ;;  %v2365_v26 = vpop.f32.mrf.mxu3  ;;  %3709 = vmatpush.msk.msra.mxu1 %vm846_vm1, %v568_v24  ;;  %v571_v35 = vld [vmem:[%s3938_s26 + $0x20] sm:$0x7f]  ;;  %v640_v24 = vld [vmem:[%s3943_s13 + $0x1c8] sm:$0xff] }
 0x2fb   : > { %3718 = vmatpush.msk.msrb.mxu0 %vm846_vm1, %v571_v35  ;;  %v590_v35 = vld [vmem:[%s3943_s13 + $0x38] sm:$0xff] }
 0x2fc   : > { %2479 = vmatmul.f32.gmra.mxu0 %v2296_v29  ;;  %2502 = vmatmul.f32.gmra.mxu1 %v2319_v36  ;;  %v572_v36 = vld [vmem:[%s3938_s26 + $0x28] sm:$0x7f] }
 0x2fd   : > { %3721 = vmatpush.msk.msrb.mxu1 %vm846_vm1, %v572_v36  ;;  %v606_v36 = vld [vmem:[%s3943_s13 + $0xb8] sm:$0xff] }
 0x301   : > { %2548 = vmatmul.f32.gmra.mxu3 %v2365_v26  ;;  %v574_v26 = vld [vmem:[%s3938_s26 + $0x38] sm:$0x7f] }
 0x302   : > { %3727 = vmatpush.msk.msrb.mxu3 %vm846_vm1, %v574_v26  ;;  %v638_v26 = vld [vmem:[%s3943_s13 + $0x1b8] sm:$0xff] }
 0x33a   : > { %v2385_v22 = vpop.f32.mrf.mxu0 }
 0x33b   : > { %v2386_v42 = vadd.f32 %v3847_v40, %v2385_v22 }
 0x353   : > { %v2431_v39 = vpop.f32.mrf.mxu2 }
 0x359   : > { %v2408_v56 = vpop.f32.mrf.mxu1 }
 0x35a   : > { %v2409_v25 = vadd.f32 %v2408_v56, %v2386_v42 }
 0x35b   : > { %v2454_v48 = vpop.f32.mrf.mxu3 }
 0x35c   : > { %v2432_v32 = vadd.f32 %v2431_v39, %v2409_v25 }
 0x35e   : > { %v2455_v34 = vadd.f32 %v2454_v48, %v2432_v32 }
 0x369   : > { %v2388_v1 = vpop.f32.mrf.mxu0  ;;  %v2411_v46 = vpop.f32.mrf.mxu1 }
 0x36a   : > { %v2389_v16 = vadd.f32 %v3848_v62, %v2388_v1 }
 0x36c   : > { %v2412_v28 = vadd.f32 %v2411_v46, %v2389_v16 }
 0x36d   : > { %v2434_v49 = vpop.f32.mrf.mxu2 }
 0x36e   : > { %v2435_v38 = vadd.f32 %v2434_v49, %v2412_v28  ;;  %v577_v28 = vld [vmem:[%s3938_s26 + $0x50] sm:$0x7f] }
 0x371   : > { %v2477_v4 = vpop.f32.mrf.mxu0  ;;  %v2500_v50 = vpop.f32.mrf.mxu1 }
 0x372   : > { %v2478_v37 = vadd.f32 %v2477_v4, %v2455_v34 }
 0x374   : > { %v2457_v51 = vpop.f32.mrf.mxu3  ;;  %v2501_v5 = vadd.f32 %v2500_v50, %v2478_v37  ;;  %v575_v37 = vld [vmem:[%s3938_s26 + $0x40] sm:$0x7f]  ;;  %v576_v50 = vld [vmem:[%s3938_s26 + $0x48] sm:$0x7f] }
 0x375   : > { %v2523_v52 = vpop.f32.mrf.mxu2  ;;  %v2458_v30 = vadd.f32 %v2457_v51, %v2435_v38  ;;  %v578_v51 = vld [vmem:[%s3938_s26 + $0x58] sm:$0x7f] }
 0x376   : > { %v2524_v43 = vadd.f32 %v2523_v52, %v2501_v5 }
 0x379   : > { %v2480_v41 = vpop.f32.mrf.mxu0  ;;  %v2503_v14 = vpop.f32.mrf.mxu1 }
 0x37a   : > { %v2481_v53 = vadd.f32 %v2480_v41, %v2458_v30  ;;  %v581_v41 = vld [vmem:[%s3938_s26 + $0x70] sm:$0x7f] }
 0x37c   : > { %v2546_v59 = vpop.f32.mrf.mxu3  ;;  %v2504_v63 = vadd.f32 %v2503_v14, %v2481_v53  ;;  %v580_v53 = vld [vmem:[%s3938_s26 + $0x68] sm:$0x7f]  ;;  %v614_v14 = vld [vmem:[%s3943_s13 + $0xf8] sm:$0xff] }
 0x37d   : > { %v2547_v17 = vadd.f32 %v2546_v59, %v2524_v43  ;;  %v2526_v57 = vpop.f32.mrf.mxu2  ;;  %v579_v43 = vld [vmem:[%s3938_s26 + $0x60] sm:$0x7f]  ;;  %v582_v59 = vld [vmem:[%s3938_s26 + $0x78] sm:$0x7f] }
 0x37e   : > { %v2527_v60 = vadd.f32 %v2526_v57, %v2504_v63  ;;  %v630_v63 = vld [vmem:[%s3943_s13 + $0x178] sm:$0xff]  ;;  %v597_v57 = vld [vmem:[%s3943_s13 + $0x70] sm:$0xff] }
 0x37f   : > { %v2552_v58 = vsel %vm839_vm2, %v2547_v17, 0.0 }
 0x380   : > { %2553 = vadd.xlane.f32.xlu2 %v2552_v58  ;;  %v646_v58 = vld [vmem:[%s3943_s13 + $0x1f8] sm:$0xff] }
 0x384   : > { %v2549_v61 = vpop.f32.mrf.mxu3 }
 0x385   : > { %v2550_v0 = vadd.f32 %v2549_v61, %v2527_v60  ;;  %v613_v60 = vld [vmem:[%s3943_s13 + $0xf0] sm:$0xff] }
 0x386   : > { %v629_v61 = vld [vmem:[%s3943_s13 + $0x170] sm:$0xff] }
 0x387   : > { %v2555_v2 = vsel %vm839_vm2, %v2550_v0, 0.0 }
 0x388   : > { %2556 = vadd.xlane.f32.xlu0 %v2555_v2  ;;  %v596_v2 = vld [vmem:[%s3943_s13 + $0x68] sm:$0xff] }
 0x3f3   : > { %v2554_v10 = vpop.xlane.xlu2 %2553 }
 0x3f4   : > { %v2565_v47 = vmul.f32 %v4467_v7, %v2554_v10  ;;  %v643_v10 = vld [vmem:[%s3943_s13 + $0x1e0] sm:$0xff] }
 0x3f6   : > { %v2567_v11 = vsub.f32 %v2547_v17, %v2565_v47  ;;  %v598_v17 = vld [vmem:[%s3943_s13 + $0x78] sm:$0xff] }
 0x3f7   : > { %v594_v47 = vld [vmem:[%s3943_s13 + $0x58] sm:$0xff] }
 0x3f8   : > { %v2569_v15 = vmul.f32 %v2567_v11, %v2567_v11 }
 0x3fa   : > { %v2571_v13 = vsel %vm839_vm2, %v2569_v15, 0.0  ;;  %v626_v15 = vld [vmem:[%s3943_s13 + $0x158] sm:$0xff] }
 0x3fb   : > { %v2557_v18 = vpop.xlane.xlu0 %2556  ;;  %2572 = vadd.xlane.f32.xlu1 %v2571_v13  ;;  %v642_v13 = vld [vmem:[%s3943_s13 + $0x1d8] sm:$0xff] }
 0x3fc   : > { %v2566_v20 = vmul.f32 %v4467_v7, %v2557_v18  ;;  %v593_v18 = vld [vmem:[%s3943_s13 + $0x50] sm:$0xff] }
 0x3fe   : > { %v2568_v21 = vsub.f32 %v2550_v0, %v2566_v20  ;;  %v645_v0 = vld [vmem:[%s3943_s13 + $0x1f0] sm:$0xff] }
 0x3ff   : > { %v609_v20 = vld [vmem:[%s3943_s13 + $0xd0] sm:$0xff] }
 0x400   : > { %v2570_v23 = vmul.f32 %v2568_v21, %v2568_v21 }
 0x402   : > { %v2574_v19 = vsel %vm839_vm2, %v2570_v23, 0.0  ;;  %v641_v23 = vld [vmem:[%s3943_s13 + $0x1d0] sm:$0xff] }
 0x403   : > { %2575 = vadd.xlane.f32.xlu2 %v2574_v19  ;;  %v592_v19 = vld [vmem:[%s3943_s13 + $0x48] sm:$0xff] }
 0x46e   : > { %v2573_v31 = vpop.xlane.xlu1 %2572 }
 0x46f   : > { %v2577_v12 = vmul.f32 %v2573_v31, %v4467_v7  ;;  %v607_v31 = vld [vmem:[%s3943_s13 + $0xc0] sm:$0xff] }
 0x471   : > { %v2579_v29 = vadd.f32 1e-05, %v2577_v12  ;;  %v623_v12 = vld [vmem:[%s3943_s13 + $0x140] sm:$0xff] }
 0x473   : > { %3839 = vrsqrt.f32 %v2579_v29  ;;  %vm2587_vm6 = vweird.f32 %v2579_v29 }
 0x476   : > { %v2576_v22 = vpop.xlane.xlu2 %2575 }
 0x477   : > { %v2578_v56 = vmul.f32 %v2576_v22, %v4467_v7  ;;  %v589_v22 = vld [vmem:[%s3943_s13 + $0x30] sm:$0xff] }
 0x479   : > { %v3840_v39 = vpop.eup %3839  ;;  %v2580_v40 = vadd.f32 1e-05, %v2578_v56  ;;  %v605_v56 = vld [vmem:[%s3943_s13 + $0xb0] sm:$0xff] }
 0x47a   : > { %v2582_v42 = vmul.f32 %v3840_v39, %v2579_v29  ;;  %vm2588_vm5 = vweird.f32 %v3840_v39  ;;  %v622_v29 = vld [vmem:[%s3943_s13 + $0x138] sm:$0xff] }
 0x47b   : > { %3841 = vrsqrt.f32 %v2580_v40  ;;  %vm2589_vm7 = vmor %vm2587_vm6, %vm2588_vm5  ;;  %vm2597_vm9 = vweird.f32 %v2580_v40 }
 0x47c   : > { %v2583_v25 = vmul.f32 %v3840_v39, %v2582_v42  ;;  %v588_v42 = vld [vmem:[%s3943_s13 + $0x28] sm:$0xff] }
 0x47e   : > { %v2584_v1 = vmul.f32 0.5, %v2583_v25  ;;  %v604_v25 = vld [vmem:[%s3943_s13 + $0xa8] sm:$0xff] }
 0x480   : > { %v2585_v46 = vsub.f32 1.5, %v2584_v1  ;;  %v620_v1 = vld [vmem:[%s3943_s13 + $0x128] sm:$0xff] }
 0x481   : > { %v3842_v48 = vpop.eup %3841 }
 0x482   : > { %v2586_v32 = vmul.f32 %v3840_v39, %v2585_v46  ;;  %v2592_v49 = vmul.f32 %v3842_v48, %v2580_v40  ;;  %vm2598_vm8 = vweird.f32 %v3842_v48  ;;  %v637_v40 = vld [vmem:[%s3943_s13 + $0x1b0] sm:$0xff]  ;;  %v636_v46 = vld [vmem:[%s3943_s13 + $0x1a8] sm:$0xff] }
 0x483   : > { %vm2599_vm10 = vmor %vm2597_vm9, %vm2598_vm8 }
 0x484   : > { %v2590_v62 = vsel %vm2589_vm7, %v3840_v39, %v2586_v32  ;;  %v2593_v16 = vmul.f32 %v3842_v48, %v2592_v49  ;;  %v621_v39 = vld [vmem:[%s3943_s13 + $0x130] sm:$0xff]  ;;  %v603_v32 = vld [vmem:[%s3943_s13 + $0xa0] sm:$0xff] }
 0x485   : > { %v4491_v34 = vmul.f32 %v2590_v62, %v2567_v11  ;;  %v610_v11 = vld [vmem:[%s3943_s13 + $0xd8] sm:$0xff]  ;;  %v619_v49 = vld [vmem:[%s3943_s13 + $0x120] sm:$0xff] }
 0x486   : > { %v2594_v4 = vmul.f32 0.5, %v2593_v16  ;;  %v635_v62 = vld [vmem:[%s3943_s13 + $0x1a0] sm:$0xff]  ;;  %v586_v16 = vld [vmem:[%s3943_s13 + $0x18] sm:$0xff] }
 0x487   : > { %3707 = vmatmul.msk.f32.vlgmr.msra.gmra.mxu0 %vm839_vm2, %v4491_v34  ;;  %3710 = vmatmul.msk.f32.vlgmr.msra.gmra.mxu1 %vm839_vm2, %v4491_v34 }
 0x488   : > { %v2595_v52 = vsub.f32 1.5, %v2594_v4  ;;  %3713 = vmatmul.msk.f32.vlgmr.msra.gmra.mxu2 %vm839_vm2, %v4491_v34  ;;  %3716 = vmatmul.msk.f32.vlgmr.msra.gmra.mxu3 %vm839_vm2, %v4491_v34  ;;  %v602_v4 = vld [vmem:[%s3943_s13 + $0x98] sm:$0xff] }
 0x489   : > { %3736 = vmatpush.msk.msra.mxu2 %vm846_vm1, %v577_v28  ;;  %3730 = vmatpush.msk.msra.mxu0 %vm846_vm1, %v575_v37  ;;  %v618_v28 = vld [vmem:[%s3943_s13 + $0x118] sm:$0xff] }
 0x48a   : > { %v2596_v38 = vmul.f32 %v3842_v48, %v2595_v52  ;;  %3733 = vmatpush.msk.msra.mxu1 %vm846_vm1, %v576_v50  ;;  %3739 = vmatpush.msk.msra.mxu3 %vm846_vm1, %v578_v51  ;;  %v634_v37 = vld [vmem:[%s3943_s13 + $0x198] sm:$0xff]  ;;  %v585_v50 = vld [vmem:[%s3943_s13 + $0x10] sm:$0xff] }
 0x48b   : > { %v601_v51 = vld [vmem:[%s3943_s13 + $0x90] sm:$0xff] }
 0x48c   : > { %v2600_v5 = vsel %vm2599_vm10, %v3842_v48, %v2596_v38  ;;  %v587_v48 = vld [vmem:[%s3943_s13 + $0x20] sm:$0xff]  ;;  %v617_v52 = vld [vmem:[%s3943_s13 + $0x110] sm:$0xff] }
 0x48d   : > { %v4509_v30 = vmul.f32 %v2600_v5, %v2568_v21  ;;  %v625_v21 = vld [vmem:[%s3943_s13 + $0x150] sm:$0xff]  ;;  %v584_v5 = vld [vmem:[%s3943_s13 + $0x8] sm:$0xff] }
 0x48e   : > { %v633_v38 = vld [vmem:[%s3943_s13 + $0x190] sm:$0xff] }
 0x48f   : > { %3708 = vmatmul.msk.f32.gmra.mxu0 %vm839_vm2, %v4509_v30  ;;  %3711 = vmatmul.msk.f32.gmra.mxu1 %vm839_vm2, %v4509_v30 }
 0x490   : > { %3714 = vmatmul.msk.f32.gmra.mxu2 %vm839_vm2, %v4509_v30  ;;  %3717 = vmatmul.msk.f32.gmra.mxu3 %vm839_vm2, %v4509_v30 }
 0x497   : > { %3719 = vmatmul.msk.f32.vlgmr.msrb.gmra.mxu0 %vm839_vm2, %v4491_v34  ;;  %3722 = vmatmul.msk.f32.vlgmr.msrb.gmra.mxu1 %vm839_vm2, %v4491_v34 }
 0x498   : > { %3725 = vmatmul.msk.f32.vlgmr.msrb.gmra.mxu2 %vm839_vm2, %v4491_v34  ;;  %3728 = vmatmul.msk.f32.vlgmr.msrb.gmra.mxu3 %vm839_vm2, %v4491_v34 }
 0x499   : > { %3748 = vmatpush.msk.msrb.mxu2 %vm846_vm1, %v581_v41  ;;  %3742 = vmatpush.msk.msrb.mxu0 %vm846_vm1, %v579_v43  ;;  %v600_v41 = vld [vmem:[%s3943_s13 + $0x88] sm:$0xff] }
 0x49a   : > { %3745 = vmatpush.msk.msrb.mxu1 %vm846_vm1, %v580_v53  ;;  %3751 = vmatpush.msk.msrb.mxu3 %vm846_vm1, %v582_v59  ;;  %v616_v43 = vld [vmem:[%s3943_s13 + $0x108] sm:$0xff]  ;;  %v583_v59 = vld [vmem:[%s3943_s13] sm:$0xff] }
 0x49b   : > { %v632_v53 = vld [vmem:[%s3943_s13 + $0x188] sm:$0xff] }
 0x49f   : > { %3720 = vmatmul.msk.f32.gmra.mxu0 %vm839_vm2, %v4509_v30  ;;  %3723 = vmatmul.msk.f32.gmra.mxu1 %vm839_vm2, %v4509_v30 }
 0x4a0   : > { %3726 = vmatmul.msk.f32.gmra.mxu2 %vm839_vm2, %v4509_v30  ;;  %3729 = vmatmul.msk.f32.gmra.mxu3 %vm839_vm2, %v4509_v30 }
 0x4a7   : > { %3731 = vmatmul.msk.f32.vlgmr.msra.gmra.mxu0 %vm839_vm2, %v4491_v34  ;;  %3734 = vmatmul.msk.f32.vlgmr.msra.gmra.mxu1 %vm839_vm2, %v4491_v34 }
 0x4a8   : > { %3737 = vmatmul.msk.f32.vlgmr.msra.gmra.mxu2 %vm839_vm2, %v4491_v34  ;;  %3740 = vmatmul.msk.f32.vlgmr.msra.gmra.mxu3 %vm839_vm2, %v4491_v34 }
 0x4a9   : > { %3057 = vmatpush.msra.mxu0 %v598_v17  ;;  %3080 = vmatpush.msra.mxu1 %v614_v14  ;;  %v599_v17 = vld [vmem:[%s3943_s13 + $0x80] sm:$0xff]  ;;  %v662_v14 = vld [vmem:[%s3943_s13 + $0x278] sm:$0xff] }
 0x4aa   : > { %3103 = vmatpush.msra.mxu2 %v630_v63  ;;  %3126 = vmatpush.msra.mxu3 %v646_v58  ;;  %v678_v63 = vld [vmem:[%s3943_s13 + $0x2f8] sm:$0xff]  ;;  %v615_v58 = vld [vmem:[%s3943_s13 + $0x100] sm:$0xff] }
 0x4ab   : > { %3058 = vmatpush.msra.mxu0 %v597_v57  ;;  %3081 = vmatpush.msra.mxu1 %v613_v60  ;;  %v631_v57 = vld [vmem:[%s3943_s13 + $0x180] sm:$0xff]  ;;  %v661_v60 = vld [vmem:[%s3943_s13 + $0x270] sm:$0xff] }
 0x4ac   : > { %3104 = vmatpush.msra.mxu2 %v629_v61  ;;  %3127 = vmatpush.msra.mxu3 %v645_v0  ;;  %v677_v61 = vld [vmem:[%s3943_s13 + $0x2f0] sm:$0xff]  ;;  %v694_v0 = vld [vmem:[%s3943_s13 + $0x378] sm:$0xff] }
 0x4ad   : > { %3059 = vmatpush.msra.mxu0 %v596_v2  ;;  %3082 = vmatpush.msra.mxu1 %v612_v45  ;;  %v710_v2 = vld [vmem:[%s3943_s13 + $0x3f8] sm:$0xff]  ;;  %v660_v45 = vld [vmem:[%s3943_s13 + $0x268] sm:$0xff] }
 0x4ae   : > { %3105 = vmatpush.msra.mxu2 %v628_v44  ;;  %3128 = vmatpush.msra.mxu3 %v644_v8  ;;  %v676_v44 = vld [vmem:[%s3943_s13 + $0x2e8] sm:$0xff]  ;;  %v693_v8 = vld [vmem:[%s3943_s13 + $0x370] sm:$0xff] }
 0x4af   : > { %3732 = vmatmul.msk.f32.gmra.mxu0 %vm839_vm2, %v4509_v30  ;;  %3735 = vmatmul.msk.f32.gmra.mxu1 %vm839_vm2, %v4509_v30 }
 0x4b0   : > { %3738 = vmatmul.msk.f32.gmra.mxu2 %vm839_vm2, %v4509_v30  ;;  %3741 = vmatmul.msk.f32.gmra.mxu3 %vm839_vm2, %v4509_v30 }
 0x4b1   : > { %3060 = vmatpush.msra.mxu0 %v595_v9  ;;  %3083 = vmatpush.msra.mxu1 %v611_v3  ;;  %v709_v9 = vld [vmem:[%s3943_s13 + $0x3f0] sm:$0xff]  ;;  %v659_v3 = vld [vmem:[%s3943_s13 + $0x260] sm:$0xff] }
 0x4b2   : > { %3106 = vmatpush.msra.mxu2 %v627_v6  ;;  %3129 = vmatpush.msra.mxu3 %v643_v10  ;;  %v675_v6 = vld [vmem:[%s3943_s13 + $0x2e0] sm:$0xff]  ;;  %v692_v10 = vld [vmem:[%s3943_s13 + $0x368] sm:$0xff] }
 0x4b3   : > { %3061 = vmatpush.msra.mxu0 %v594_v47  ;;  %3084 = vmatpush.msra.mxu1 %v610_v11  ;;  %v708_v47 = vld [vmem:[%s3943_s13 + $0x3e8] sm:$0xff]  ;;  %v658_v11 = vld [vmem:[%s3943_s13 + $0x258] sm:$0xff] }
 0x4b4   : > { %3107 = vmatpush.msra.mxu2 %v626_v15  ;;  %3130 = vmatpush.msra.mxu3 %v642_v13  ;;  %v674_v15 = vld [vmem:[%s3943_s13 + $0x2d8] sm:$0xff]  ;;  %v691_v13 = vld [vmem:[%s3943_s13 + $0x360] sm:$0xff] }
 0x4b5   : > { %3062 = vmatpush.msra.mxu0 %v593_v18  ;;  %3085 = vmatpush.msra.mxu1 %v609_v20  ;;  %v707_v18 = vld [vmem:[%s3943_s13 + $0x3e0] sm:$0xff]  ;;  %v657_v20 = vld [vmem:[%s3943_s13 + $0x250] sm:$0xff] }
 0x4b6   : > { %3108 = vmatpush.msra.mxu2 %v625_v21  ;;  %3131 = vmatpush.msra.mxu3 %v641_v23  ;;  %v673_v21 = vld [vmem:[%s3943_s13 + $0x2d0] sm:$0xff]  ;;  %v690_v23 = vld [vmem:[%s3943_s13 + $0x358] sm:$0xff] }
 0x4b7   : > { %3743 = vmatmul.msk.f32.vlgmr.msrb.gmra.mxu0 %vm839_vm2, %v4491_v34  ;;  %3746 = vmatmul.msk.f32.vlgmr.msrb.gmra.mxu1 %vm839_vm2, %v4491_v34 }
 0x4b8   : > { %3749 = vmatmul.msk.f32.vlgmr.msrb.gmra.mxu2 %vm839_vm2, %v4491_v34  ;;  %3752 = vmatmul.msk.f32.vlgmr.msrb.gmra.mxu3 %vm839_vm2, %v4491_v34 }
 0x4b9   : > { %3063 = vmatpush.msra.mxu0 %v592_v19  ;;  %3086 = vmatpush.msra.mxu1 %v608_v55  ;;  %v706_v19 = vld [vmem:[%s3943_s13 + $0x3d8] sm:$0xff]  ;;  %v656_v55 = vld [vmem:[%s3943_s13 + $0x248] sm:$0xff] }
 0x4ba   : > { %3109 = vmatpush.msra.mxu2 %v624_v54  ;;  %3132 = vmatpush.msra.mxu3 %v640_v24  ;;  %v672_v54 = vld [vmem:[%s3943_s13 + $0x2c8] sm:$0xff]  ;;  %v689_v24 = vld [vmem:[%s3943_s13 + $0x350] sm:$0xff] }
 0x4bb   : > { %3064 = vmatpush.msra.mxu0 %v591_v27  ;;  %3087 = vmatpush.msra.mxu1 %v607_v31  ;;  %v705_v27 = vld [vmem:[%s3943_s13 + $0x3d0] sm:$0xff]  ;;  %v655_v31 = vld [vmem:[%s3943_s13 + $0x240] sm:$0xff] }
 0x4bc   : > { %3110 = vmatpush.msra.mxu2 %v623_v12  ;;  %3133 = vmatpush.msra.mxu3 %v639_v33  ;;  %v671_v12 = vld [vmem:[%s3943_s13 + $0x2c0] sm:$0xff]  ;;  %v688_v33 = vld [vmem:[%s3943_s13 + $0x348] sm:$0xff] }
 0x4bd   : > { %3065 = vmatpush.msra.mxu0 %v590_v35  ;;  %3088 = vmatpush.msra.mxu1 %v606_v36  ;;  %v704_v35 = vld [vmem:[%s3943_s13 + $0x3c8] sm:$0xff]  ;;  %v654_v36 = vld [vmem:[%s3943_s13 + $0x238] sm:$0xff] }
 0x4be   : > { %3111 = vmatpush.msra.mxu2 %v622_v29  ;;  %3134 = vmatpush.msra.mxu3 %v638_v26  ;;  %v670_v29 = vld [vmem:[%s3943_s13 + $0x2b8] sm:$0xff]  ;;  %v687_v26 = vld [vmem:[%s3943_s13 + $0x340] sm:$0xff] }
 0x4bf   : > { %3744 = vmatmul.msk.f32.gmra.mxu0 %vm839_vm2, %v4509_v30  ;;  %3747 = vmatmul.msk.f32.gmra.mxu1 %vm839_vm2, %v4509_v30 }
 0x4c0   : > { %3750 = vmatmul.msk.f32.gmra.mxu2 %vm839_vm2, %v4509_v30  ;;  %3753 = vmatmul.msk.f32.gmra.mxu3 %vm839_vm2, %v4509_v30 }
 0x4c1   : > { %3066 = vmatpush.msra.mxu0 %v589_v22  ;;  %3089 = vmatpush.msra.mxu1 %v605_v56  ;;  %v703_v22 = vld [vmem:[%s3943_s13 + $0x3c0] sm:$0xff]  ;;  %v653_v56 = vld [vmem:[%s3943_s13 + $0x230] sm:$0xff] }
 0x4c2   : > { %3112 = vmatpush.msra.mxu2 %v621_v39  ;;  %3135 = vmatpush.msra.mxu3 %v637_v40  ;;  %v669_v39 = vld [vmem:[%s3943_s13 + $0x2b0] sm:$0xff]  ;;  %v686_v40 = vld [vmem:[%s3943_s13 + $0x338] sm:$0xff] }
 0x4c3   : > { %3067 = vmatpush.msra.mxu0 %v588_v42  ;;  %3090 = vmatpush.msra.mxu1 %v604_v25  ;;  %v702_v42 = vld [vmem:[%s3943_s13 + $0x3b8] sm:$0xff]  ;;  %v652_v25 = vld [vmem:[%s3943_s13 + $0x228] sm:$0xff] }
 0x4c4   : > { %3113 = vmatpush.msra.mxu2 %v620_v1  ;;  %3136 = vmatpush.msra.mxu3 %v636_v46  ;;  %v668_v1 = vld [vmem:[%s3943_s13 + $0x2a8] sm:$0xff]  ;;  %v685_v46 = vld [vmem:[%s3943_s13 + $0x330] sm:$0xff] }
 0x4c5   : > { %3068 = vmatpush.msra.mxu0 %v587_v48  ;;  %3091 = vmatpush.msra.mxu1 %v603_v32  ;;  %v701_v48 = vld [vmem:[%s3943_s13 + $0x3b0] sm:$0xff]  ;;  %v651_v32 = vld [vmem:[%s3943_s13 + $0x220] sm:$0xff] }
 0x4c6   : > { %3114 = vmatpush.msra.mxu2 %v619_v49  ;;  %3137 = vmatpush.msra.mxu3 %v635_v62  ;;  %v667_v49 = vld [vmem:[%s3943_s13 + $0x2a0] sm:$0xff]  ;;  %v684_v62 = vld [vmem:[%s3943_s13 + $0x328] sm:$0xff] }
 0x4c7   : > { %3069 = vmatpush.msra.mxu0 %v586_v16  ;;  %3092 = vmatpush.msra.mxu1 %v602_v4  ;;  %v700_v16 = vld [vmem:[%s3943_s13 + $0x3a8] sm:$0xff]  ;;  %v650_v4 = vld [vmem:[%s3943_s13 + $0x218] sm:$0xff] }
 0x4c8   : > { %3115 = vmatpush.msra.mxu2 %v618_v28  ;;  %3138 = vmatpush.msra.mxu3 %v634_v37  ;;  %v666_v28 = vld [vmem:[%s3943_s13 + $0x298] sm:$0xff]  ;;  %v649_v37 = vld [vmem:[%s3943_s13 + $0x210] sm:$0xff] }
 0x4c9   : > { %3070 = vmatpush.msra.mxu0 %v585_v50  ;;  %3093 = vmatpush.msra.mxu1 %v601_v51  ;;  %v665_v50 = vld [vmem:[%s3943_s13 + $0x290] sm:$0xff]  ;;  %v683_v51 = vld [vmem:[%s3943_s13 + $0x320] sm:$0xff] }
 0x4ca   : > { %3116 = vmatpush.msra.mxu2 %v617_v52  ;;  %3139 = vmatpush.msra.mxu3 %v633_v38  ;;  %v648_v52 = vld [vmem:[%s3943_s13 + $0x208] sm:$0xff]  ;;  %v699_v38 = vld [vmem:[%s3943_s13 + $0x3a0] sm:$0xff] }
 0x4cb   : > { %3071 = vmatpush.msra.mxu0 %v584_v5  ;;  %3094 = vmatpush.msra.mxu1 %v600_v41  ;;  %v664_v5 = vld [vmem:[%s3943_s13 + $0x288] sm:$0xff]  ;;  %v682_v41 = vld [vmem:[%s3943_s13 + $0x318] sm:$0xff] }
 0x4cc   : > { %3117 = vmatpush.msra.mxu2 %v616_v43  ;;  %3140 = vmatpush.msra.mxu3 %v632_v53  ;;  %v698_v43 = vld [vmem:[%s3943_s13 + $0x398] sm:$0xff]  ;;  %v681_v53 = vld [vmem:[%s3943_s13 + $0x310] sm:$0xff] }
 0x4cd   : > { %3072 = vmatpush.msra.mxu0 %v583_v59  ;;  %3095 = vmatpush.msra.mxu1 %v599_v17  ;;  %v697_v59 = vld [vmem:[%s3943_s13 + $0x390] sm:$0xff]  ;;  %v647_v17 = vld [vmem:[%s3943_s13 + $0x200] sm:$0xff] }
 0x4ce   : > { %3118 = vmatpush.msra.mxu2 %v615_v58  ;;  %3141 = vmatpush.msra.mxu3 %v631_v57  ;;  %v696_v58 = vld [vmem:[%s3943_s13 + $0x388] sm:$0xff]  ;;  %v679_v57 = vld [vmem:[%s3943_s13 + $0x300] sm:$0xff] }
 0x4cf   : > { %3149 = vmatpush.msrb.mxu0 %v662_v14  ;;  %3172 = vmatpush.msrb.mxu1 %v678_v63  ;;  %v663_v14 = vld [vmem:[%s3943_s13 + $0x280] sm:$0xff]  ;;  %v680_v63 = vld [vmem:[%s3943_s13 + $0x308] sm:$0xff] }
 0x4d0   : > { %3195 = vmatpush.msrb.mxu2 %v694_v0  ;;  %3218 = vmatpush.msrb.mxu3 %v710_v2 }
 0x4d1   : > { %3150 = vmatpush.msrb.mxu0 %v661_v60  ;;  %3173 = vmatpush.msrb.mxu1 %v677_v61  ;;  %v695_v60 = vld [vmem:[%s3943_s13 + $0x380] sm:$0xff] }
 0x4d2   : > { %3196 = vmatpush.msrb.mxu2 %v693_v8  ;;  %3219 = vmatpush.msrb.mxu3 %v709_v9  ;;  %v742_v8 = vld [vmem:[%s3943_s13 + $0x4f8] sm:$0xff]  ;;  %v725_v9 = vld [vmem:[%s3943_s13 + $0x470] sm:$0xff] }
 0x4d3   : > { %3151 = vmatpush.msrb.mxu0 %v660_v45  ;;  %3174 = vmatpush.msrb.mxu1 %v676_v44  ;;  %v726_v44 = vld [vmem:[%s3943_s13 + $0x478] sm:$0xff] }
 0x4d4   : > { %3197 = vmatpush.msrb.mxu2 %v692_v10  ;;  %3220 = vmatpush.msrb.mxu3 %v708_v47  ;;  %v740_v10 = vld [vmem:[%s3943_s13 + $0x4e8] sm:$0xff] }
 0x4d5   : > { %3152 = vmatpush.msrb.mxu0 %v659_v3  ;;  %3175 = vmatpush.msrb.mxu1 %v675_v6  ;;  %v741_v3 = vld [vmem:[%s3943_s13 + $0x4f0] sm:$0xff]  ;;  %v724_v6 = vld [vmem:[%s3943_s13 + $0x468] sm:$0xff] }
 0x4d6   : > { %3198 = vmatpush.msrb.mxu2 %v691_v13  ;;  %3221 = vmatpush.msrb.mxu3 %v707_v18 }
 0x4d7   : > { %3153 = vmatpush.msrb.mxu0 %v658_v11  ;;  %3176 = vmatpush.msrb.mxu1 %v674_v15 }
 0x4d8   : > { %3199 = vmatpush.msrb.mxu2 %v690_v23  ;;  %3222 = vmatpush.msrb.mxu3 %v706_v19  ;;  %v739_v23 = vld [vmem:[%s3943_s13 + $0x4e0] sm:$0xff] }
 0x4d9   : > { %3154 = vmatpush.msrb.mxu0 %v657_v20  ;;  %3177 = vmatpush.msrb.mxu1 %v673_v21  ;;  %v723_v21 = vld [vmem:[%s3943_s13 + $0x460] sm:$0xff] }
 0x4da   : > { %3200 = vmatpush.msrb.mxu2 %v689_v24  ;;  %3223 = vmatpush.msrb.mxu3 %v705_v27  ;;  %v774_v24 = vld [vmem:[%s3943_s13 + $0x5f8] sm:$0xff] }
 0x4db   : > { %3155 = vmatpush.msrb.mxu0 %v656_v55  ;;  %3178 = vmatpush.msrb.mxu1 %v672_v54  ;;  %v758_v54 = vld [vmem:[%s3943_s13 + $0x578] sm:$0xff] }
 0x4dc   : > { %3201 = vmatpush.msrb.mxu2 %v688_v33  ;;  %3224 = vmatpush.msrb.mxu3 %v704_v35  ;;  %v722_v27 = vld [vmem:[%s3943_s13 + $0x458] sm:$0xff]  ;;  %v773_v33 = vld [vmem:[%s3943_s13 + $0x5f0] sm:$0xff] }
 0x4dd   : > { %3156 = vmatpush.msrb.mxu0 %v655_v31  ;;  %3179 = vmatpush.msrb.mxu1 %v671_v12  ;;  %v738_v31 = vld [vmem:[%s3943_s13 + $0x4d8] sm:$0xff]  ;;  %v757_v12 = vld [vmem:[%s3943_s13 + $0x570] sm:$0xff] }
 0x4de   : > { %3202 = vmatpush.msrb.mxu2 %v687_v26  ;;  %3225 = vmatpush.msrb.mxu3 %v703_v22  ;;  %v721_v35 = vld [vmem:[%s3943_s13 + $0x450] sm:$0xff]  ;;  %v772_v26 = vld [vmem:[%s3943_s13 + $0x5e8] sm:$0xff] }
 0x4df   : > { %3157 = vmatpush.msrb.mxu0 %v654_v36  ;;  %3180 = vmatpush.msrb.mxu1 %v670_v29  ;;  %v737_v36 = vld [vmem:[%s3943_s13 + $0x4d0] sm:$0xff]  ;;  %v756_v29 = vld [vmem:[%s3943_s13 + $0x568] sm:$0xff] }
 0x4e0   : > { %3203 = vmatpush.msrb.mxu2 %v686_v40  ;;  %3226 = vmatpush.msrb.mxu3 %v702_v42  ;;  %v736_v40 = vld [vmem:[%s3943_s13 + $0x4c8] sm:$0xff] }
 0x4e1   : > { %3158 = vmatpush.msrb.mxu0 %v653_v56  ;;  %3181 = vmatpush.msrb.mxu1 %v669_v39  ;;  %v720_v39 = vld [vmem:[%s3943_s13 + $0x448] sm:$0xff] }
 0x4e2   : > { %3204 = vmatpush.msrb.mxu2 %v685_v46  ;;  %3227 = vmatpush.msrb.mxu3 %v701_v48  ;;  %v771_v46 = vld [vmem:[%s3943_s13 + $0x5e0] sm:$0xff] }
 0x4e3   : > { %3159 = vmatpush.msrb.mxu0 %v652_v25  ;;  %3182 = vmatpush.msrb.mxu1 %v668_v1  ;;  %v755_v1 = vld [vmem:[%s3943_s13 + $0x560] sm:$0xff] }
 0x4e4   : > { %3205 = vmatpush.msrb.mxu2 %v684_v62  ;;  %3228 = vmatpush.msrb.mxu3 %v700_v16  ;;  %v735_v62 = vld [vmem:[%s3943_s13 + $0x4c0] sm:$0xff] }
 0x4e5   : > { %3160 = vmatpush.msrb.mxu0 %v651_v32  ;;  %3183 = vmatpush.msrb.mxu1 %v667_v49  ;;  %v719_v49 = vld [vmem:[%s3943_s13 + $0x440] sm:$0xff] }
 0x4e6   : > { %3206 = vmatpush.msrb.mxu2 %v683_v51  ;;  %3229 = vmatpush.msrb.mxu3 %v699_v38  ;;  %v734_v51 = vld [vmem:[%s3943_s13 + $0x4b8] sm:$0xff]  ;;  %v769_v38 = vld [vmem:[%s3943_s13 + $0x5d0] sm:$0xff] }
 0x4e7   : > { %3161 = vmatpush.msrb.mxu0 %v650_v4  ;;  %3184 = vmatpush.msrb.mxu1 %v666_v28  ;;  %v754_v28 = vld [vmem:[%s3943_s13 + $0x558] sm:$0xff] }
 0x4e8   : > { %3207 = vmatpush.msrb.mxu2 %v682_v41  ;;  %3230 = vmatpush.msrb.mxu3 %v698_v43  ;;  %v733_v41 = vld [vmem:[%s3943_s13 + $0x4b0] sm:$0xff] }
 0x4e9   : > { %3162 = vmatpush.msrb.mxu0 %v649_v37  ;;  %3185 = vmatpush.msrb.mxu1 %v665_v50  ;;  %v770_v37 = vld [vmem:[%s3943_s13 + $0x5d8] sm:$0xff] }
 0x4ea   : > { %3208 = vmatpush.msrb.mxu2 %v681_v53  ;;  %3231 = vmatpush.msrb.mxu3 %v697_v59  ;;  %v718_v50 = vld [vmem:[%s3943_s13 + $0x438] sm:$0xff]  ;;  %v752_v59 = vld [vmem:[%s3943_s13 + $0x548] sm:$0xff] }
 0x4eb   : > { %3163 = vmatpush.msrb.mxu0 %v648_v52  ;;  %3186 = vmatpush.msrb.mxu1 %v664_v5  ;;  %v753_v52 = vld [vmem:[%s3943_s13 + $0x550] sm:$0xff] }
 0x4ec   : > { %3209 = vmatpush.msrb.mxu2 %v680_v63  ;;  %3232 = vmatpush.msrb.mxu3 %v696_v58  ;;  %v717_v5 = vld [vmem:[%s3943_s13 + $0x430] sm:$0xff]  ;;  %v732_v63 = vld [vmem:[%s3943_s13 + $0x4a8] sm:$0xff] }
 0x4ed   : > { %3164 = vmatpush.msrb.mxu0 %v647_v17  ;;  %3187 = vmatpush.msrb.mxu1 %v663_v14  ;;  %v768_v17 = vld [vmem:[%s3943_s13 + $0x5c8] sm:$0xff] }
 0x4ee   : > { %3210 = vmatpush.msrb.mxu2 %v679_v57  ;;  %3233 = vmatpush.msrb.mxu3 %v695_v60  ;;  %v716_v14 = vld [vmem:[%s3943_s13 + $0x428] sm:$0xff]  ;;  %v751_v60 = vld [vmem:[%s3943_s13 + $0x540] sm:$0xff] }
 0x504   : > { %v2674_v61 = vpop.f32.mrf.mxu0  ;;  %v2697_v0 = vpop.f32.mrf.mxu1 }
 0x505   : > { %v3025_v2 = vmax.f32 %v2674_v61, 0.0  ;;  %v3026_v45 = vmax.f32 %v2697_v0, 0.0  ;;  %v767_v61 = vld [vmem:[%s3943_s13 + $0x5c0] sm:$0xff] }
 0x507   : > { %3073 = vmatmul.f32.vlgmr.msra.gmra.mxu0 %v3025_v2  ;;  %3096 = vmatmul.f32.vlgmr.msra.gmra.mxu1 %v3026_v45  ;;  %v715_v45 = vld [vmem:[%s3943_s13 + $0x420] sm:$0xff] }
 0x508   : > { %3241 = vmatpush.msra.mxu0 %v726_v44  ;;  %3264 = vmatpush.msra.mxu1 %v742_v8  ;;  %v731_v44 = vld [vmem:[%s3943_s13 + $0x4a0] sm:$0xff] }
 0x50a   : > { %3242 = vmatpush.msra.mxu0 %v725_v9  ;;  %3265 = vmatpush.msra.mxu1 %v741_v3  ;;  %v750_v3 = vld [vmem:[%s3943_s13 + $0x538] sm:$0xff] }
 0x50b   : > { %v2720_v47 = vpop.f32.mrf.mxu2  ;;  %v2743_v11 = vpop.f32.mrf.mxu3 }
 0x50c   : > { %v3027_v15 = vmax.f32 %v2720_v47, 0.0  ;;  %v3028_v13 = vmax.f32 %v2743_v11, 0.0  ;;  %3243 = vmatpush.msra.mxu0 %v724_v6  ;;  %3266 = vmatpush.msra.mxu1 %v740_v10  ;;  %v2677_v18 = vpop.f32.mrf.mxu0  ;;  %v2700_v20 = vpop.f32.mrf.mxu1  ;;  %v766_v6 = vld [vmem:[%s3943_s13 + $0x5b8] sm:$0xff]  ;;  %v749_v11 = vld [vmem:[%s3943_s13 + $0x530] sm:$0xff] }
 0x50d   : > { %v3041_v19 = vmax.f32 %v2677_v18, 0.0  ;;  %v3042_v55 = vmax.f32 %v2700_v20, 0.0  ;;  %v714_v10 = vld [vmem:[%s3943_s13 + $0x418] sm:$0xff]  ;;  %v729_v18 = vld [vmem:[%s3943_s13 + $0x490] sm:$0xff] }
 0x50e   : > { %3119 = vmatmul.f32.vlgmr.msra.gmra.mxu2 %v3027_v15  ;;  %3142 = vmatmul.f32.vlgmr.msra.gmra.mxu3 %v3028_v13  ;;  %v730_v47 = vld [vmem:[%s3943_s13 + $0x498] sm:$0xff]  ;;  %v765_v15 = vld [vmem:[%s3943_s13 + $0x5b0] sm:$0xff] }
 0x50f   : > { %3244 = vmatpush.msra.mxu0 %v723_v21  ;;  %3267 = vmatpush.msra.mxu1 %v739_v23  ;;  %v713_v13 = vld [vmem:[%s3943_s13 + $0x410] sm:$0xff]  ;;  %v748_v23 = vld [vmem:[%s3943_s13 + $0x528] sm:$0xff] }
 0x510   : > { %3287 = vmatpush.msra.mxu2 %v758_v54  ;;  %3310 = vmatpush.msra.mxu3 %v774_v24  ;;  %v728_v54 = vld [vmem:[%s3943_s13 + $0x488] sm:$0xff] }
 0x511   : > { %3076 = vmatmul.f32.gmra.mxu0 %v3041_v19  ;;  %3099 = vmatmul.f32.gmra.mxu1 %v3042_v55  ;;  %v764_v19 = vld [vmem:[%s3943_s13 + $0x5a8] sm:$0xff] }
 0x512   : > { %3245 = vmatpush.msra.mxu0 %v722_v27  ;;  %3268 = vmatpush.msra.mxu1 %v738_v31  ;;  %v712_v55 = vld [vmem:[%s3943_s13 + $0x408] sm:$0xff]  ;;  %v747_v31 = vld [vmem:[%s3943_s13 + $0x520] sm:$0xff] }
 0x513   : > { %3288 = vmatpush.msra.mxu2 %v757_v12  ;;  %3311 = vmatpush.msra.mxu3 %v773_v33  ;;  %v2723_v22 = vpop.f32.mrf.mxu2  ;;  %v2746_v56 = vpop.f32.mrf.mxu3  ;;  %v763_v12 = vld [vmem:[%s3943_s13 + $0x5a0] sm:$0xff] }
 0x514   : > { %3246 = vmatpush.msra.mxu0 %v721_v35  ;;  %3269 = vmatpush.msra.mxu1 %v737_v36  ;;  %v3043_v42 = vmax.f32 %v2723_v22, 0.0  ;;  %v3044_v25 = vmax.f32 %v2746_v56, 0.0  ;;  %v2766_v48 = vpop.f32.mrf.mxu0  ;;  %v2789_v32 = vpop.f32.mrf.mxu1  ;;  %v711_v36 = vld [vmem:[%s3943_s13 + $0x400] sm:$0xff]  ;;  %v762_v22 = vld [vmem:[%s3943_s13 + $0x598] sm:$0xff] }
 0x515   : > { %3289 = vmatpush.msra.mxu2 %v756_v29  ;;  %3312 = vmatpush.msra.mxu3 %v772_v26  ;;  %v3029_v16 = vmax.f32 %v2766_v48, 0.0  ;;  %v3030_v4 = vmax.f32 %v2789_v32, 0.0  ;;  %v727_v29 = vld [vmem:[%s3943_s13 + $0x480] sm:$0xff]  ;;  %v746_v26 = vld [vmem:[%s3943_s13 + $0x518] sm:$0xff]  ;;  %v805_v48 = vld [vmem:[%s3943_s13 + $0x6f0] sm:$0xff] }
 0x516   : > { %3247 = vmatpush.msra.mxu0 %v720_v39  ;;  %3270 = vmatpush.msra.mxu1 %v736_v40  ;;  %v790_v40 = vld [vmem:[%s3943_s13 + $0x678] sm:$0xff]  ;;  %v744_v32 = vld [vmem:[%s3943_s13 + $0x508] sm:$0xff] }
 0x517   : > { %3290 = vmatpush.msra.mxu2 %v755_v1  ;;  %3313 = vmatpush.msra.mxu3 %v771_v46  ;;  %v761_v1 = vld [vmem:[%s3943_s13 + $0x590] sm:$0xff] }
 0x518   : > { %3122 = vmatmul.f32.gmra.mxu2 %v3043_v42  ;;  %3145 = vmatmul.f32.gmra.mxu3 %v3044_v25  ;;  %v806_v42 = vld [vmem:[%s3943_s13 + $0x6f8] sm:$0xff]  ;;  %v745_v25 = vld [vmem:[%s3943_s13 + $0x510] sm:$0xff] }
 0x519   : > { %3248 = vmatpush.msra.mxu0 %v719_v49  ;;  %3271 = vmatpush.msra.mxu1 %v735_v62  ;;  %v789_v46 = vld [vmem:[%s3943_s13 + $0x670] sm:$0xff]  ;;  %v760_v49 = vld [vmem:[%s3943_s13 + $0x588] sm:$0xff] }
 0x51a   : > { %3291 = vmatpush.msra.mxu2 %v754_v28  ;;  %3314 = vmatpush.msra.mxu3 %v770_v37  ;;  %v804_v28 = vld [vmem:[%s3943_s13 + $0x6e8] sm:$0xff]  ;;  %v743_v37 = vld [vmem:[%s3943_s13 + $0x500] sm:$0xff] }
 0x51b   : > { %3165 = vmatmul.f32.vlgmr.msrb.gmra.mxu0 %v3029_v16  ;;  %3188 = vmatmul.f32.vlgmr.msrb.gmra.mxu1 %v3030_v4  ;;  %v2812_v43 = vpop.f32.mrf.mxu2  ;;  %v2835_v53 = vpop.f32.mrf.mxu3  ;;  %v788_v4 = vld [vmem:[%s3943_s13 + $0x668] sm:$0xff] }
 0x51c   : > { %3249 = vmatpush.msra.mxu0 %v718_v50  ;;  %3272 = vmatpush.msra.mxu1 %v734_v51  ;;  %v3031_v58 = vmax.f32 %v2812_v43, 0.0  ;;  %v3032_v57 = vmax.f32 %v2835_v53, 0.0  ;;  %v2769_v0 = vpop.f32.mrf.mxu0  ;;  %v2792_v2 = vpop.f32.mrf.mxu1  ;;  %v759_v50 = vld [vmem:[%s3943_s13 + $0x580] sm:$0xff]  ;;  %v822_v53 = vld [vmem:[%s3943_s13 + $0x778] sm:$0xff] }
 0x51d   : > { %3292 = vmatpush.msra.mxu2 %v753_v52  ;;  %3315 = vmatpush.msra.mxu3 %v769_v38  ;;  %v3045_v8 = vmax.f32 %v2769_v0, 0.0  ;;  %v3046_v9 = vmax.f32 %v2792_v2, 0.0  ;;  %v787_v51 = vld [vmem:[%s3943_s13 + $0x660] sm:$0xff]  ;;  %v801_v0 = vld [vmem:[%s3943_s13 + $0x6d0] sm:$0xff]  ;;  %v820_v2 = vld [vmem:[%s3943_s13 + $0x768] sm:$0xff] }
 0x51e   : > { %3250 = vmatpush.msra.mxu0 %v717_v5  ;;  %3273 = vmatpush.msra.mxu1 %v733_v41  ;;  %v803_v52 = vld [vmem:[%s3943_s13 + $0x6e0] sm:$0xff] }
 0x51f   : > { %3293 = vmatpush.msra.mxu2 %v752_v59  ;;  %3316 = vmatpush.msra.mxu3 %v768_v17  ;;  %v838_v59 = vld [vmem:[%s3943_s13 + $0x7f8] sm:$0xff] }
 0x520   : > { %3251 = vmatpush.msra.mxu0 %v716_v14  ;;  %3274 = vmatpush.msra.mxu1 %v732_v63  ;;  %v786_v17 = vld [vmem:[%s3943_s13 + $0x658] sm:$0xff] }
 0x521   : > { %3294 = vmatpush.msra.mxu2 %v751_v60  ;;  %3317 = vmatpush.msra.mxu3 %v767_v61  ;;  %v802_v14 = vld [vmem:[%s3943_s13 + $0x6d8] sm:$0xff]  ;;  %v837_v60 = vld [vmem:[%s3943_s13 + $0x7f0] sm:$0xff] }
 0x522   : > { %3211 = vmatmul.f32.vlgmr.msrb.gmra.mxu2 %v3031_v58  ;;  %3234 = vmatmul.f32.vlgmr.msrb.gmra.mxu3 %v3032_v57  ;;  %v821_v57 = vld [vmem:[%s3943_s13 + $0x770] sm:$0xff] }
 0x523   : > { %3252 = vmatpush.msra.mxu0 %v715_v45  ;;  %3275 = vmatpush.msra.mxu1 %v731_v44  ;;  %v2815_v20 = vpop.f32.mrf.mxu2  ;;  %v2838_v21 = vpop.f32.mrf.mxu3  ;;  %v785_v61 = vld [vmem:[%s3943_s13 + $0x650] sm:$0xff]  ;;  %v836_v45 = vld [vmem:[%s3943_s13 + $0x7e8] sm:$0xff] }
 0x524   : > { %3295 = vmatpush.msra.mxu2 %v750_v3  ;;  %3318 = vmatpush.msra.mxu3 %v766_v6  ;;  %v3047_v24 = vmax.f32 %v2815_v20, 0.0  ;;  %v3048_v27 = vmax.f32 %v2838_v21, 0.0  ;;  %v2858_v33 = vpop.f32.mrf.mxu0  ;;  %v2881_v35 = vpop.f32.mrf.mxu1  ;;  %v800_v3 = vld [vmem:[%s3943_s13 + $0x6c8] sm:$0xff]  ;;  %v819_v6 = vld [vmem:[%s3943_s13 + $0x760] sm:$0xff]  ;;  %v834_v20 = vld [vmem:[%s3943_s13 + $0x7d8] sm:$0xff] }
 0x525   : > { %3168 = vmatmul.f32.gmra.mxu0 %v3045_v8  ;;  %3191 = vmatmul.f32.gmra.mxu1 %v3046_v9  ;;  %v3033_v56 = vmax.f32 %v2858_v33, 0.0  ;;  %v3034_v39 = vmax.f32 %v2881_v35, 0.0  ;;  %v784_v9 = vld [vmem:[%s3943_s13 + $0x648] sm:$0xff]  ;;  %v782_v21 = vld [vmem:[%s3943_s13 + $0x638] sm:$0xff]  ;;  %v815_v35 = vld [vmem:[%s3943_s13 + $0x740] sm:$0xff] }
 0x526   : > { %3253 = vmatpush.msra.mxu0 %v714_v10  ;;  %3276 = vmatpush.msra.mxu1 %v730_v47  ;;  %v835_v10 = vld [vmem:[%s3943_s13 + $0x7e0] sm:$0xff]  ;;  %v796_v33 = vld [vmem:[%s3943_s13 + $0x6a8] sm:$0xff] }
 0x527   : > { %3296 = vmatpush.msra.mxu2 %v749_v11  ;;  %3319 = vmatpush.msra.mxu3 %v765_v15  ;;  %v783_v47 = vld [vmem:[%s3943_s13 + $0x640] sm:$0xff] }
 0x528   : > { %3254 = vmatpush.msra.mxu0 %v713_v13  ;;  %3277 = vmatpush.msra.mxu1 %v729_v18  ;;  %v799_v11 = vld [vmem:[%s3943_s13 + $0x6c0] sm:$0xff]  ;;  %v818_v18 = vld [vmem:[%s3943_s13 + $0x758] sm:$0xff] }
 0x529   : > { %3297 = vmatpush.msra.mxu2 %v748_v23  ;;  %3320 = vmatpush.msra.mxu3 %v764_v19  ;;  %v798_v23 = vld [vmem:[%s3943_s13 + $0x6b8] sm:$0xff]  ;;  %v817_v19 = vld [vmem:[%s3943_s13 + $0x750] sm:$0xff] }
 0x52a   : > { %3255 = vmatpush.msra.mxu0 %v712_v55  ;;  %3278 = vmatpush.msra.mxu1 %v728_v54  ;;  %v833_v55 = vld [vmem:[%s3943_s13 + $0x7d0] sm:$0xff] }
 0x52b   : > { %3298 = vmatpush.msra.mxu2 %v747_v31  ;;  %3321 = vmatpush.msra.mxu3 %v763_v12  ;;  %v2904_v62 = vpop.f32.mrf.mxu2  ;;  %v2927_v16 = vpop.f32.mrf.mxu3  ;;  %v781_v54 = vld [vmem:[%s3943_s13 + $0x630] sm:$0xff]  ;;  %v832_v31 = vld [vmem:[%s3943_s13 + $0x7c8] sm:$0xff] }
 0x52c   : > { %3214 = vmatmul.f32.gmra.mxu2 %v3047_v24  ;;  %3237 = vmatmul.f32.gmra.mxu3 %v3048_v27  ;;  %v3035_v38 = vmax.f32 %v2904_v62, 0.0  ;;  %v3036_v5 = vmax.f32 %v2927_v16, 0.0  ;;  %v2861_v41 = vpop.f32.mrf.mxu0  ;;  %v2884_v43 = vpop.f32.mrf.mxu1  ;;  %v797_v24 = vld [vmem:[%s3943_s13 + $0x6b0] sm:$0xff]  ;;  %v816_v27 = vld [vmem:[%s3943_s13 + $0x748] sm:$0xff] }
 0x52d   : > { %3256 = vmatpush.msra.mxu0 %v711_v36  ;;  %3279 = vmatpush.msra.mxu1 %v727_v29  ;;  %v3049_v63 = vmax.f32 %v2861_v41, 0.0  ;;  %v3050_v58 = vmax.f32 %v2884_v43, 0.0  ;;  %v780_v12 = vld [vmem:[%s3943_s13 + $0x628] sm:$0xff]  ;;  %v831_v36 = vld [vmem:[%s3943_s13 + $0x7c0] sm:$0xff]  ;;  %v809_v43 = vld [vmem:[%s3943_s13 + $0x710] sm:$0xff] }
 0x52e   : > { %3299 = vmatpush.msra.mxu2 %v746_v26  ;;  %3322 = vmatpush.msra.mxu3 %v762_v22  ;;  %v779_v29 = vld [vmem:[%s3943_s13 + $0x620] sm:$0xff]  ;;  %v814_v22 = vld [vmem:[%s3943_s13 + $0x738] sm:$0xff]  ;;  %v776_v16 = vld [vmem:[%s3943_s13 + $0x608] sm:$0xff] }
 0x52f   : > { %3333 = vmatpush.msrb.mxu0 %v790_v40  ;;  %3356 = vmatpush.msrb.mxu1 %v806_v42  ;;  %v795_v26 = vld [vmem:[%s3943_s13 + $0x6a0] sm:$0xff]  ;;  %v794_v40 = vld [vmem:[%s3943_s13 + $0x698] sm:$0xff]  ;;  %v813_v42 = vld [vmem:[%s3943_s13 + $0x730] sm:$0xff] }
 0x530   : > { %3257 = vmatmul.f32.vlgmr.msra.gmra.mxu0 %v3033_v56  ;;  %3280 = vmatmul.f32.vlgmr.msra.gmra.mxu1 %v3034_v39  ;;  %v830_v56 = vld [vmem:[%s3943_s13 + $0x7b8] sm:$0xff] }
 0x531   : > { %3300 = vmatpush.msra.mxu2 %v745_v25  ;;  %3323 = vmatpush.msra.mxu3 %v761_v1  ;;  %v778_v39 = vld [vmem:[%s3943_s13 + $0x618] sm:$0xff]  ;;  %v829_v25 = vld [vmem:[%s3943_s13 + $0x7b0] sm:$0xff] }
 0x532   : > { %3334 = vmatpush.msrb.mxu0 %v789_v46  ;;  %3357 = vmatpush.msrb.mxu1 %v805_v48  ;;  %v777_v1 = vld [vmem:[%s3943_s13 + $0x610] sm:$0xff]  ;;  %v812_v48 = vld [vmem:[%s3943_s13 + $0x728] sm:$0xff] }
 0x533   : > { %3301 = vmatpush.msra.mxu2 %v744_v32  ;;  %3324 = vmatpush.msra.mxu3 %v760_v49  ;;  %v2907_v44 = vpop.f32.mrf.mxu2  ;;  %v2930_v8 = vpop.f32.mrf.mxu3  ;;  %v793_v46 = vld [vmem:[%s3943_s13 + $0x690] sm:$0xff]  ;;  %v828_v32 = vld [vmem:[%s3943_s13 + $0x7a8] sm:$0xff] }
 0x534   : > { %3335 = vmatpush.msrb.mxu0 %v788_v4  ;;  %3358 = vmatpush.msrb.mxu1 %v804_v28  ;;  %v3051_v15 = vmax.f32 %v2907_v44, 0.0  ;;  %v3052_v13 = vmax.f32 %v2930_v8, 0.0  ;;  %v2950_v49 = vpop.f32.mrf.mxu0  ;;  %v2973_v62 = vpop.f32.mrf.mxu1  ;;  %v792_v4 = vld [vmem:[%s3943_s13 + $0x688] sm:$0xff]  ;;  %v811_v28 = vld [vmem:[%s3943_s13 + $0x720] sm:$0xff] }
 0x535   : > { %3302 = vmatpush.msra.mxu2 %v743_v37  ;;  %3325 = vmatpush.msra.mxu3 %v759_v50  ;;  %v827_v37 = vld [vmem:[%s3943_s13 + $0x7a0] sm:$0xff]  ;;  %v3038_v41 = vmax.f32 %v2973_v62, 0.0 }
 0x536   : > { %3336 = vmatpush.msrb.mxu0 %v787_v51  ;;  %3359 = vmatpush.msrb.mxu1 %v803_v52  ;;  %v775_v50 = vld [vmem:[%s3943_s13 + $0x600] sm:$0xff]  ;;  %v810_v52 = vld [vmem:[%s3943_s13 + $0x718] sm:$0xff] }
 0x537   : > { %3379 = vmatpush.msrb.mxu2 %v822_v53  ;;  %3402 = vmatpush.msrb.mxu3 %v838_v59  ;;  %v791_v51 = vld [vmem:[%s3943_s13 + $0x680] sm:$0xff]  ;;  %v825_v53 = vld [vmem:[%s3943_s13 + $0x790] sm:$0xff] }
 0x538   : > { %3303 = vmatmul.f32.vlgmr.msra.gmra.mxu2 %v3035_v38  ;;  %3326 = vmatmul.f32.vlgmr.msra.gmra.mxu3 %v3036_v5  ;;  %v826_v38 = vld [vmem:[%s3943_s13 + $0x798] sm:$0xff]  ;;  %v3037_v5 = vmax.f32 %v2950_v49, 0.0 }
 0x539   : > { %3337 = vmatpush.msrb.mxu0 %v786_v17  ;;  %3360 = vmatpush.msrb.mxu1 %v802_v14  ;;  %v808_v14 = vld [vmem:[%s3943_s13 + $0x708] sm:$0xff] }
 0x53a   : > { %3380 = vmatpush.msrb.mxu2 %v821_v57  ;;  %3403 = vmatpush.msrb.mxu3 %v837_v60  ;;  %v823_v57 = vld [vmem:[%s3943_s13 + $0x780] sm:$0xff] }
 0x53b   : > { %3260 = vmatmul.f32.gmra.mxu0 %v3049_v63  ;;  %3283 = vmatmul.f32.gmra.mxu1 %v3050_v58  ;;  %v2996_v59 = vpop.f32.mrf.mxu2  ;;  %v3019_v17 = vpop.f32.mrf.mxu3  ;;  %v824_v63 = vld [vmem:[%s3943_s13 + $0x788] sm:$0xff]  ;;  %v807_v58 = vld [vmem:[%s3943_s13 + $0x700] sm:$0xff] }
 0x53c   : > { %3338 = vmatpush.msrb.mxu0 %v785_v61  ;;  %3361 = vmatpush.msrb.mxu1 %v801_v0  ;;  %v2953_v60 = vpop.f32.mrf.mxu0  ;;  %v2976_v61 = vpop.f32.mrf.mxu1  ;;  %v3039_v0 = vmax.f32 %v2996_v59, 0.0 }
 0x53d   : > { %3381 = vmatpush.msrb.mxu2 %v820_v2  ;;  %3404 = vmatpush.msrb.mxu3 %v836_v45  ;;  %v3040_v2 = vmax.f32 %v3019_v17, 0.0  ;;  %v3053_v45 = vmax.f32 %v2953_v60, 0.0  ;;  %v3054_v44 = vmax.f32 %v2976_v61, 0.0 }
 0x53e   : > { %3339 = vmatpush.msrb.mxu0 %v784_v9  ;;  %3362 = vmatpush.msrb.mxu1 %v800_v3 }
 0x53f   : > { %3382 = vmatpush.msrb.mxu2 %v819_v6  ;;  %3405 = vmatpush.msrb.mxu3 %v835_v10 }
 0x540   : > { %3340 = vmatpush.msrb.mxu0 %v783_v47  ;;  %3363 = vmatpush.msrb.mxu1 %v799_v11 }
 0x541   : > { %3383 = vmatpush.msrb.mxu2 %v818_v18  ;;  %3406 = vmatpush.msrb.mxu3 %v834_v20 }
 0x542   : > { %3306 = vmatmul.f32.gmra.mxu2 %v3051_v15  ;;  %3329 = vmatmul.f32.gmra.mxu3 %v3052_v13 }
 0x543   : > { %3341 = vmatpush.msrb.mxu0 %v782_v21  ;;  %3364 = vmatpush.msrb.mxu1 %v798_v23  ;;  %v2999_v8 = vpop.f32.mrf.mxu2  ;;  %v3022_v9 = vpop.f32.mrf.mxu3 }
 0x544   : > { %3384 = vmatpush.msrb.mxu2 %v817_v19  ;;  %3407 = vmatpush.msrb.mxu3 %v833_v55  ;;  %v3055_v3 = vmax.f32 %v2999_v8, 0.0  ;;  %v3056_v6 = vmax.f32 %v3022_v9, 0.0 }
 0x545   : > { %3342 = vmatpush.msrb.mxu0 %v781_v54  ;;  %3365 = vmatpush.msrb.mxu1 %v797_v24 }
 0x546   : > { %3385 = vmatpush.msrb.mxu2 %v816_v27  ;;  %3408 = vmatpush.msrb.mxu3 %v832_v31 }
 0x547   : > { %3343 = vmatpush.msrb.mxu0 %v780_v12  ;;  %3366 = vmatpush.msrb.mxu1 %v796_v33 }
 0x548   : > { %3386 = vmatpush.msrb.mxu2 %v815_v35  ;;  %3409 = vmatpush.msrb.mxu3 %v831_v36 }
 0x549   : > { %3344 = vmatpush.msrb.mxu0 %v779_v29  ;;  %3367 = vmatpush.msrb.mxu1 %v795_v26 }
 0x54a   : > { %3387 = vmatpush.msrb.mxu2 %v814_v22  ;;  %3410 = vmatpush.msrb.mxu3 %v830_v56 }
 0x54b   : > { %3345 = vmatpush.msrb.mxu0 %v778_v39  ;;  %3368 = vmatpush.msrb.mxu1 %v794_v40 }
 0x54c   : > { %3388 = vmatpush.msrb.mxu2 %v813_v42  ;;  %3411 = vmatpush.msrb.mxu3 %v829_v25 }
 0x54d   : > { %3346 = vmatpush.msrb.mxu0 %v777_v1  ;;  %3369 = vmatpush.msrb.mxu1 %v793_v46 }
 0x54e   : > { %3389 = vmatpush.msrb.mxu2 %v812_v48  ;;  %3412 = vmatpush.msrb.mxu3 %v828_v32 }
 0x54f   : > { %3347 = vmatpush.msrb.mxu0 %v776_v16  ;;  %3370 = vmatpush.msrb.mxu1 %v792_v4 }
 0x550   : > { %3390 = vmatpush.msrb.mxu2 %v811_v28  ;;  %3413 = vmatpush.msrb.mxu3 %v827_v37 }
 0x551   : > { %3348 = vmatpush.msrb.mxu0 %v775_v50  ;;  %3371 = vmatpush.msrb.mxu1 %v791_v51 }
 0x552   : > { %3391 = vmatpush.msrb.mxu2 %v810_v52  ;;  %3414 = vmatpush.msrb.mxu3 %v826_v38 }
 0x553   : > { %3349 = vmatmul.f32.vlgmr.msrb.gmra.mxu0 %v3037_v5  ;;  %3372 = vmatmul.f32.vlgmr.msrb.gmra.mxu1 %v3038_v41 }
 0x554   : > { %3392 = vmatpush.msrb.mxu2 %v809_v43  ;;  %3415 = vmatpush.msrb.mxu3 %v825_v53 }
 0x556   : > { %3393 = vmatpush.msrb.mxu2 %v808_v14  ;;  %3416 = vmatpush.msrb.mxu3 %v824_v63 }
 0x558   : > { %3394 = vmatpush.msrb.mxu2 %v807_v58  ;;  %3417 = vmatpush.msrb.mxu3 %v823_v57 }
 0x559   : > { %3395 = vmatmul.f32.vlgmr.msrb.gmra.mxu2 %v3039_v0  ;;  %3418 = vmatmul.f32.vlgmr.msrb.gmra.mxu3 %v3040_v2 }
 0x55b   : > { %3352 = vmatmul.f32.gmra.mxu0 %v3053_v45  ;;  %3375 = vmatmul.f32.gmra.mxu1 %v3054_v44 }
 0x561   : > { %3398 = vmatmul.f32.gmra.mxu2 %v3055_v3  ;;  %3421 = vmatmul.f32.gmra.mxu3 %v3056_v6 }
 0x584   : > { %v3074_v10 = vpop.f32.mrf.mxu0  ;;  %v3097_v47 = vpop.f32.mrf.mxu1 }
 0x585   : > { %v3075_v19 = vadd.f32 %v3074_v10, %v4491_v34 }
 0x587   : > { %v3098_v54 = vadd.f32 %v3097_v47, %v3075_v19 }
 0x58e   : > { %v3077_v11 = vpop.f32.mrf.mxu0  ;;  %v3100_v18 = vpop.f32.mrf.mxu1 }
 0x58f   : > { %v3078_v33 = vadd.f32 %v3077_v11, %v4509_v30 }
 0x591   : > { %v3120_v15 = vpop.f32.mrf.mxu2  ;;  %v3143_v13 = vpop.f32.mrf.mxu3  ;;  %v3101_v36 = vadd.f32 %v3100_v18, %v3078_v33 }
 0x592   : > { %v3121_v24 = vadd.f32 %v3120_v15, %v3098_v54 }
 0x594   : > { %v3144_v35 = vadd.f32 %v3143_v13, %v3121_v24 }
 0x598   : > { %v3166_v20 = vpop.f32.mrf.mxu0  ;;  %v3189_v55 = vpop.f32.mrf.mxu1 }
 0x599   : > { %v3167_v26 = vadd.f32 %v3166_v20, %v3144_v35 }
 0x59b   : > { %v3123_v21 = vpop.f32.mrf.mxu2  ;;  %v3146_v23 = vpop.f32.mrf.mxu3  ;;  %v3190_v42 = vadd.f32 %v3189_v55, %v3167_v26 }
 0x59c   : > { %v3124_v22 = vadd.f32 %v3123_v21, %v3101_v36 }
 0x59e   : > { %v3147_v25 = vadd.f32 %v3146_v23, %v3124_v22 }
 0x5a2   : > { %v3169_v27 = vpop.f32.mrf.mxu0  ;;  %v3192_v29 = vpop.f32.mrf.mxu1 }
 0x5a3   : > { %v3170_v34 = vadd.f32 %v3169_v27, %v3147_v25 }
 0x5a5   : > { %v3212_v31 = vpop.f32.mrf.mxu2  ;;  %v3235_v12 = vpop.f32.mrf.mxu3  ;;  %v3193_v32 = vadd.f32 %v3192_v29, %v3170_v34 }
 0x5a6   : > { %v3213_v1 = vadd.f32 %v3212_v31, %v3190_v42 }
 0x5a8   : > { %v3236_v48 = vadd.f32 %v3235_v12, %v3213_v1 }
 0x5ad   : > { %v3258_v56 = vpop.f32.mrf.mxu0  ;;  %v3281_v46 = vpop.f32.mrf.mxu1 }
 0x5ae   : > { %v3259_v4 = vadd.f32 %v3258_v56, %v3236_v48 }
 0x5af   : > { %v3215_v39 = vpop.f32.mrf.mxu2  ;;  %v3238_v40 = vpop.f32.mrf.mxu3 }
 0x5b0   : > { %v3216_v30 = vadd.f32 %v3215_v39, %v3193_v32  ;;  %v3282_v28 = vadd.f32 %v3281_v46, %v3259_v4 }
 0x5b2   : > { %v3239_v37 = vadd.f32 %v3238_v40, %v3216_v30 }
 0x5b8   : > { %v3261_v49 = vpop.f32.mrf.mxu0  ;;  %v3284_v50 = vpop.f32.mrf.mxu1 }
 0x5b9   : > { %v3262_v38 = vadd.f32 %v3261_v49, %v3239_v37 }
 0x5bb   : > { %v3304_v62 = vpop.f32.mrf.mxu2  ;;  %v3327_v16 = vpop.f32.mrf.mxu3  ;;  %v3285_v53 = vadd.f32 %v3284_v50, %v3262_v38 }
 0x5bc   : > { %v3305_v51 = vadd.f32 %v3304_v62, %v3282_v28 }
 0x5be   : > { %v3328_v43 = vadd.f32 %v3327_v16, %v3305_v51 }
 0x5c5   : > { %v3307_v5 = vpop.f32.mrf.mxu2  ;;  %v3330_v41 = vpop.f32.mrf.mxu3 }
 0x5c6   : > { %v3308_v14 = vadd.f32 %v3307_v5, %v3285_v53 }
 0x5c8   : > { %v3331_v61 = vadd.f32 %v3330_v41, %v3308_v14 }
 0x5d0   : > { %v3350_v52 = vpop.f32.mrf.mxu0  ;;  %v3373_v17 = vpop.f32.mrf.mxu1 }
 0x5d1   : > { %v3351_v59 = vadd.f32 %v3350_v52, %v3328_v43 }
 0x5d3   : > { %v3374_v63 = vadd.f32 %v3373_v17, %v3351_v59 }
 0x5d8   : > { %v3353_v58 = vpop.f32.mrf.mxu0  ;;  %v3376_v8 = vpop.f32.mrf.mxu1 }
 0x5d9   : > { %v3354_v2 = vadd.f32 %v3353_v58, %v3331_v61 }
 0x5db   : > { %v3377_v9 = vadd.f32 %v3376_v8, %v3354_v2 }
 0x5dc   : > { %v3396_v57 = vpop.f32.mrf.mxu2  ;;  %v3419_v60 = vpop.f32.mrf.mxu3 }
 0x5dd   : > { %v3397_v0 = vadd.f32 %v3396_v57, %v3374_v63 }
 0x5df   : > { %v3420_v45 = vadd.f32 %v3419_v60, %v3397_v0 }
 0x5e1   : > { %v3425_v44 = vsel %vm839_vm2, %v3420_v45, 0.0 }
 0x5e2   : > { %3426 = vadd.xlane.f32.xlu0 %v3425_v44 }
 0x5e4   : > { %v3399_v3 = vpop.f32.mrf.mxu2  ;;  %v3422_v10 = vpop.f32.mrf.mxu3 }
 0x5e5   : > { %v3400_v6 = vadd.f32 %v3399_v3, %v3377_v9 }
 0x5e7   : > { %v3423_v47 = vadd.f32 %v3422_v10, %v3400_v6 }
 0x5e9   : > { %v3428_v11 = vsel %vm839_vm2, %v3423_v47, 0.0 }
 0x5ea   : > { %3429 = vadd.xlane.f32.xlu1 %v3428_v11 }
 0x655   : > { %v3427_v15 = vpop.xlane.xlu0 %3426 }
 0x656   : > { %v3431_v13 = vmul.f32 %v3427_v15, %v4467_v7 }
 0x658   : > { %v3433_v18 = vsub.f32 %v3420_v45, %v3431_v13 }
 0x65a   : > { %v3435_v20 = vmul.f32 %v3433_v18, %v3433_v18 }
 0x65c   : > { %v3437_v21 = vsel %vm839_vm2, %v3435_v20, 0.0 }
 0x65d   : > { %3438 = vadd.xlane.f32.xlu2 %v3437_v21  ;;  %v3430_v23 = vpop.xlane.xlu1 %3429 }
 0x65e   : > { %v3432_v19 = vmul.f32 %v3430_v23, %v4467_v7 }
 0x660   : > { %v3434_v55 = vsub.f32 %v3423_v47, %v3432_v19 }
 0x662   : > { %v3436_v54 = vmul.f32 %v3434_v55, %v3434_v55 }
 0x664   : > { %v3440_v24 = vsel %vm839_vm2, %v3436_v54, 0.0 }
 0x665   : > { %3441 = vadd.xlane.f32.xlu0 %v3440_v24 }
 0x6d0   : > { %v3439_v27 = vpop.xlane.xlu2 %3438 }
 0x6d1   : > { %v3443_v31 = vmul.f32 %v3439_v27, %v4467_v7 }
 0x6d3   : > { %v3445_v12 = vadd.f32 1e-05, %v3443_v31 }
 0x6d5   : > { %3843 = vrsqrt.f32 %v3445_v12  ;;  %vm3453_vm12 = vweird.f32 %v3445_v12 }
 0x6d8   : > { %v3442_v33 = vpop.xlane.xlu0 %3441 }
 0x6d9   : > { %v3444_v35 = vmul.f32 %v3442_v33, %v4467_v7 }
 0x6db   : > { %v3844_v36 = vpop.eup %3843  ;;  %v3446_v29 = vadd.f32 1e-05, %v3444_v35 }
 0x6dc   : > { %v3448_v26 = vmul.f32 %v3844_v36, %v3445_v12  ;;  %vm3454_vm11 = vweird.f32 %v3844_v36 }
 0x6dd   : > { %3845 = vrsqrt.f32 %v3446_v29  ;;  %vm3455_vm13 = vmor %vm3453_vm12, %vm3454_vm11  ;;  %vm3463_vm15 = vweird.f32 %v3446_v29 }
 0x6de   : > { %v3449_v22 = vmul.f32 %v3844_v36, %v3448_v26 }
 0x6e0   : > { %v3450_v56 = vmul.f32 0.5, %v3449_v22 }
 0x6e2   : > { %v3451_v39 = vsub.f32 1.5, %v3450_v56 }
 0x6e3   : > { %v3846_v40 = vpop.eup %3845 }
 0x6e4   : > { %v3452_v42 = vmul.f32 %v3844_v36, %v3451_v39  ;;  %v3458_v25 = vmul.f32 %v3846_v40, %v3446_v29  ;;  %vm3464_vm14 = vweird.f32 %v3846_v40 }
 0x6e5   : > { %vm3465_vm0 = vmor %vm3463_vm15, %vm3464_vm14 }
 0x6e6   : > { %v3456_v1 = vsel %vm3455_vm13, %v3844_v36, %v3452_v42  ;;  %v3459_v34 = vmul.f32 %v3846_v40, %v3458_v25 }
 0x6e7   : > { %v3467_v46 = vmul.f32 %v3456_v1, %v3433_v18 }
 0x6e8   : > { %v3460_v48 = vmul.f32 0.5, %v3459_v34 }
 0x6e9   : > { %3469 = vst.msk [vmem:[#allocation2] sm:$0xff] %vm839_vm2, %v3467_v46 }
 0x6ea   : > { %v3461_v7 = vsub.f32 1.5, %v3460_v48 }
 0x6ec   : > { %v3462_v32 = vmul.f32 %v3846_v40, %v3461_v7 }
 0x6ed   : > { %3474 = sbr.rel (%p3754_p5) target bundleno = 1780 (0x6f4), region = 56 }
 0x6ee   : > { %v3466_v49 = vsel %vm3465_vm0, %v3846_v40, %v3462_v32 }
 0x6ef   : > { %v3468_v62 = vmul.f32 %v3466_v49, %v3434_v55 }
 0x6f1   : > { %3470 = vst.msk [vmem:[#allocation2 + $0x8] sm:$0xff] %vm839_vm2, %v3468_v62 }
 0x6f2   : > { %3475 = vst.msk [vmem:[%s4862_s7] sm:$0xff] %vm839_vm2, %v3467_v46 }
 0x6f3   : > { %3476 = vst.msk [vmem:[%s4862_s7 + $0x8] sm:$0xff] %vm839_vm2, %v3468_v62 }
 0x6f4 PF: > { %s19_s27 = sadd.s32 1, %s3855_s27  }
 0x6f5   : > { %p16_p6 = scmp.ge.s32.totalorder %s19_s27, 8  }
 0x6f7   :  { %18 = sbr.rel (!%p16_p6) target bundleno = 1 (0x1), region = 109 }

</bundles_post_ra>
